<compile_context>
chip_gen: v7x
topology: tpu7x:2x2x1
jax: 0.10.0
libtpu: 0.0.40
codegen_flags: <defaults>
</compile_context>

<pallas_src>
import functools

import jax
import jax.numpy as jnp
from jax import lax
from jax.experimental import pallas as pl
from jax.experimental.pallas import tpu as pltpu


# ----------------------------------------------------------------------------
# Stateless counter-based RNG helpers (plain int32/f32 ops -> lower everywhere)
# ----------------------------------------------------------------------------
def _i32(v):
    """Wrap an unsigned 32-bit constant into the int32 two's-complement range."""
    v &= 0xFFFFFFFF
    return v - (1 << 32) if v >= (1 << 31) else v


_GOLDEN = _i32(0x9E3779B9)     # seed mixing constant
_S1 = _i32(0x632BE5AB)         # stream-1 offset
_S2 = _i32(0x1B873593)         # stream-2 offset
_FMIX_C1 = _i32(0x85EBCA6B)
_FMIX_C2 = _i32(0xC2B2AE35)
_INV_2_24 = 1.0 / 16777216.0


def _shr(x, n):
    """Logical right shift of an int32 tensor by a static amount n."""
    return (x >> n) & ((1 << (32 - n)) - 1)


def _fmix32(x):
    """murmur3 finalizer: int32 in -> well-mixed int32 out (bit level)."""
    x = x ^ _shr(x, 16)
    x = x * _FMIX_C1
    x = x ^ _shr(x, 13)
    x = x * _FMIX_C2
    x = x ^ _shr(x, 16)
    return x


def _bits_to_unit(h, *, open_interval):
    """Top 24 hash bits -> float32 uniform; (0,1) if open_interval else [0,1)."""
    b = _shr(h, 8).astype(jnp.float32)          # exact in f32 (< 2**24)
    if open_interval:
        return (b + 0.5) * _INV_2_24            # safe for log()
    return b * _INV_2_24


def _sin_pi(x):
    """sin(pi*x) for x in [-1, 1]; polynomial approx, |err| ~ 1e-3, VPU-only."""
    y = 4.0 * x * (1.0 - jnp.abs(x))
    return y * (0.775 + 0.225 * jnp.abs(y))


# ----------------------------------------------------------------------------
# Kernel
# ----------------------------------------------------------------------------
def _quant_noise_kernel(seed_ref, w_ref, alpha_ref, out_ref, *,
                        bit, noise_type, clip, tile_o, tile_i, in_features):
    i = pl.program_id(0)                         # row-tile index
    j = pl.program_id(1)                         # col-tile index
    qmax = float(2 ** (bit - 1) - 1)

    # alpha_scale is resident for the whole grid; slice this tile's rows.
    row0 = pl.multiple_of(i * tile_o, tile_o)
    alpha = alpha_ref[pl.ds(row0, tile_o), :].astype(jnp.float32)   # (tile_o, 1)

    # Per-call key; per-element counters are the *global* element indices, so
    # tiles / TensorCores / calls never reuse a stream.
    # TODO(synk): distributionally equivalent to torch.randn/rand but not
    # bit-identical (torch's Philox stream has no Pallas equivalent).
    seed = seed_ref[0]
    key = seed * _GOLDEN

    def counters(ncols):
        rr = lax.broadcasted_iota(jnp.int32, (tile_o, ncols), 0) + i * tile_o
        cc = lax.broadcasted_iota(jnp.int32, (tile_o, ncols), 1) + j * tile_i
        return rr * in_features + cc             # unique per element (mod 2**32)

    def add_noise_and_store(w_tile, w_rand, col_slice):
        w = w_tile.astype(jnp.float32)           # no-op when weights are f32
        if clip:
            out = jnp.where(w >= alpha, alpha,
                            jnp.where(w <= -alpha, -alpha, w + w_rand))
        else:
            out = w + w_rand
        out_ref[:, col_slice] = out.astype(out_ref.dtype)

    if noise_type == "normal":
        # noise = randn()/2 ; fold 0.5 and 1/qmax into a per-row delta_eff.
        delta_eff = alpha * (0.5 / qmax)
        if tile_i % 256 == 0:
            # Box-Muller, consuming BOTH outputs: cos -> left half, sin -> right.
            half = tile_i // 2
            ctr = counters(half)
            u1 = _bits_to_unit(_fmix32(ctr + (key + _S1)), open_interval=True)
            u2 = _bits_to_unit(_fmix32(ctr + (key + _S2)), open_interval=False)
            r = jnp.sqrt(-2.0 * jnp.log(u1))
            a = 2.0 * u2 - 1.0                   # angle / pi, uniform in [-1, 1)
            sin_t = _sin_pi(a)
            ca = 0.5 - a                         # cos(pi*a) = sin(pi*(0.5 - a))
            ca = jnp.where(ca > 1.0, ca - 2.0, ca)
            cos_t = _sin_pi(ca)
            add_noise_and_store(w_ref[:, :half], (r * cos_t) * delta_eff,
                                slice(0, half))
            add_noise_and_store(w_ref[:, half:], (r * sin_t) * delta_eff,
                                slice(half, tile_i))
        else:
            ctr = counters(tile_i)
            u1 = _bits_to_unit(_fmix32(ctr + (key + _S1)), open_interval=True)
            u2 = _bits_to_unit(_fmix32(ctr + (key + _S2)), open_interval=False)
            z = jnp.sqrt(-2.0 * jnp.log(u1)) * _sin_pi(2.0 * u2 - 1.0)
            add_noise_and_store(w_ref[...], z * delta_eff, slice(None))
    elif noise_type == "uniform":
        delta_eff = alpha * (1.0 / qmax)
        ctr = counters(tile_i)
        u = _bits_to_unit(_fmix32(ctr + (key + _S1)), open_interval=False)
        add_noise_and_store(w_ref[...], (u - 0.5) * delta_eff, slice(None))
    else:
        raise ValueError(f"unknown noise_type: {noise_type}")


# ----------------------------------------------------------------------------
# Wrapper
# ----------------------------------------------------------------------------
def _pick_tile(dim, target, quantum):
    """Largest tile <= target that divides dim and is a multiple of quantum,
    falling back to the full dimension (always a legal block shape)."""
    if dim <= target:
        return dim
    t = (target // quantum) * quantum
    while t >= quantum:
        if dim % t == 0:
            return t
        t -= quantum
    return dim


def bit_noise_quant_forward(weight, alpha_scale, seed, *, bit, noise_type,
                            alpha_requires_grad=True, tile_o=None, tile_i=None):
    """BitNoiseQuant.forward(weight) on TPU via Pallas.

    weight:      (out_features, in_features)
    alpha_scale: (out_features, 1)    (module parameter, init = ones)
    seed:        int; selects an independent noise stream (runtime scalar,
                 so different seeds do NOT trigger recompilation)
    bit:         static python int (module stores a tensor; it only enters
                 through 2**(bit-1)-1, so a static int is exact)
    """
    O, I = weight.shape
    assert alpha_scale.shape == (O, 1)

    # dtype-aware sublane quantum: 8 (4B) / 16 (2B) / 32 (1B).
    sub_q = max(8, 32 // jnp.dtype(weight.dtype).itemsize)
    if tile_o is None:
        tile_o = _pick_tile(O, 256, sub_q)
    if tile_i is None:
        tile_i = _pick_tile(I, 2048, 128)
    assert O % tile_o == 0 and I % tile_i == 0

    kernel = functools.partial(
        _quant_noise_kernel, bit=int(bit), noise_type=noise_type,
        clip=alpha_requires_grad, tile_o=tile_o, tile_i=tile_i, in_features=I)

    grid_spec = pltpu.PrefetchScalarGridSpec(
        num_scalar_prefetch=1,                                   # seed -> SMEM
        grid=(O // tile_o, I // tile_i),
        in_specs=[
            pl.BlockSpec((tile_o, tile_i), lambda i, j, seed: (i, j)),  # weight
            pl.BlockSpec((O, 1), lambda i, j, seed: (0, 0)),            # alpha (resident)
        ],
        out_specs=pl.BlockSpec((tile_o, tile_i), lambda i, j, seed: (i, j)),
    )

    return pl.pallas_call(
        kernel,
        out_shape=jax.ShapeDtypeStruct((O, I), weight.dtype),
        grid_spec=grid_spec,
        compiler_params=pltpu.CompilerParams(
            # Stateless RNG + disjoint output tiles -> both axes are parallel
            # (lets v7x shard the grid across its 2 TensorCores).
            dimension_semantics=("parallel", "parallel"),
            vmem_limit_bytes=32 * 1024 * 1024,
        ),
    )(jnp.asarray([seed], jnp.int32), weight, alpha_scale)


# ----------------------------------------------------------------------------
# Demo / self-check
# ----------------------------------------------------------------------------
if __name__ == "__main__":
    out_features, in_features, bit = 128, 512, 4

    key = jax.random.PRNGKey(0)
    weight = jax.random.normal(key, (out_features, in_features), dtype=jnp.float32)
    alpha_scale = jnp.ones((out_features, 1), dtype=jnp.float32)   # __init__ value

    # Default (single large tile) and an explicitly tiled (2x2 grid) run.
    out_n = bit_noise_quant_forward(weight, alpha_scale, seed=0, bit=bit,
                                    noise_type="normal")
    out_n2 = bit_noise_quant_forward(weight, alpha_scale, seed=0, bit=bit,
                                     noise_type="normal", tile_o=64, tile_i=256)
    out_u = bit_noise_quant_forward(weight, alpha_scale, seed=1, bit=bit,
                                    noise_type="uniform")
    out_u2 = bit_noise_quant_forward(weight, alpha_scale, seed=1, bit=bit,
                                     noise_type="uniform", tile_o=64, tile_i=256)
    jax.block_until_ready((out_n, out_n2, out_u, out_u2))

    qmax = 2.0 ** (bit - 1) - 1.0
    alpha = alpha_scale
    delta = alpha / qmax

    for out in (out_n, out_n2, out_u, out_u2):
        assert out.shape == weight.shape
        assert bool(jnp.all(jnp.isfinite(out)))
        # clip branch: |w| >= alpha -> exactly +/- alpha
        assert bool(jnp.all(jnp.where(weight >= alpha, out == alpha, True)))
        assert bool(jnp.all(jnp.where(weight <= -alpha, out == -alpha, True)))

    inside = (weight > -alpha) & (weight < alpha)

    # uniform noise is bounded by delta/2
    err_u = jnp.abs(out_u - weight)
    assert bool(jnp.all(jnp.where(inside, err_u <= 0.5 * delta + 1e-6, True)))
    # counter-based RNG is tiling-independent (same seed -> same noise)
    assert bool(jnp.allclose(out_u, out_u2, atol=1e-6, rtol=0))

    # normal noise statistics on the un-clipped region: std ~ 0.5*delta, mean ~ 0
    noise_n = jnp.where(inside, out_n - weight, 0.0)
    n = jnp.sum(inside).astype(jnp.float32)
    mean = jnp.sum(noise_n) / n
    var = jnp.sum(jnp.where(inside, (noise_n - mean) ** 2, 0.0)) / n
    std = float(jnp.sqrt(var))
    target = 0.5 * float(delta[0, 0])
    assert abs(float(mean)) < 0.1 * target
    assert 0.9 * target < std < 1.1 * target

    print("KERNEL_OK")
</pallas_src>

<mosaic_0001>
module attributes {stable_mosaic.version = 11 : i64} {
  func.func @_quant_noise_kernel(%arg0: i32, %arg1: i32, %arg2: memref<1xi32, #tpu.memory_space<smem>>, %arg3: memref<128x512xf32, #tpu.memory_space<vmem>>, %arg4: memref<128x1xf32, #tpu.memory_space<vmem>>, %arg5: memref<128x512xf32, #tpu.memory_space<vmem>>) attributes {dimension_semantics = [#tpu.dimension_semantics<parallel>, #tpu.dimension_semantics<parallel>], iteration_bounds = array<i64: 1, 1>, scalar_prefetch = 1 : i64, scratch_operands = 0 : i64, tpu.core_type = #tpu.core_type<tc>, window_params = [{transform_indices = @transform_0, window_bounds = array<i64: 128, 512>}, {pipeline_mode = #tpu.pipeline_mode<synchronous>, transform_indices = @transform_1, window_bounds = array<i64: 128, 1>}, {transform_indices = @transform_2, window_bounds = array<i64: 128, 512>}]} {
    %c128_i32 = arith.constant 128 : i32
    %0 = arith.muli %arg0, %c128_i32 : i32
    %1 = tpu.assume_multiple %0, 128 : i32
    %2 = arith.index_cast %1 : i32 to index
    %c0 = arith.constant 0 : index
    %3 = vector.load %arg4[%2, %c0] : memref<128x1xf32, #tpu.memory_space<vmem>>, vector<128x1xf32>
    %c0_0 = arith.constant 0 : index
    %4 = memref.load %arg2[%c0_0] : memref<1xi32, #tpu.memory_space<smem>>
    %c-1640531527_i32 = arith.constant -1640531527 : i32
    %5 = arith.muli %4, %c-1640531527_i32 : i32
    %cst = arith.constant 0.0714285746 : f32
    %6 = vector.broadcast %cst : f32 to vector<128x1xf32>
    %7 = arith.mulf %3, %6 : vector<128x1xf32>
    %8 = tpu.iota {dimensions = array<i32: 0>} : vector<128x256xi32>
    %c128_i32_1 = arith.constant 128 : i32
    %9 = arith.muli %arg0, %c128_i32_1 : i32
    %10 = vector.broadcast %9 : i32 to vector<128x256xi32>
    %11 = arith.addi %8, %10 : vector<128x256xi32>
    %12 = tpu.iota {dimensions = array<i32: 1>} : vector<128x256xi32>
    %c512_i32 = arith.constant 512 : i32
    %13 = arith.muli %arg1, %c512_i32 : i32
    %14 = vector.broadcast %13 : i32 to vector<128x256xi32>
    %15 = arith.addi %12, %14 : vector<128x256xi32>
    %c512_i32_2 = arith.constant 512 : i32
    %16 = vector.broadcast %c512_i32_2 : i32 to vector<128x256xi32>
    %17 = arith.muli %11, %16 : vector<128x256xi32>
    %18 = arith.addi %17, %15 : vector<128x256xi32>
    %c1663821227_i32 = arith.constant 1663821227 : i32
    %19 = arith.addi %5, %c1663821227_i32 : i32
    %20 = vector.broadcast %19 : i32 to vector<128x256xi32>
    %21 = arith.addi %18, %20 : vector<128x256xi32>
    %c16_i32 = arith.constant 16 : i32
    %22 = vector.broadcast %c16_i32 : i32 to vector<128x256xi32>
    %23 = arith.shrsi %21, %22 : vector<128x256xi32>
    %c65535_i32 = arith.constant 65535 : i32
    %24 = vector.broadcast %c65535_i32 : i32 to vector<128x256xi32>
    %25 = arith.andi %23, %24 : vector<128x256xi32>
    %26 = arith.xori %21, %25 : vector<128x256xi32>
    %c-2048144789_i32 = arith.constant -2048144789 : i32
    %27 = vector.broadcast %c-2048144789_i32 : i32 to vector<128x256xi32>
    %28 = arith.muli %26, %27 : vector<128x256xi32>
    %c13_i32 = arith.constant 13 : i32
    %29 = vector.broadcast %c13_i32 : i32 to vector<128x256xi32>
    %30 = arith.shrsi %28, %29 : vector<128x256xi32>
    %c524287_i32 = arith.constant 524287 : i32
    %31 = vector.broadcast %c524287_i32 : i32 to vector<128x256xi32>
    %32 = arith.andi %30, %31 : vector<128x256xi32>
    %33 = arith.xori %28, %32 : vector<128x256xi32>
    %c-1028477387_i32 = arith.constant -1028477387 : i32
    %34 = vector.broadcast %c-1028477387_i32 : i32 to vector<128x256xi32>
    %35 = arith.muli %33, %34 : vector<128x256xi32>
    %c16_i32_3 = arith.constant 16 : i32
    %36 = vector.broadcast %c16_i32_3 : i32 to vector<128x256xi32>
    %37 = arith.shrsi %35, %36 : vector<128x256xi32>
    %c65535_i32_4 = arith.constant 65535 : i32
    %38 = vector.broadcast %c65535_i32_4 : i32 to vector<128x256xi32>
    %39 = arith.andi %37, %38 : vector<128x256xi32>
    %40 = arith.xori %35, %39 : vector<128x256xi32>
    %c8_i32 = arith.constant 8 : i32
    %41 = vector.broadcast %c8_i32 : i32 to vector<128x256xi32>
    %42 = arith.shrsi %40, %41 : vector<128x256xi32>
    %c16777215_i32 = arith.constant 16777215 : i32
    %43 = vector.broadcast %c16777215_i32 : i32 to vector<128x256xi32>
    %44 = arith.andi %42, %43 : vector<128x256xi32>
    %45 = arith.sitofp %44 : vector<128x256xi32> to vector<128x256xf32>
    %cst_5 = arith.constant 5.000000e-01 : f32
    %46 = vector.broadcast %cst_5 : f32 to vector<128x256xf32>
    %47 = arith.addf %45, %46 : vector<128x256xf32>
    %cst_6 = arith.constant 5.96046448E-8 : f32
    %48 = vector.broadcast %cst_6 : f32 to vector<128x256xf32>
    %49 = arith.mulf %47, %48 : vector<128x256xf32>
    %c461845907_i32 = arith.constant 461845907 : i32
    %50 = arith.addi %5, %c461845907_i32 : i32
    %51 = vector.broadcast %50 : i32 to vector<128x256xi32>
    %52 = arith.addi %18, %51 : vector<128x256xi32>
    %c16_i32_7 = arith.constant 16 : i32
    %53 = vector.broadcast %c16_i32_7 : i32 to vector<128x256xi32>
    %54 = arith.shrsi %52, %53 : vector<128x256xi32>
    %c65535_i32_8 = arith.constant 65535 : i32
    %55 = vector.broadcast %c65535_i32_8 : i32 to vector<128x256xi32>
    %56 = arith.andi %54, %55 : vector<128x256xi32>
    %57 = arith.xori %52, %56 : vector<128x256xi32>
    %c-2048144789_i32_9 = arith.constant -2048144789 : i32
    %58 = vector.broadcast %c-2048144789_i32_9 : i32 to vector<128x256xi32>
    %59 = arith.muli %57, %58 : vector<128x256xi32>
    %c13_i32_10 = arith.constant 13 : i32
    %60 = vector.broadcast %c13_i32_10 : i32 to vector<128x256xi32>
    %61 = arith.shrsi %59, %60 : vector<128x256xi32>
    %c524287_i32_11 = arith.constant 524287 : i32
    %62 = vector.broadcast %c524287_i32_11 : i32 to vector<128x256xi32>
    %63 = arith.andi %61, %62 : vector<128x256xi32>
    %64 = arith.xori %59, %63 : vector<128x256xi32>
    %c-1028477387_i32_12 = arith.constant -1028477387 : i32
    %65 = vector.broadcast %c-1028477387_i32_12 : i32 to vector<128x256xi32>
    %66 = arith.muli %64, %65 : vector<128x256xi32>
    %c16_i32_13 = arith.constant 16 : i32
    %67 = vector.broadcast %c16_i32_13 : i32 to vector<128x256xi32>
    %68 = arith.shrsi %66, %67 : vector<128x256xi32>
    %c65535_i32_14 = arith.constant 65535 : i32
    %69 = vector.broadcast %c65535_i32_14 : i32 to vector<128x256xi32>
    %70 = arith.andi %68, %69 : vector<128x256xi32>
    %71 = arith.xori %66, %70 : vector<128x256xi32>
    %c8_i32_15 = arith.constant 8 : i32
    %72 = vector.broadcast %c8_i32_15 : i32 to vector<128x256xi32>
    %73 = arith.shrsi %71, %72 : vector<128x256xi32>
    %c16777215_i32_16 = arith.constant 16777215 : i32
    %74 = vector.broadcast %c16777215_i32_16 : i32 to vector<128x256xi32>
    %75 = arith.andi %73, %74 : vector<128x256xi32>
    %76 = arith.sitofp %75 : vector<128x256xi32> to vector<128x256xf32>
    %cst_17 = arith.constant 5.96046448E-8 : f32
    %77 = vector.broadcast %cst_17 : f32 to vector<128x256xf32>
    %78 = arith.mulf %76, %77 : vector<128x256xf32>
    %79 = math.log %49 : vector<128x256xf32>
    %cst_18 = arith.constant -2.000000e+00 : f32
    %80 = vector.broadcast %cst_18 : f32 to vector<128x256xf32>
    %81 = arith.mulf %80, %79 : vector<128x256xf32>
    %82 = math.sqrt %81 : vector<128x256xf32>
    %cst_19 = arith.constant 2.000000e+00 : f32
    %83 = vector.broadcast %cst_19 : f32 to vector<128x256xf32>
    %84 = arith.mulf %83, %78 : vector<128x256xf32>
    %cst_20 = arith.constant 1.000000e+00 : f32
    %85 = vector.broadcast %cst_20 : f32 to vector<128x256xf32>
    %86 = arith.subf %84, %85 : vector<128x256xf32>
    %cst_21 = arith.constant 4.000000e+00 : f32
    %87 = vector.broadcast %cst_21 : f32 to vector<128x256xf32>
    %88 = arith.mulf %87, %86 : vector<128x256xf32>
    %89 = math.absf %86 : vector<128x256xf32>
    %cst_22 = arith.constant 1.000000e+00 : f32
    %90 = vector.broadcast %cst_22 : f32 to vector<128x256xf32>
    %91 = arith.subf %90, %89 : vector<128x256xf32>
    %92 = arith.mulf %88, %91 : vector<128x256xf32>
    %93 = math.absf %92 : vector<128x256xf32>
    %cst_23 = arith.constant 2.250000e-01 : f32
    %94 = vector.broadcast %cst_23 : f32 to vector<128x256xf32>
    %95 = arith.mulf %94, %93 : vector<128x256xf32>
    %cst_24 = arith.constant 0.774999976 : f32
    %96 = vector.broadcast %cst_24 : f32 to vector<128x256xf32>
    %97 = arith.addf %96, %95 : vector<128x256xf32>
    %98 = arith.mulf %92, %97 : vector<128x256xf32>
    %cst_25 = arith.constant 5.000000e-01 : f32
    %99 = vector.broadcast %cst_25 : f32 to vector<128x256xf32>
    %100 = arith.subf %99, %86 : vector<128x256xf32>
    %cst_26 = arith.constant 1.000000e+00 : f32
    %101 = vector.broadcast %cst_26 : f32 to vector<128x256xf32>
    %102 = arith.cmpf ogt, %100, %101 : vector<128x256xf32>
    %cst_27 = arith.constant 2.000000e+00 : f32
    %103 = vector.broadcast %cst_27 : f32 to vector<128x256xf32>
    %104 = arith.subf %100, %103 : vector<128x256xf32>
    %105 = arith.select %102, %104, %100 : vector<128x256xi1>, vector<128x256xf32>
    %cst_28 = arith.constant 4.000000e+00 : f32
    %106 = vector.broadcast %cst_28 : f32 to vector<128x256xf32>
    %107 = arith.mulf %106, %105 : vector<128x256xf32>
    %108 = math.absf %105 : vector<128x256xf32>
    %cst_29 = arith.constant 1.000000e+00 : f32
    %109 = vector.broadcast %cst_29 : f32 to vector<128x256xf32>
    %110 = arith.subf %109, %108 : vector<128x256xf32>
    %111 = arith.mulf %107, %110 : vector<128x256xf32>
    %112 = math.absf %111 : vector<128x256xf32>
    %cst_30 = arith.constant 2.250000e-01 : f32
    %113 = vector.broadcast %cst_30 : f32 to vector<128x256xf32>
    %114 = arith.mulf %113, %112 : vector<128x256xf32>
    %cst_31 = arith.constant 0.774999976 : f32
    %115 = vector.broadcast %cst_31 : f32 to vector<128x256xf32>
    %116 = arith.addf %115, %114 : vector<128x256xf32>
    %117 = arith.mulf %111, %116 : vector<128x256xf32>
    %c0_32 = arith.constant 0 : index
    %c0_33 = arith.constant 0 : index
    %118 = vector.load %arg3[%c0_32, %c0_33] : memref<128x512xf32, #tpu.memory_space<vmem>>, vector<128x256xf32>
    %119 = arith.mulf %82, %117 : vector<128x256xf32>
    %120 = vector.broadcast %7 : vector<128x1xf32> to vector<128x256xf32>
    %121 = arith.mulf %119, %120 : vector<128x256xf32>
    %122 = vector.broadcast %3 : vector<128x1xf32> to vector<128x256xf32>
    %123 = arith.cmpf oge, %118, %122 : vector<128x256xf32>
    %cst_34 = arith.constant 0.000000e+00 : f32
    %124 = vector.broadcast %cst_34 : f32 to vector<128x1xf32>
    %125 = arith.subf %124, %3 : vector<128x1xf32>
    %126 = vector.broadcast %125 : vector<128x1xf32> to vector<128x256xf32>
    %127 = arith.cmpf ole, %118, %126 : vector<128x256xf32>
    %cst_35 = arith.constant 0.000000e+00 : f32
    %128 = vector.broadcast %cst_35 : f32 to vector<128x1xf32>
    %129 = arith.subf %128, %3 : vector<128x1xf32>
    %130 = arith.addf %118, %121 : vector<128x256xf32>
    %131 = vector.shape_cast %129 : vector<128x1xf32> to vector<128x1xf32>
    %132 = vector.broadcast %131 : vector<128x1xf32> to vector<128x256xf32>
    %133 = arith.select %127, %132, %130 : vector<128x256xi1>, vector<128x256xf32>
    %134 = vector.shape_cast %3 : vector<128x1xf32> to vector<128x1xf32>
    %135 = vector.broadcast %134 : vector<128x1xf32> to vector<128x256xf32>
    %136 = arith.select %123, %135, %133 : vector<128x256xi1>, vector<128x256xf32>
    %c0_36 = arith.constant 0 : index
    %c0_37 = arith.constant 0 : index
    %137 = vector.load %arg5[%c0_36, %c0_37] : memref<128x512xf32, #tpu.memory_space<vmem>>, vector<128x256xf32>
    tpu.vector_store %arg5[%c0_36, %c0_37], %136 {strides = array<i32>} : memref<128x512xf32, #tpu.memory_space<vmem>>, vector<128x256xf32>,
    %c0_38 = arith.constant 0 : index
    %c256 = arith.constant 256 : index
    %138 = vector.load %arg3[%c0_38, %c256] : memref<128x512xf32, #tpu.memory_space<vmem>>, vector<128x256xf32>
    %139 = arith.mulf %82, %98 : vector<128x256xf32>
    %140 = vector.broadcast %7 : vector<128x1xf32> to vector<128x256xf32>
    %141 = arith.mulf %139, %140 : vector<128x256xf32>
    %142 = vector.broadcast %3 : vector<128x1xf32> to vector<128x256xf32>
    %143 = arith.cmpf oge, %138, %142 : vector<128x256xf32>
    %cst_39 = arith.constant 0.000000e+00 : f32
    %144 = vector.broadcast %cst_39 : f32 to vector<128x1xf32>
    %145 = arith.subf %144, %3 : vector<128x1xf32>
    %146 = vector.broadcast %145 : vector<128x1xf32> to vector<128x256xf32>
    %147 = arith.cmpf ole, %138, %146 : vector<128x256xf32>
    %cst_40 = arith.constant 0.000000e+00 : f32
    %148 = vector.broadcast %cst_40 : f32 to vector<128x1xf32>
    %149 = arith.subf %148, %3 : vector<128x1xf32>
    %150 = arith.addf %138, %141 : vector<128x256xf32>
    %151 = vector.shape_cast %149 : vector<128x1xf32> to vector<128x1xf32>
    %152 = vector.broadcast %151 : vector<128x1xf32> to vector<128x256xf32>
    %153 = arith.select %147, %152, %150 : vector<128x256xi1>, vector<128x256xf32>
    %154 = vector.shape_cast %3 : vector<128x1xf32> to vector<128x1xf32>
    %155 = vector.broadcast %154 : vector<128x1xf32> to vector<128x256xf32>
    %156 = arith.select %143, %155, %153 : vector<128x256xi1>, vector<128x256xf32>
    %c0_41 = arith.constant 0 : index
    %c256_42 = arith.constant 256 : index
    %157 = vector.load %arg5[%c0_41, %c256_42] : memref<128x512xf32, #tpu.memory_space<vmem>>, vector<128x256xf32>
    tpu.vector_store %arg5[%c0_41, %c256_42], %156 {strides = array<i32>} : memref<128x512xf32, #tpu.memory_space<vmem>>, vector<128x256xf32>,
    return
  }
  func.func @transform_0(%arg0: i32, %arg1: i32, %arg2: memref<1xi32, #tpu.memory_space<smem>>) -> (i32, i32) {
    %c0_i32 = arith.constant 0 : i32
    return %arg0, %arg1 : i32, i32
  }
  func.func @transform_1(%arg0: i32, %arg1: i32, %arg2: memref<1xi32, #tpu.memory_space<smem>>) -> (i32, i32) {
    %c0_i32 = arith.constant 0 : i32
    %c0_i32_0 = arith.constant 0 : i32
    %c0_i32_1 = arith.constant 0 : i32
    return %c0_i32, %c0_i32_0 : i32, i32
  }
  func.func @transform_2(%arg0: i32, %arg1: i32, %arg2: memref<1xi32, #tpu.memory_space<smem>>) -> (i32, i32) {
    %c0_i32 = arith.constant 0 : i32
    return %arg0, %arg1 : i32, i32
  }
}

</mosaic_0001>

<bundles_post_ra>
// kernel: tpu_custom_call.1
= control target key start
LH: loop header
LB: loop body
LE: loop exit
PB: predicated region body
PF: predicated region fallthrough
CT: control target
= control target key end

     0   :  { %9 = vsyncpa [#allocation5], 0  ;;  %s5692_s0 = inlined_call_operand.<no memory space> [shape: s32[1], index: 0, kind: input, shape index: {}]   ;;  %s5693_s1 = inlined_call_operand.hbm [shape: f32[128,512], index: 1, kind: input, shape index: {}]   ;;  %s5694_s2 = inlined_call_operand.vmem [shape: f32[128,1], index: 2, kind: input, shape index: {}]   ;;  %s5695_s3 = inlined_call_operand.hbm [shape: f32[128,512], index: 3, kind: output, shape index: {}]  }
   0x1   :  { %10 = vsyncpa [#allocation6], 0  ;;  %s3637_s12 = smov [#allocation4]   ;;  %s3589_s16 = scalar_lea.hbm %s5693_s1, 8192 }
   0x2   :  { %s16_s13 = sshll.u32 %s3637_s12, 4  ;;  %p3590_p0 = scmp.ne.s32.totalorder %s5693_s1, %s3589_s16  ;;  %s17_s13 = int_to_ptr.vmem [resolvable:$true] %s16_s13 }
   0x3   :  { %p3593_p1 = scmp.lt.u32.totalorder %s3589_s16, %s5693_s1 }
   0x5   :  { %p3595_p2 = pnand %p3593_p1, %p3590_p0 }
   0x7   :  { %3598 = shalt.err (!%p3595_p2)
}
   0x8   :  { %s3599_s21 = scalar_lea.vmem %s17_s13, 8192  ;;  %p3604_p4 = scmp.lt.s32.totalorder %s17_s13, %s17_s13 }
   0x9   :  { %p3600_p3 = scmp.ne.s32.totalorder %s17_s13, %s3599_s21  ;;  %p3605_p5 = scmp.lt.s32.totalorder %s3599_s21, %s3599_s21 }
   0xb   :  { %p3606_p6 = por %p3605_p5, %p3604_p4 }
   0xd   :  { %p3607_p7 = pnand %p3606_p6, %p3600_p3 }
   0xf   :  { %3610 = shalt.err (!%p3607_p7)
}
  0x10   :  { %s3638_s22 = smov 512   ;;  %s3639_s23 = smov 32  }
  0x11   :  { %22 = dma.hbm_to_vmem [thread:$0]  %s5693_s1, 8192, %s17_s13, [#allocation5], %s3638_s22, %s3638_s22, %s3639_s23  }
  0x12   :  { %3633 = dma.done.wait [#allocation5], 8192  }
  0x13   :  { %3634 = vsyncadd [#allocation5], 4294959104  ;;  %v64_v0 = vlaneseq  ;;  %v3640_v1 = vmov 0   ;;  %s47_s28 = smul.u32 2654435769, %s5692_s0  ;;  %v3691_v7 = vld [vmem:[%s5694_s2 + $0x10] sm:$0xff] }
  0x14   :  { %3412 = vset.pattern.permute.xlu1 %v3640_v1  ;;  %3411 = vset.pattern.permute.xlu0 %v3640_v1  ;;  %v3696_v8 = vld [vmem:[%s5694_s2] sm:$0xff]  ;;  %v3701_v9 = vld [vmem:[%s5694_s2 + $0x18] sm:$0xff]  ;;  %v50_v11 = vmul.f32 0.071428575, %v3691_v7  ;;  %v3709_v13 = vld [vmem:[%s5694_s2 + $0x8] sm:$0xff] }
  0x15   :  { %v3677_v2 = vshrl.u32 %v64_v0, 7  ;;  %v3679_v3 = vand.u32 127, %v64_v0  ;;  %s153_s0 = sadd.s32 1663821227, %s47_s28  ;;  %v48_v12 = vmul.f32 0.071428575, %v3696_v8 }
  0x16   :  { %s699_s7 = sadd.s32 461845907, %s47_s28  ;;  %2313 = vperm.xlu1 %3412, %v50_v11   ;;  %v51_v15 = vmul.f32 0.071428575, %v3701_v9  ;;  %v49_v16 = vmul.f32 0.071428575, %v3709_v13  ;;  %v3715_v18 = vstv %s153_s0 }
  0x17   :  { %v67_v4 = vadd.s32 16, %v3677_v2  ;;  %v3686_v5 = vadd.s32 128, %v3679_v3  ;;  %v105_v10 = vmul.u32 512, %v3677_v2  ;;  %2303 = vperm.xlu0 %3411, %v48_v12   ;;  %v3720_v19 = vld [vmem:[%s5694_s2 + $0x28] sm:$0xff]  ;;  %v3725_v20 = vld [vmem:[%s5694_s2 + $0x20] sm:$0xff]  ;;  %v3727_v21 = vstv %s699_s7  ;;  %v3737_v27 = vld [vmem:[%s5694_s2 + $0x38] sm:$0xff] }
  0x18   :  { %v53_v25 = vmul.f32 0.071428575, %v3720_v19  ;;  %v52_v26 = vmul.f32 0.071428575, %v3725_v20  ;;  %v3742_v28 = vld [vmem:[%s5694_s2 + $0x30] sm:$0xff]  ;;  %v3749_v31 = vld [vmem:[%s5694_s2 + $0x48] sm:$0xff] }
  0x19   :  { %v107_v6 = vmul.u32 512, %v67_v4  ;;  %v121_v22 = vadd.s32 %v105_v10, %v3679_v3  ;;  %v122_v23 = vadd.s32 %v105_v10, %v3686_v5  ;;  %v55_v36 = vmul.f32 0.071428575, %v3737_v27  ;;  %v3761_v40 = vld [vmem:[%s5694_s2 + $0x40] sm:$0xff]  ;;  %v3768_v55 = vld [vmem:[%s5694_s2 + $0x58] sm:$0xff]  ;;  %v3773_v60 = vld [vmem:[%s5694_s2 + $0x50] sm:$0xff] }
  0x1a   :  { %2318 = vperm.xlu1 %3412, %v51_v15   ;;  %v54_v37 = vmul.f32 0.071428575, %v3742_v28  ;;  %v57_v39 = vmul.f32 0.071428575, %v3749_v31  ;;  %v56_v51 = vmul.f32 0.071428575, %v3761_v40 }
  0x1b   :  { %v125_v14 = vadd.s32 %v107_v6, %v3679_v3  ;;  %v126_v17 = vadd.s32 %v107_v6, %v3686_v5  ;;  %2308 = vperm.xlu0 %3411, %v49_v16   ;;  %v155_v33 = vadd.s32 %v3715_v18, %v121_v22  ;;  %v156_v34 = vadd.s32 %v3715_v18, %v122_v23  ;;  %v3780_v15 = vld [vmem:[%s5694_s2 + $0x68] sm:$0xff] }
  0x1c   :  { %v701_v35 = vadd.s32 %v3727_v21, %v121_v22  ;;  %v702_v49 = vadd.s32 %v3727_v21, %v122_v23  ;;  %v59_v10 = vmul.f32 0.071428575, %v3768_v55  ;;  %v3785_v23 = vld [vmem:[%s5694_s2 + $0x60] sm:$0xff] }
  0x1d   :  { %v159_v24 = vadd.s32 %v3715_v18, %v125_v14  ;;  %v160_v29 = vadd.s32 %v3715_v18, %v126_v17  ;;  %v705_v30 = vadd.s32 %v3727_v21, %v125_v14  ;;  %v706_v32 = vadd.s32 %v3727_v21, %v126_v17 }
  0x1e   :  { %2328 = vperm.xlu1 %3412, %v53_v25   ;;  %v3086_v45 = vshrl.u32 %v155_v33, 16  ;;  %v3087_v46 = vshrl.u32 %v156_v34, 16  ;;  %v3214_v50 = vshrl.u32 %v701_v35, 16  ;;  %v3215_v58 = vshrl.u32 %v702_v49, 16 }
  0x1f   :  { %v3090_v38 = vshrl.u32 %v159_v24, 16  ;;  %2323 = vperm.xlu0 %3411, %v52_v26   ;;  %v3091_v41 = vshrl.u32 %v160_v29, 16  ;;  %v3218_v42 = vshrl.u32 %v705_v30, 16  ;;  %v3219_v44 = vshrl.u32 %v706_v32, 16 }
  0x20   :  { %v251_v54 = vxor.u32 %v3086_v45, %v155_v33  ;;  %v797_v59 = vxor.u32 %v3214_v50, %v701_v35  ;;  %v252_v63 = vxor.u32 %v3087_v46, %v156_v34  ;;  %v798_v6 = vxor.u32 %v3215_v58, %v702_v49 }
  0x21   :  { %v255_v43 = vxor.u32 %v3090_v38, %v159_v24  ;;  %v256_v47 = vxor.u32 %v3091_v41, %v160_v29  ;;  %v801_v48 = vxor.u32 %v3218_v42, %v705_v30  ;;  %v802_v53 = vxor.u32 %v3219_v44, %v706_v32  ;;  %v3797_v41 = vld [vmem:[%s5694_s2 + $0x70] sm:$0xff] }
  0x22   :  { %2338 = vperm.xlu1 %3412, %v55_v36   ;;  %v283_v0 = vmul.u32 2246822507, %v251_v54  ;;  %v58_v14 = vmul.f32 0.071428575, %v3773_v60  ;;  %v829_v22 = vmul.u32 2246822507, %v797_v59 }
  0x23   :  { %v287_v52 = vmul.u32 2246822507, %v255_v43  ;;  %2333 = vperm.xlu0 %3411, %v54_v37   ;;  %v288_v56 = vmul.u32 2246822507, %v256_v47  ;;  %v61_v32 = vmul.f32 0.071428575, %v3780_v15 }
  0x24   :  { %v833_v57 = vmul.u32 2246822507, %v801_v48  ;;  %v834_v62 = vmul.u32 2246822507, %v802_v53  ;;  %v3118_v17 = vshrl.u32 %v283_v0, 13  ;;  %v3792_v36 = vld [vmem:[%s5694_s2 + $0x78] sm:$0xff] }
  0x25   :  { %v3122_v61 = vshrl.u32 %v287_v52, 13  ;;  %v3123_v1 = vshrl.u32 %v288_v56, 13  ;;  %v284_v26 = vmul.u32 2246822507, %v252_v63  ;;  %v830_v30 = vmul.u32 2246822507, %v798_v6 }
  0x26   :  { %v3250_v4 = vshrl.u32 %v833_v57, 13  ;;  %v3251_v12 = vshrl.u32 %v834_v62, 13  ;;  %2348 = vperm.xlu1 %3412, %v57_v39   ;;  %v60_v35 = vmul.f32 0.071428575, %v3785_v23  ;;  %v379_v38 = vxor.u32 %v3118_v17, %v283_v0  ;;  %s3641_s2 = smov [#allocation7]  }
  0x27   :  { %v383_v11 = vxor.u32 %v3122_v61, %v287_v52  ;;  %2343 = vperm.xlu0 %3411, %v56_v51   ;;  %v384_v24 = vxor.u32 %v3123_v1, %v288_v56  ;;  %v3246_v39 = vshrl.u32 %v829_v22, 13  ;;  %v3119_v45 = vshrl.u32 %v284_v26, 13  ;;  %s3074_s7 = sshll.u32 %s3641_s2, 4  ;;  %s3075_s7 = int_to_ptr.vmem [resolvable:$true] %s3074_s7 }
  0x28   :  { %v929_v16 = vxor.u32 %v3250_v4, %v833_v57  ;;  %v930_v25 = vxor.u32 %v3251_v12, %v834_v62  ;;  %v3247_v46 = vshrl.u32 %v830_v30, 13  ;;  %v63_v47 = vmul.f32 0.071428575, %v3792_v36  ;;  %s3611_s8 = scalar_lea.vmem %s3075_s7, 8192  ;;  %p3616_p9 = scmp.lt.s32.totalorder %s3075_s7, %s3075_s7 }
  0x29   :  { %v415_v33 = vmul.u32 3266489909, %v383_v11  ;;  %v416_v42 = vmul.u32 3266489909, %v384_v24  ;;  %v62_v50 = vmul.f32 0.071428575, %v3797_v41  ;;  %v925_v53 = vxor.u32 %v3246_v39, %v829_v22  ;;  %p3612_p8 = scmp.ne.s32.totalorder %s3075_s7, %s3611_s8  ;;  %p3617_p10 = scmp.lt.s32.totalorder %s3611_s8, %s3611_s8 }
  0x2a   :  { %v961_v29 = vmul.u32 3266489909, %v929_v16  ;;  %v962_v34 = vmul.u32 3266489909, %v930_v25  ;;  %2358 = vperm.xlu1 %3412, %v59_v10   ;;  %v380_v56 = vxor.u32 %v3119_v45, %v284_v26  ;;  %v926_v57 = vxor.u32 %v3247_v46, %v830_v30 }
  0x2b   :  { %2353 = vperm.xlu0 %3411, %v58_v14   ;;  %v3154_v48 = vshrl.u32 %v415_v33, 16  ;;  %v411_v52 = vmul.u32 3266489909, %v379_v38  ;;  %v3155_v54 = vshrl.u32 %v416_v42, 16  ;;  %v957_v63 = vmul.u32 3266489909, %v925_v53  ;;  %p3618_p11 = por %p3617_p10, %p3616_p9 }
  0x2c   :  { %v3282_v37 = vshrl.u32 %v961_v29, 16  ;;  %v3283_v43 = vshrl.u32 %v962_v34, 16  ;;  %v412_v1 = vmul.u32 3266489909, %v380_v56  ;;  %v958_v4 = vmul.u32 3266489909, %v926_v57 }
  0x2d   :  { %v511_v58 = vxor.u32 %v3154_v48, %v415_v33  ;;  %v3150_v62 = vshrl.u32 %v411_v52, 16  ;;  %v512_v0 = vxor.u32 %v3155_v54, %v416_v42  ;;  %v3278_v14 = vshrl.u32 %v957_v63, 16  ;;  %p3619_p12 = pnand %p3618_p11, %p3612_p8 }
  0x2e   :  { %v1057_v44 = vxor.u32 %v3282_v37, %v961_v29  ;;  %v1058_v49 = vxor.u32 %v3283_v43, %v962_v34  ;;  %2368 = vperm.xlu1 %3412, %v61_v32   ;;  %v3151_v17 = vshrl.u32 %v412_v1, 16  ;;  %v3279_v22 = vshrl.u32 %v958_v4, 16 }
  0x2f   :  { %2363 = vperm.xlu0 %3411, %v60_v35   ;;  %v3186_v6 = vshrl.u32 %v511_v58, 8  ;;  %v507_v12 = vxor.u32 %v3150_v62, %v411_v52  ;;  %v3187_v16 = vshrl.u32 %v512_v0, 8  ;;  %v1053_v30 = vxor.u32 %v3278_v14, %v957_v63 }
  0x30   :  { %v3314_v51 = vshrl.u32 %v1057_v44, 8  ;;  %v3315_v59 = vshrl.u32 %v1058_v49, 8  ;;  %v508_v33 = vxor.u32 %v3151_v17, %v412_v1  ;;  %v1054_v34 = vxor.u32 %v3279_v22, %v958_v4 }
  0x31   :  { %v607_v24 = vcvt.s32.f32 %v3186_v6  ;;  %v3182_v29 = vshrl.u32 %v507_v12, 8  ;;  %v608_v32 = vcvt.s32.f32 %v3187_v16  ;;  %v68_v38 = vadd.s32 24, %v3677_v2 }
  0x32   :  { %2378 = vperm.xlu1 %3412, %v63_v47   ;;  %v1153_v61 = vcvt.s32.f32 %v3314_v51  ;;  %v1154_v10 = vcvt.s32.f32 %v3315_v59  ;;  %v3807_v39 = vadd.s32 8, %v3677_v2  ;;  %v3310_v44 = vshrl.u32 %v1053_v30, 8 }
  0x33   :  { %2373 = vperm.xlu0 %3411, %v62_v50   ;;  %v639_v35 = vadd.f32 0.5, %v607_v24  ;;  %v603_v43 = vcvt.s32.f32 %v3182_v29  ;;  %v3812_v45 = vadd.s32 40, %v3677_v2  ;;  %v640_v46 = vadd.f32 0.5, %v608_v32 }
  0x34   :  { %v1185_v11 = vmul.f32 5.9604645e-08, %v1153_v61  ;;  %v1186_v25 = vmul.f32 5.9604645e-08, %v1154_v10  ;;  %v3183_v47 = vshrl.u32 %v508_v33, 8  ;;  %v3311_v48 = vshrl.u32 %v1054_v34, 8 }
  0x35   :  { %v3815_v49 = vadd.s32 32, %v3677_v2  ;;  %v671_v50 = vmul.f32 5.9604645e-08, %v639_v35  ;;  %v108_v52 = vmul.u32 512, %v68_v38  ;;  %v106_v53 = vmul.u32 512, %v3807_v39 }
  0x36   :  { %2420 = vperm.xlu1 %3412, %v3709_v13   ;;  %v1537_v26 = vmul.f32 2.0, %v1185_v11  ;;  %v1538_v37 = vmul.f32 2.0, %v1186_v25  ;;  %v635_v56 = vadd.f32 0.5, %v603_v43  ;;  %v1149_v57 = vcvt.s32.f32 %v3310_v44 }
  0x37   :  { %2415 = vperm.xlu0 %3411, %v3696_v8   ;;  %v2525_v59 = vsub.f32 0.0, %v3696_v8  ;;  %v2527_v61 = vsub.f32 0.0, %v3691_v7  ;;  %v672_v62 = vmul.f32 5.9604645e-08, %v640_v46  ;;  %v2528_v0 = vsub.f32 0.0, %v3701_v9 }
  0x38   :  { %v3346_v42 = vadd.f32 -1.0, %v1537_v26  ;;  %v3347_v51 = vadd.f32 -1.0, %v1538_v37  ;;  %v604_v4 = vcvt.s32.f32 %v3183_v47  ;;  %v1150_v6 = vcvt.s32.f32 %v3311_v48 }
  0x39   :  { %v2526_v10 = vsub.f32 0.0, %v3709_v13  ;;  %v2529_v11 = vsub.f32 0.0, %v3725_v20  ;;  %3413 = vlog2.f32 %v671_v50  ;;  %v2530_v14 = vsub.f32 0.0, %v3720_v19 }
  0x3a   :  { %2430 = vperm.xlu1 %3412, %v3701_v9   ;;  %v1857_v54 = vsub.f32 0.5, %v3346_v42  ;;  %v1633_v63 = vand.u32 2147483647, %v3346_v42  ;;  %v1634_v1 = vand.u32 2147483647, %v3347_v51  ;;  %v1858_v12 = vsub.f32 0.5, %v3347_v51 }
  0x3b   :  { %2425 = vperm.xlu0 %3411, %v3691_v7   ;;  %v667_v17 = vmul.f32 5.9604645e-08, %v635_v56  ;;  %v1181_v22 = vmul.f32 5.9604645e-08, %v1149_v57  ;;  %3415 = vlog2.f32 %v672_v62  ;;  %v1601_v24 = vmul.f32 4.0, %v3346_v42 }
  0x3c   :  { %v3378_v16 = vadd.f32 -2.0, %v1857_v54  ;;  %v1665_v25 = vsub.f32 1.0, %v1633_v63  ;;  %vm1889_vm0 = vcmp.gt.f32.partialorder %v1857_v54, 1.0  ;;  %v1602_v26 = vmul.f32 4.0, %v3347_v51 }
  0x3d   :  { %v1666_v29 = vsub.f32 1.0, %v1634_v1  ;;  %v636_v30 = vadd.f32 0.5, %v604_v4  ;;  %v1182_v32 = vmul.f32 5.9604645e-08, %v1150_v6  ;;  %v2531_v33 = vsub.f32 0.0, %v3742_v28 }
  0x3e   :  { %2440 = vperm.xlu1 %3412, %v3720_v19   ;;  %v3379_v35 = vadd.f32 -2.0, %v1858_v12  ;;  %v127_v37 = vadd.s32 %v108_v52, %v3679_v3  ;;  %vm1890_vm1 = vcmp.gt.f32.partialorder %v1858_v12, 1.0  ;;  %v1953_v42 = vsel %vm1889_vm0, %v3378_v16, %v1857_v54 }
  0x3f   :  { %2435 = vperm.xlu0 %3411, %v3725_v20   ;;  %v128_v43 = vadd.s32 %v108_v52, %v3686_v5  ;;  %v3837_v46 = vmul.f32 %v1665_v25, %v1601_v24  ;;  %3417 = vlog2.f32 %v667_v17  ;;  %v1533_v47 = vmul.f32 2.0, %v1181_v22 }
  0x40   :  { %v3840_v50 = vmul.f32 %v1666_v29, %v1602_v26  ;;  %v668_v51 = vmul.f32 5.9604645e-08, %v636_v30  ;;  %v1534_v56 = vmul.f32 2.0, %v1182_v32  ;;  %v1954_v62 = vsel %vm1890_vm1, %v3379_v35, %v1858_v12 }
  0x41   :  { %v2017_v63 = vand.u32 2147483647, %v1953_v42  ;;  %v161_v54 = vadd.s32 %v3715_v18, %v127_v37  ;;  %v162_v6 = vadd.s32 %v3715_v18, %v128_v43  ;;  %v1729_v12 = vand.u32 2147483647, %v3837_v46 }
  0x42   :  { %2450 = vperm.xlu1 %3412, %v3737_v27   ;;  %v3342_v22 = vadd.f32 -1.0, %v1533_v47  ;;  %v1730_v25 = vand.u32 2147483647, %v3840_v50  ;;  %v2018_v26 = vand.u32 2147483647, %v1954_v62  ;;  %3419 = vlog2.f32 %v668_v51 }
  0x43   :  { %2445 = vperm.xlu0 %3411, %v3742_v28   ;;  %v3414_v16 = vpop.eup %3413  ;;  %v3092_v24 = vshrl.u32 %v161_v54, 16  ;;  %v3853_v29 = vadd.f32 -1.0, %v1534_v56  ;;  %v1985_v32 = vmul.f32 4.0, %v1953_v42  ;;  %v2049_v35 = vsub.f32 1.0, %v2017_v63 }
  0x44   :  { %v1629_v58 = vand.u32 2147483647, %v3342_v22  ;;  %v707_v4 = vadd.s32 %v3727_v21, %v127_v37  ;;  %v1222_v1 = vmul.f32 0.6931472, %v3414_v16  ;;  %v3093_v47 = vshrl.u32 %v162_v6, 16 }
  0x45   :  { %v3416_v30 = vpop.eup %3415  ;;  %v257_v17 = vxor.u32 %v3092_v24, %v161_v54  ;;  %v708_v57 = vadd.s32 %v3727_v21, %v128_v43  ;;  %v1761_v52 = vmul.f32 0.225, %v1729_v12  ;;  %v1986_v51 = vmul.f32 4.0, %v1954_v62 }
  0x46   :  { %2460 = vperm.xlu1 %3412, %v3749_v31   ;;  %v1597_v56 = vmul.f32 4.0, %v3342_v22  ;;  %v1630_v38 = vand.u32 2147483647, %v3853_v29  ;;  %v1224_v42 = vmul.f32 0.6931472, %v3416_v30  ;;  %v2050_v48 = vsub.f32 1.0, %v2018_v26 }
  0x47   :  { %2455 = vperm.xlu0 %3411, %v3761_v40   ;;  %v1762_v63 = vmul.f32 0.225, %v1730_v25  ;;  %v3862_v37 = vmul.f32 4.0, %v3853_v29  ;;  %v258_v34 = vxor.u32 %v3093_v47, %v162_v6  ;;  %v289_v16 = vmul.u32 2246822507, %v257_v17 }
  0x48   :  { %v3220_v44 = vshrl.u32 %v707_v4, 16  ;;  %v3870_v43 = vmul.f32 -2.0, %v1222_v1  ;;  %v1661_v62 = vsub.f32 1.0, %v1629_v58  ;;  %v3872_v54 = vsub.f32 0.5, %v3342_v22 }
  0x49   :  { %v3418_v8 = vpop.eup %3417  ;;  %v3221_v12 = vshrl.u32 %v708_v57, 16  ;;  %v1793_v24 = vadd.f32 0.775, %v1761_v52  ;;  %v1662_v25 = vsub.f32 1.0, %v1630_v38  ;;  %v290_v26 = vmul.u32 2246822507, %v258_v34 }
  0x4a   :  { %2470 = vperm.xlu1 %3412, %v3768_v55   ;;  %v3124_v30 = vshrl.u32 %v289_v16, 13  ;;  %v3876_v6 = vmul.f32 %v2050_v48, %v1986_v51  ;;  %v1214_v17 = vmul.f32 0.6931472, %v3418_v8  ;;  %v803_v7 = vxor.u32 %v3220_v44, %v707_v4 }
  0x4b   :  { %2465 = vperm.xlu0 %3411, %v3773_v60   ;;  %3421 = vrsqrt.f32 %v3870_v43  ;;  %v3884_v58 = vmul.f32 %v1661_v62, %v1597_v56  ;;  %v804_v34 = vxor.u32 %v3221_v12, %v708_v57  ;;  %v1342_v44 = vand.u32 2147483648, %v3870_v43 }
  0x4c   :  { %v385_v1 = vxor.u32 %v3124_v30, %v289_v16  ;;  %v835_v38 = vmul.u32 2246822507, %v803_v7  ;;  %v123_v4 = vadd.s32 %v106_v53, %v3679_v3  ;;  %v124_v9 = vadd.s32 %v106_v53, %v3686_v5 }
  0x4d   :  { %v836_v20 = vmul.u32 2246822507, %v804_v34  ;;  %v3901_v51 = vmul.f32 %v1793_v24, %v3837_v46  ;;  %v2114_v62 = vand.u32 2147483647, %v3876_v6  ;;  %v5710_v24 = vsub.f32 0.0, %v3761_v40 }
  0x4e   :  { %2480 = vperm.xlu1 %3412, %v3780_v15   ;;  %v417_v52 = vmul.u32 3266489909, %v385_v1  ;;  %v157_v47 = vadd.s32 %v3715_v18, %v123_v4  ;;  %v158_v39 = vadd.s32 %v3715_v18, %v124_v9  ;;  %v703_v46 = vadd.s32 %v3727_v21, %v123_v4 }
  0x4f   :  { %2475 = vperm.xlu0 %3411, %v3785_v23   ;;  %v3253_v56 = vshrl.u32 %v836_v20, 13  ;;  %v5711_v30 = vsub.f32 0.0, %v3737_v27  ;;  %v3917_v1 = vmul.f32 %v1662_v25, %v3862_v37  ;;  %v1725_v27 = vand.u32 2147483647, %v3884_v58 }
  0x50   :  { %v3156_v22 = vshrl.u32 %v417_v52, 16  ;;  %v3088_v16 = vshrl.u32 %v157_v47, 16  ;;  %v3089_v12 = vshrl.u32 %v158_v39, 16  ;;  %v3216_v34 = vshrl.u32 %v703_v46, 16 }
  0x51   :  { %v932_v28 = vxor.u32 %v3253_v56, %v836_v20  ;;  %v5713_v37 = vsub.f32 0.0, %v3749_v31  ;;  %v2146_v25 = vmul.f32 0.225, %v2114_v62  ;;  %vm1885_vm2 = vcmp.gt.f32.partialorder %v3872_v54, 1.0 }
  0x52   :  { %2543 = vperm.xlu1 %3412, %v2525_v59   ;;  %v3864_v59 = vmul.f32 %v2049_v35, %v1985_v32  ;;  %v3874_v32 = vmul.f32 -2.0, %v1224_v42  ;;  %v3420_v35 = vpop.eup %3419  ;;  %v513_v8 = vxor.u32 %v3156_v22, %v417_v52  ;;  %v254_v40 = vxor.u32 %v3089_v12, %v158_v39 }
  0x53   :  { %2485 = vperm.xlu0 %3411, %v3797_v41   ;;  %v964_v7 = vmul.u32 3266489909, %v932_v28  ;;  %vm1339_vm3 = vcmp.eq.f32.partialorder %v3870_v43, inf  ;;  %v5714_v62 = vsub.f32 0.0, %v3785_v23  ;;  %vm1341_vm6 = vcmp.eq.f32.partialorder %v3870_v43, 0.0 }
  0x54   :  { %v2113_v13 = vand.u32 2147483647, %v3864_v59  ;;  %3423 = vrsqrt.f32 %v3874_v32  ;;  %vm1346_vm5 = vcmp.eq.f32.partialorder %v3874_v32, inf  ;;  %v1726_v23 = vand.u32 2147483647, %v3917_v1 }
  0x55   :  { %vm1348_vm7 = vcmp.eq.f32.partialorder %v3874_v32, 0.0 }
  0x56   :  { %2553 = vperm.xlu1 %3412, %v2527_v61   ;;  %v1794_v61 = vadd.f32 0.775, %v1762_v63  ;;  %v2145_v19 = vmul.f32 0.225, %v2113_v13  ;;  %v3188_v13 = vshrl.u32 %v513_v8, 8 }
  0x57   :  { %2548 = vperm.xlu0 %3411, %v2526_v10   ;;  %v3125_v10 = vshrl.u32 %v290_v26, 13 }
  0x58   :  { %v3905_v53 = vmul.f32 %v1794_v61, %v3840_v50  ;;  %v3913_v50 = vmul.f32 -2.0, %v1214_v17  ;;  %v1854_v17 = vsub.f32 0.5, %v3853_v29  ;;  %v3374_v29 = vadd.f32 -2.0, %v3872_v54 }
  0x59   :  { %v386_v48 = vxor.u32 %v3125_v10, %v290_v26  ;;  %v704_v10 = vadd.s32 %v3727_v21, %v124_v9  ;;  %v5712_v9 = vsub.f32 0.0, %v3773_v60 }
  0x5a   :  { %2563 = vperm.xlu1 %3412, %v2529_v11   ;;  %v3252_v11 = vshrl.u32 %v835_v38, 13  ;;  %v3375_v60 = vadd.f32 -2.0, %v1854_v17  ;;  %vm1886_vm4 = vcmp.gt.f32.partialorder %v1854_v17, 1.0  ;;  %3425 = vrsqrt.f32 %v3913_v50 }
  0x5b   :  { %2558 = vperm.xlu0 %3411, %v2528_v0   ;;  %v1349_v0 = vand.u32 2147483648, %v3874_v32  ;;  %v418_v57 = vmul.u32 3266489909, %v386_v48  ;;  %v3285_v48 = vshrl.u32 %v964_v7, 16  ;;  %v3217_v4 = vshrl.u32 %v704_v10, 16 }
  0x5c   :  { %v931_v42 = vxor.u32 %v3252_v11, %v835_v38  ;;  %v3422_v38 = vpop.eup %3421  ;;  %v799_v11 = vxor.u32 %v3216_v34, %v703_v46  ;;  %v2177_v46 = vadd.f32 0.775, %v2145_v19  ;;  %vm1311_vm8 = vcmp.eq.f32.partialorder %v3913_v50, inf }
  0x5d   :  { %v3157_v63 = vshrl.u32 %v418_v57, 16  ;;  %v1060_v22 = vxor.u32 %v3285_v48, %v964_v7  ;;  %v800_v56 = vxor.u32 %v3217_v4, %v704_v10  ;;  %vm1313_vm9 = vcmp.eq.f32.partialorder %v3913_v50, 0.0 }
  0x5e   :  { %2573 = vperm.xlu1 %3412, %v2531_v33   ;;  %v963_v33 = vmul.u32 3266489909, %v931_v42  ;;  %v609_v42 = vcvt.s32.f32 %v3188_v13  ;;  %v2178_v13 = vadd.f32 0.775, %v2146_v25  ;;  %v2209_v4 = vmul.f32 %v2177_v46, %v3864_v59 }
  0x5f   :  { %2568 = vperm.xlu0 %3411, %v2530_v14   ;;  %v1216_v14 = vmul.f32 0.6931472, %v3420_v35  ;;  %v514_v26 = vxor.u32 %v3157_v63, %v418_v57  ;;  %v253_v35 = vxor.u32 %v3088_v16, %v157_v47  ;;  %v3424_v57 = vpop.eup %3423  ;;  %v831_v63 = vmul.u32 2246822507, %v799_v11 }
  0x60   :  { %v3284_v61 = vshrl.u32 %v963_v33, 16  ;;  %v3317_v8 = vshrl.u32 %v1060_v22, 8  ;;  %v286_v16 = vmul.u32 2246822507, %v254_v40  ;;  %v832_v28 = vmul.u32 2246822507, %v800_v56 }
  0x61   :  { %v3189_v20 = vshrl.u32 %v514_v26, 8  ;;  %v285_v39 = vmul.u32 2246822507, %v253_v35  ;;  %v3248_v12 = vshrl.u32 %v831_v63, 13  ;;  %v5715_v26 = vsub.f32 0.0, %v3768_v55 }
  0x62   :  { %2583 = vperm.xlu1 %3412, %v5710_v24   ;;  %v1059_v52 = vxor.u32 %v3284_v61, %v963_v33  ;;  %v3932_v24 = vmul.f32 -2.0, %v1216_v14  ;;  %v641_v7 = vadd.f32 0.5, %v609_v42  ;;  %v3249_v10 = vshrl.u32 %v832_v28, 13 }
  0x63   :  { %2578 = vperm.xlu0 %3411, %v5711_v30   ;;  %v610_v33 = vcvt.s32.f32 %v3189_v20  ;;  %v1156_v30 = vcvt.s32.f32 %v3317_v8  ;;  %v3120_v61 = vshrl.u32 %v285_v39, 13  ;;  %v1949_v55 = vsel %vm1885_vm2, %v3374_v29, %v3872_v54 }
  0x64   :  { %v3316_v47 = vshrl.u32 %v1059_v52, 8  ;;  %v3121_v19 = vshrl.u32 %v286_v16, 13  ;;  %v1950_v14 = vsel %vm1886_vm4, %v3375_v60, %v1854_v17  ;;  %v927_v48 = vxor.u32 %v3248_v12, %v831_v63 }
  0x65   :  { %v642_v35 = vadd.f32 0.5, %v610_v33  ;;  %v5716_v52 = vsub.f32 0.0, %v3797_v41  ;;  %v5717_v40 = vsub.f32 0.0, %v3780_v15  ;;  %3427 = vrsqrt.f32 %v3932_v24 }
  0x66   :  { %2593 = vperm.xlu1 %3412, %v5712_v9   ;;  %v1155_v31 = vcvt.s32.f32 %v3316_v47  ;;  %v1757_v20 = vmul.f32 0.225, %v1725_v27  ;;  %v1188_v11 = vmul.f32 5.9604645e-08, %v1156_v30  ;;  %v2013_v54 = vand.u32 2147483647, %v1949_v55 }
  0x67   :  { %2588 = vperm.xlu0 %3411, %v5713_v37   ;;  %v673_v9 = vmul.f32 5.9604645e-08, %v641_v7  ;;  %v381_v17 = vxor.u32 %v3120_v61, %v285_v39  ;;  %v928_v37 = vxor.u32 %v3249_v10, %v832_v28  ;;  %v1338_v25 = vmul.f32 %v3422_v38, %v3870_v43 }
  0x68   :  { %v1187_v34 = vmul.f32 5.9604645e-08, %v1155_v31  ;;  %v1314_v41 = vand.u32 2147483648, %v3913_v50  ;;  %v2014_v22 = vand.u32 2147483647, %v1950_v14  ;;  %v382_v47 = vxor.u32 %v3121_v19, %v286_v16 }
  0x69   :  { %v1758_v15 = vmul.f32 0.225, %v1726_v23  ;;  %v674_v56 = vmul.f32 5.9604645e-08, %v642_v35  ;;  %v959_v63 = vmul.u32 3266489909, %v927_v48  ;;  %v5718_v59 = vsub.f32 0.0, %v3792_v36 }
  0x6a   :  { %2603 = vperm.xlu1 %3412, %v5714_v62   ;;  %v1539_v42 = vmul.f32 2.0, %v1187_v34  ;;  %v1345_v27 = vmul.f32 %v3424_v57, %v3874_v32  ;;  %v1789_v29 = vadd.f32 0.775, %v1757_v20  ;;  %v1981_v39 = vmul.f32 4.0, %v1949_v55 }
  0x6b   :  { %2598 = vperm.xlu0 %3411, %v5715_v26   ;;  %v1540_v8 = vmul.f32 2.0, %v1188_v11  ;;  %v2045_v38 = vsub.f32 1.0, %v2013_v54  ;;  %3429 = vlog2.f32 %v673_v9  ;;  %v413_v28 = vmul.u32 3266489909, %v381_v17 }
  0x6c   :  { %v960_v16 = vmul.u32 3266489909, %v928_v37  ;;  %v1340_v60 = vsel %vm1339_vm3, %v3870_v43, %v1338_v25  ;;  %v1982_v33 = vmul.f32 4.0, %v1950_v14  ;;  %v2046_v31 = vsub.f32 1.0, %v2014_v22 }
  0x6d   :  { %v414_v12 = vmul.u32 3266489909, %v382_v47  ;;  %v1790_v62 = vadd.f32 0.775, %v1758_v15  ;;  %3431 = vlog2.f32 %v674_v56  ;;  %v3958_v57 = vadd.f32 -1.0, %v1539_v42 }
  0x6e   :  { %2613 = vperm.xlu1 %3412, %v5716_v52   ;;  %v3280_v26 = vshrl.u32 %v959_v63, 16  ;;  %v1347_v46 = vsel %vm1346_vm5, %v3874_v32, %v1345_v27  ;;  %vm1318_vm10 = vcmp.eq.f32.partialorder %v3932_v24, inf  ;;  %v1321_v30 = vand.u32 2147483648, %v3932_v24 }
  0x6f   :  { %2608 = vperm.xlu0 %3411, %v5717_v40   ;;  %v3966_v7 = vadd.f32 -1.0, %v1540_v8  ;;  %v1343_v61 = vsel %vm1341_vm6, %v1342_v44, %v1340_v60  ;;  %v3972_v10 = vmul.f32 %v2045_v38, %v1981_v39  ;;  %v3152_v23 = vshrl.u32 %v413_v28, 16 }
  0x70   :  { %v3281_v55 = vshrl.u32 %v960_v16, 16  ;;  %v2210_v14 = vmul.f32 %v2178_v13, %v3876_v6  ;;  %vm1320_vm11 = vcmp.eq.f32.partialorder %v3932_v24, 0.0  ;;  %v3977_v35 = vmul.f32 %v1789_v29, %v3884_v58 }
  0x71   :  { %v3979_v34 = vmul.f32 %v2046_v31, %v1982_v33  ;;  %v3153_v48 = vshrl.u32 %v414_v12, 16  ;;  %v3985_v43 = vsel %vm1348_vm7, %v1349_v0, %v1347_v46  ;;  %v3988_v44 = vmul.f32 %v1790_v62, %v3917_v1 }
  0x72   :  { %2490 = vperm.xlu1 %3412, %v3792_v36   ;;  %v3426_v36 = vpop.eup %3425  ;;  %v1859_v52 = vsub.f32 0.5, %v3958_v57  ;;  %v1055_v6 = vxor.u32 %v3280_v26, %v959_v63  ;;  %v3991_v13 = vmul.f32 %v2209_v4, %v1343_v61  ;;  %v1860_v40 = vsub.f32 0.5, %v3966_v7 }
  0x73   :  { %2618 = vperm.xlu0 %3411, %v5718_v59   ;;  %v3428_v19 = vpop.eup %3427  ;;  %v1310_v58 = vmul.f32 %v3426_v36, %v3913_v50  ;;  %v5719_v20 = vmul.u32 512, %v3812_v45  ;;  %v2109_v32 = vand.u32 2147483647, %v3972_v10  ;;  %v509_v0 = vxor.u32 %v3152_v23, %v413_v28 }
  0x74   :  { %v1056_v54 = vxor.u32 %v3281_v55, %v960_v16  ;;  %v4007_v4 = vmul.f32 %v3901_v51, %v1343_v61  ;;  %v1317_v17 = vmul.f32 %v3428_v19, %v3932_v24  ;;  %v2110_v37 = vand.u32 2147483647, %v3979_v34 }
  0x75   :  { %v3998_v11 = vadd.s32 %v5719_v20, %v3679_v3  ;;  %v5720_v1 = vmov %v5719_v20  ;;  %v510_v25 = vxor.u32 %v3153_v48, %v414_v12  ;;  %v3430_v22 = vpop.eup %3429  ;;  %v4012_v47 = vmul.f32 %v2210_v14, %v3985_v43 }
  0x76   :  { %v4004_v9 = vadd.s32 %v5720_v1, %v3686_v5  ;;  %v3380_v15 = vadd.f32 -2.0, %v1859_v52  ;;  %v3312_v56 = vshrl.u32 %v1055_v6, 8  ;;  %v3313_v42 = vshrl.u32 %v1056_v54, 8 }
  0x77   :  { %v1312_v45 = vsel %vm1311_vm8, %v3913_v50, %v1310_v58  ;;  %vm1891_vm12 = vcmp.gt.f32.partialorder %v1859_v52, 1.0  ;;  %v3381_v63 = vadd.f32 -2.0, %v1860_v40  ;;  %v165_v51 = vadd.s32 %v3715_v18, %v3998_v11  ;;  %v3432_v59 = vpop.eup %3431 }
  0x78   :  { %v2141_v27 = vmul.f32 0.225, %v2109_v32  ;;  %vm1892_vm13 = vcmp.gt.f32.partialorder %v1860_v40, 1.0  ;;  %v3184_v29 = vshrl.u32 %v509_v0, 8  ;;  %v166_v39 = vadd.s32 %v3715_v18, %v4004_v9 }
  0x79   :  { %v1319_v8 = vsel %vm1318_vm10, %v3932_v24, %v1317_v17  ;;  %v2142_v38 = vmul.f32 0.225, %v2110_v37  ;;  %v1226_v28 = vmul.f32 0.6931472, %v3430_v22  ;;  %v3185_v16 = vshrl.u32 %v510_v25, 8 }
  0x7a   :  { %v1315_v60 = vsel %vm1313_vm9, %v1314_v41, %v1312_v45  ;;  %v1955_v33 = vsel %vm1891_vm12, %v3380_v15, %v1859_v52  ;;  %v1151_v31 = vcvt.s32.f32 %v3312_v56  ;;  %v1152_v12 = vcvt.s32.f32 %v3313_v42 }
  0x7b   :  { %v1228_v36 = vmul.f32 0.6931472, %v3432_v59  ;;  %v1635_v62 = vand.u32 2147483647, %v3958_v57  ;;  %v1956_v26 = vsel %vm1892_vm13, %v3381_v63, %v1860_v40  ;;  %v3096_v46 = vshrl.u32 %v165_v51, 16 }
  0x7c   :  { %v4031_v61 = vsel %vm1320_vm11, %v1321_v30, %v1319_v8  ;;  %v2173_v23 = vadd.f32 0.775, %v2141_v27  ;;  %v605_v55 = vcvt.s32.f32 %v3184_v29  ;;  %v3097_v19 = vshrl.u32 %v166_v39, 16 }
  0x7d   :  { %v2174_v14 = vadd.f32 0.775, %v2142_v38  ;;  %v4033_v48 = vmul.f32 -2.0, %v1226_v28  ;;  %v2019_v50 = vand.u32 2147483647, %v1955_v33  ;;  %v606_v41 = vcvt.s32.f32 %v3185_v16 }
  0x7e   :  { %v1603_v52 = vmul.f32 4.0, %v3958_v57  ;;  %v2020_v6 = vand.u32 2147483647, %v1956_v26  ;;  %v1183_v58 = vmul.f32 5.9604645e-08, %v1151_v31  ;;  %v1184_v20 = vmul.f32 5.9604645e-08, %v1152_v12 }
  0x7f   :  { %v4036_v32 = vmul.f32 -2.0, %v1228_v36  ;;  %v1636_v40 = vand.u32 2147483647, %v3966_v7  ;;  %v1667_v24 = vsub.f32 1.0, %v1635_v62  ;;  %v261_v30 = vxor.u32 %v3096_v46, %v165_v51 }
  0x80   :  { %v2205_v0 = vmul.f32 %v2173_v23, %v3972_v10  ;;  %v1604_v54 = vmul.f32 4.0, %v3966_v7  ;;  %v637_v1 = vadd.f32 0.5, %v605_v55  ;;  %v262_v17 = vxor.u32 %v3097_v19, %v166_v39 }
  0x81   :  { %3433 = vrsqrt.f32 %v4033_v48  ;;  %v1987_v37 = vmul.f32 4.0, %v1955_v33  ;;  %v2051_v25 = vsub.f32 1.0, %v2019_v50  ;;  %v638_v57 = vadd.f32 0.5, %v606_v41 }
  0x82   :  { %v1988_v22 = vmul.f32 4.0, %v1956_v26  ;;  %v2052_v15 = vsub.f32 1.0, %v2020_v6  ;;  %v1535_v56 = vmul.f32 2.0, %v1183_v58  ;;  %v1536_v42 = vmul.f32 2.0, %v1184_v20 }
  0x83   :  { %3435 = vrsqrt.f32 %v4036_v32  ;;  %v1668_v45 = vsub.f32 1.0, %v1636_v40  ;;  %v4043_v63 = vmul.f32 %v1667_v24, %v1603_v52  ;;  %v293_v51 = vmul.u32 2246822507, %v261_v30 }
  0x84   :  { %v4047_v7 = vmul.f32 %v3905_v53, %v3985_v43  ;;  %v4050_v10 = vmul.f32 %v3977_v35, %v1315_v60  ;;  %v4054_v59 = vmul.f32 %v3988_v44, %v4031_v61  ;;  %v294_v27 = vmul.u32 2246822507, %v262_v17 }
  0x85   :  { %v2206_v29 = vmul.f32 %v2174_v14, %v3979_v34  ;;  %v4057_v39 = vmul.f32 %v2051_v25, %v1987_v37  ;;  %v669_v8 = vmul.f32 5.9604645e-08, %v637_v1  ;;  %v711_v38 = vadd.s32 %v3727_v21, %v3998_v11 }
  0x86   :  { %v4061_v28 = vmul.f32 %v2052_v15, %v1988_v22  ;;  %v670_v53 = vmul.f32 5.9604645e-08, %v638_v57  ;;  %v3344_v43 = vadd.f32 -1.0, %v1535_v56  ;;  %v3345_v16 = vadd.f32 -1.0, %v1536_v42 }
  0x87   :  { %v4063_v35 = vmul.f32 %v2205_v0, %v1315_v60  ;;  %v4065_v33 = vmul.f32 %v1668_v45, %v1604_v54  ;;  %v1731_v44 = vand.u32 2147483647, %v4043_v63  ;;  %v3128_v31 = vshrl.u32 %v293_v51, 13 }
  0x88   :  { %vm1353_vm14 = vcmp.eq.f32.partialorder %v4033_v48, inf  ;;  %v1631_v34 = vand.u32 2147483647, %v3344_v43  ;;  %v1632_v12 = vand.u32 2147483647, %v3345_v16  ;;  %v3129_v36 = vshrl.u32 %v294_v27, 13 }
  0x89   :  { %v2115_v62 = vand.u32 2147483647, %v4057_v39  ;;  %3437 = vlog2.f32 %v669_v8  ;;  %v712_v11 = vadd.s32 %v3727_v21, %v4004_v9  ;;  %v3224_v26 = vshrl.u32 %v711_v38, 16 }
  0x8a   :  { %vm1355_vm15 = vcmp.eq.f32.partialorder %v4033_v48, 0.0  ;;  %v1356_v60 = vand.u32 2147483648, %v4033_v48  ;;  %v2116_v46 = vand.u32 2147483647, %v4061_v28  ;;  %3439 = vlog2.f32 %v670_v53 }
  0x8b   :  { %v3434_v23 = vpop.eup %3433  ;;  %v1732_v55 = vand.u32 2147483647, %v4065_v33  ;;  %v1763_v19 = vmul.f32 0.225, %v1731_v44  ;;  %v1599_v14 = vmul.f32 4.0, %v3344_v43  ;;  %v389_v50 = vxor.u32 %v3128_v31, %v293_v51 }
  0x8c   :  { %v1600_v41 = vmul.f32 4.0, %v3345_v16  ;;  %v1663_v52 = vsub.f32 1.0, %v1631_v34  ;;  %v1664_v6 = vsub.f32 1.0, %v1632_v12  ;;  %v390_v58 = vxor.u32 %v3129_v36, %v294_v27 }
  0x8d   :  { %v3436_v20 = vpop.eup %3435  ;;  %vm1360_vm0 = vcmp.eq.f32.partialorder %v4036_v32, inf  ;;  %v2147_v9 = vmul.f32 0.225, %v2115_v62  ;;  %v3225_v40 = vshrl.u32 %v712_v11, 16  ;;  %v807_v24 = vxor.u32 %v3224_v26, %v711_v38 }
  0x8e   :  { %v1352_v30 = vmul.f32 %v3434_v23, %v4033_v48  ;;  %vm1362_vm1 = vcmp.eq.f32.partialorder %v4036_v32, 0.0  ;;  %v2148_v0 = vmul.f32 0.225, %v2116_v46  ;;  %v1855_v54 = vsub.f32 0.5, %v3344_v43 }
  0x8f   :  { %v4080_v1 = vmul.f32 %v2206_v29, %v4031_v61  ;;  %v1764_v17 = vmul.f32 0.225, %v1732_v55  ;;  %v1795_v37 = vadd.f32 0.775, %v1763_v19  ;;  %v421_v25 = vmul.u32 3266489909, %v389_v50 }
  0x90   :  { %v1359_v57 = vmul.f32 %v3436_v20, %v4036_v32  ;;  %v4083_v22 = vmul.f32 %v1663_v52, %v1599_v14  ;;  %v4085_v15 = vmul.f32 %v1664_v6, %v1600_v41  ;;  %v422_v56 = vmul.u32 3266489909, %v390_v58 }
  0x91   :  { %v1363_v42 = vand.u32 2147483648, %v4036_v32  ;;  %v2179_v45 = vadd.f32 0.775, %v2147_v9  ;;  %v808_v51 = vxor.u32 %v3225_v40, %v712_v11  ;;  %v839_v27 = vmul.u32 2246822507, %v807_v24 }
  0x92   :  { %v1354_v61 = vsel %vm1353_vm14, %v4033_v48, %v1352_v30  ;;  %v2180_v29 = vadd.f32 0.775, %v2148_v0  ;;  %v1856_v8 = vsub.f32 0.5, %v3345_v16  ;;  %v3376_v38 = vadd.f32 -2.0, %v1855_v54 }
  0x93   :  { %v3438_v53 = vpop.eup %3437  ;;  %v1796_v43 = vadd.f32 0.775, %v1764_v17  ;;  %v1827_v44 = vmul.f32 %v1795_v37, %v4043_v63  ;;  %vm1887_vm2 = vcmp.gt.f32.partialorder %v1855_v54, 1.0  ;;  %v3160_v31 = vshrl.u32 %v421_v25, 16 }
  0x94   :  { %v3440_v34 = vpop.eup %3439  ;;  %v1361_v12 = vsel %vm1360_vm0, %v4036_v32, %v1359_v57  ;;  %v1727_v36 = vand.u32 2147483647, %v4083_v22  ;;  %v1728_v62 = vand.u32 2147483647, %v4085_v15  ;;  %v3161_v11 = vshrl.u32 %v422_v56, 16 }
  0x95   :  { %v1357_v16 = vsel %vm1355_vm15, %v1356_v60, %v1354_v61  ;;  %v2211_v26 = vmul.f32 %v2179_v45, %v4057_v39  ;;  %v840_v46 = vmul.u32 2246822507, %v808_v51  ;;  %v3256_v23 = vshrl.u32 %v839_v27, 13 }
  0x96   :  { %v2212_v63 = vmul.f32 %v2180_v29, %v4061_v28  ;;  %v1218_v55 = vmul.f32 0.6931472, %v3438_v53  ;;  %v3377_v19 = vadd.f32 -2.0, %v1856_v8  ;;  %v1951_v14 = vsel %vm1887_vm2, %v3376_v38, %v1855_v54  ;;  %v2314_v38 = vpop.permute.xlu1 %2313 }
  0x97   :  { %v1364_v50 = vsel %vm1362_vm1, %v1363_v42, %v1361_v12  ;;  %v1220_v41 = vmul.f32 0.6931472, %v3440_v34  ;;  %vm1888_vm3 = vcmp.gt.f32.partialorder %v1856_v8, 1.0  ;;  %v517_v52 = vxor.u32 %v3160_v31, %v421_v25 }
  0x98   :  { %v1828_v6 = vmul.f32 %v1796_v43, %v4065_v33  ;;  %v1759_v58 = vmul.f32 0.225, %v1727_v36  ;;  %v1760_v48 = vmul.f32 0.225, %v1728_v62  ;;  %v518_v60 = vxor.u32 %v3161_v11, %v422_v56 }
  0x99   :  { %v4104_v20 = vmul.f32 %v1827_v44, %v1357_v16  ;;  %v2015_v39 = vand.u32 2147483647, %v1951_v14  ;;  %v3257_v9 = vshrl.u32 %v840_v46, 13  ;;  %v935_v40 = vxor.u32 %v3256_v23, %v839_v27 }
  0x9a   :  { %v4106_v28 = vmul.f32 %v2211_v26, %v1357_v16  ;;  %v4108_v24 = vmul.f32 %v2212_v63, %v1364_v50  ;;  %v4110_v30 = vmul.f32 -2.0, %v1218_v55  ;;  %v1952_v32 = vsel %vm1888_vm3, %v3377_v19, %v1856_v8 }
  0x9b   :  { %v4112_v0 = vmul.f32 -2.0, %v1220_v41  ;;  %v3192_v54 = vshrl.u32 %v517_v52, 8  ;;  %v936_v17 = vxor.u32 %v3257_v9, %v840_v46  ;;  %v967_v33 = vmul.u32 3266489909, %v935_v40  ;;  %v2304_v46 = vpop.permute.xlu0 %2303  ;;  %v2242_v9 = vld [vmem:[#allocation4 + $0x48] sm:$0xff] }
  0x9c   :  { %v4114_v37 = vmul.f32 %v1828_v6, %v1364_v50  ;;  %v1791_v25 = vadd.f32 0.775, %v1759_v58  ;;  %v1792_v57 = vadd.f32 0.775, %v1760_v48  ;;  %v3193_v56 = vshrl.u32 %v518_v60, 8 }
  0x9d   :  { %v1983_v42 = vmul.f32 4.0, %v1951_v14  ;;  %v2016_v45 = vand.u32 2147483647, %v1952_v32  ;;  %v2047_v51 = vsub.f32 1.0, %v2015_v39  ;;  %v968_v27 = vmul.u32 3266489909, %v936_v17 }
  0x9e   :  { %3441 = vrsqrt.f32 %v4110_v30  ;;  %v1328_v61 = vand.u32 2147483648, %v4110_v30  ;;  %v3288_v29 = vshrl.u32 %v967_v33, 16  ;;  %v109_v8 = vmul.u32 512, %v3815_v49  ;;  %v2241_v39 = vld [vmem:[#allocation4 + $0x40] sm:$0xff] }
  0x9f   :  { %3443 = vrsqrt.f32 %v4112_v0  ;;  %v1335_v53 = vand.u32 2147483648, %v4112_v0  ;;  %v613_v43 = vcvt.s32.f32 %v3192_v54  ;;  %v3289_v44 = vshrl.u32 %v968_v27, 16 }
  0xa0   :  { %v4122_v31 = vmul.f32 %v1791_v25, %v4083_v22  ;;  %v1984_v34 = vmul.f32 4.0, %v1952_v32  ;;  %v614_v12 = vcvt.s32.f32 %v3193_v56  ;;  %v129_v36 = vadd.s32 %v109_v8, %v3679_v3  ;;  %v2785_v56 = vld [vmem:[#allocation4 + $0x50] sm:$0xff] }
  0xa1   :  { %v4126_v62 = vmul.f32 %v1792_v57, %v4085_v15  ;;  %v2048_v11 = vsub.f32 1.0, %v2016_v45  ;;  %v4128_v16 = vmul.f32 %v2047_v51, %v1983_v42  ;;  %v130_v49 = vadd.s32 %v109_v8, %v3686_v5  ;;  %v2237_v8 = vld [vmem:[#allocation4] sm:$0xff] }
  0xa2   :  { %v2385_v26 = vmul.f32 %v2314_v38, %v3991_v13  ;;  %v1063_v23 = vxor.u32 %v3288_v29, %v967_v33  ;;  %v163_v63 = vadd.s32 %v3715_v18, %v129_v36  ;;  %v709_v22 = vadd.s32 %v3727_v21, %v129_v36 }
  0xa3   :  { %v645_v55 = vadd.f32 0.5, %v613_v43  ;;  %v1064_v19 = vxor.u32 %v3289_v44, %v968_v27  ;;  %v164_v14 = vadd.s32 %v3715_v18, %v130_v49  ;;  %v710_v15 = vadd.s32 %v3727_v21, %v130_v49  ;;  %v2238_v49 = vld [vmem:[#allocation4 + $0x8] sm:$0xff] }
  0xa4   :  { %v2386_v50 = vmul.f32 %v2314_v38, %v4012_v47  ;;  %v646_v41 = vadd.f32 0.5, %v614_v12  ;;  %v3094_v52 = vshrl.u32 %v163_v63, 16  ;;  %v3222_v6 = vshrl.u32 %v709_v22, 16 }
  0xa5   :  { %v2849_v58 = vmul.f32 %v4007_v4, %v2314_v38  ;;  %v2850_v13 = vmul.f32 %v4047_v7, %v2314_v38  ;;  %v2381_v48 = vmul.f32 %v2304_v46, %v4063_v35  ;;  %v3095_v60 = vshrl.u32 %v164_v14, 16 }
  0xa6   :  { %v2382_v40 = vmul.f32 %v2304_v46, %v4080_v1  ;;  %vm1325_vm4 = vcmp.eq.f32.partialorder %v4110_v30, inf  ;;  %v3320_v32 = vshrl.u32 %v1063_v23, 8  ;;  %v259_v54 = vxor.u32 %v3094_v52, %v163_v63  ;;  %v2786_v1 = vld [vmem:[#allocation4 + $0x58] sm:$0xff]  ;;  %v2781_v63 = vld [vmem:[#allocation4 + $0x10] sm:$0xff] }
  0xa7   :  { %v3223_v17 = vshrl.u32 %v710_v15, 16  ;;  %v677_v47 = vmul.f32 5.9604645e-08, %v645_v55  ;;  %v3321_v33 = vshrl.u32 %v1064_v19, 8  ;;  %v260_v25 = vxor.u32 %v3095_v60, %v164_v14 }
  0xa8   :  { %v4142_v57 = vxor.u32 %v3222_v6, %v709_v22  ;;  %v3442_v4 = vpop.eup %3441  ;;  %v2845_v7 = vmul.f32 %v4050_v10, %v2304_v46  ;;  %v2846_v35 = vmul.f32 %v4054_v59, %v2304_v46  ;;  %v678_v42 = vmul.f32 5.9604645e-08, %v646_v41  ;;  %v2782_v22 = vld [vmem:[#allocation4 + $0x18] sm:$0xff] }
  0xa9   :  { %v291_v45 = vmul.u32 2246822507, %v259_v54  ;;  %v3444_v51 = vpop.eup %3443  ;;  %v4146_v27 = vadd.f32 %v2385_v26, %v2241_v39  ;;  %v4148_v29 = vadd.f32 %v2386_v50, %v2242_v9  ;;  %vm1332_vm5 = vcmp.eq.f32.partialorder %v4112_v0, inf }
  0xaa   :  { %v292_v38 = vmul.u32 2246822507, %v260_v25  ;;  %v72_v43 = vadd.s32 56, %v3677_v2  ;;  %vm1327_vm6 = vcmp.eq.f32.partialorder %v4110_v30, 0.0  ;;  %v4153_v44 = vmul.f32 %v2048_v11, %v1984_v34  ;;  %v2319_v34 = vpop.permute.xlu1 %2318 }
  0xab   :  { %v1159_v10 = vcvt.s32.f32 %v3320_v32  ;;  %v3126_v59 = vshrl.u32 %v291_v45, 13  ;;  %v806_v12 = vxor.u32 %v3223_v17, %v710_v15  ;;  %v4155_v36 = vadd.f32 %v2849_v58, %v2785_v56 }
  0xac   :  { %v1160_v26 = vcvt.s32.f32 %v3321_v33  ;;  %3445 = vlog2.f32 %v677_v47  ;;  %v837_v46 = vmul.u32 2246822507, %v4142_v57  ;;  %v4158_v23 = vadd.f32 %v2850_v13, %v2786_v1  ;;  %v2244_v47 = vld [vmem:[#allocation4 + $0x68] sm:$0xff] }
  0xad   :  { %v4160_v55 = vadd.f32 %v2381_v48, %v2237_v8  ;;  %v1324_v19 = vmul.f32 %v3442_v4, %v4110_v30  ;;  %vm1334_vm7 = vcmp.eq.f32.partialorder %v4112_v0, 0.0  ;;  %3447 = vlog2.f32 %v678_v42 }
  0xae   :  { %v2111_v11 = vand.u32 2147483647, %v4128_v16  ;;  %v3127_v14 = vshrl.u32 %v292_v38, 13  ;;  %v387_v15 = vxor.u32 %v3126_v59, %v291_v45  ;;  %v112_v50 = vmul.u32 512, %v72_v43 }
  0xaf   :  { %v4165_v41 = vadd.f32 %v2382_v40, %v2238_v49  ;;  %v2112_v52 = vand.u32 2147483647, %v4153_v44  ;;  %v1191_v6 = vmul.f32 5.9604645e-08, %v1159_v10  ;;  %v838_v58 = vmul.u32 2246822507, %v806_v12  ;;  %v2243_v40 = vld [vmem:[#allocation4 + $0x60] sm:$0xff] }
  0xb0   :  { %v4168_v13 = vadd.f32 %v2845_v7, %v2781_v63  ;;  %v4170_v48 = vadd.f32 %v2846_v35, %v2782_v22  ;;  %v1192_v60 = vmul.f32 5.9604645e-08, %v1160_v26  ;;  %v3254_v39 = vshrl.u32 %v837_v46, 13  ;;  %v2787_v10 = vld [vmem:[#allocation4 + $0x70] sm:$0xff] }
  0xb1   :  { %v2387_v9 = vmul.f32 %v2319_v34, %v4106_v28  ;;  %v2388_v32 = vmul.f32 %v2319_v34, %v4108_v24  ;;  %v2851_v54 = vmul.f32 %v4104_v20, %v2319_v34  ;;  %v1331_v17 = vmul.f32 %v3444_v51, %v4112_v0 }
  0xb2   :  { %v1326_v33 = vsel %vm1325_vm4, %v4110_v30, %v1324_v19  ;;  %v388_v25 = vxor.u32 %v3127_v14, %v292_v38  ;;  %v419_v57 = vmul.u32 3266489909, %v387_v15  ;;  %v4180_v4 = vadd.s32 %v112_v50, %v3679_v3 }
  0xb3   :  { %v2143_v56 = vmul.f32 0.225, %v2111_v11  ;;  %v2144_v7 = vmul.f32 0.225, %v2112_v52  ;;  %v1543_v28 = vmul.f32 2.0, %v1191_v6  ;;  %v3255_v35 = vshrl.u32 %v838_v58, 13 }
  0xb4   :  { %v1544_v24 = vmul.f32 2.0, %v1192_v60  ;;  %v420_v42 = vmul.u32 3266489909, %v388_v25  ;;  %v3158_v20 = vshrl.u32 %v419_v57, 16  ;;  %v933_v45 = vxor.u32 %v3254_v39, %v837_v46 }
  0xb5   :  { %v4182_v51 = vadd.f32 %v2387_v9, %v2243_v40  ;;  %v4185_v1 = vmul.f32 %v4114_v37, %v2319_v34  ;;  %v1333_v8 = vsel %vm1332_vm5, %v4112_v0, %v1331_v17  ;;  %v4191_v38 = vadd.s32 %v112_v50, %v3686_v5 }
  0xb6   :  { %v3446_v43 = vpop.eup %3445  ;;  %v4193_v59 = vadd.f32 %v2388_v32, %v2244_v47  ;;  %v1329_v12 = vsel %vm1327_vm6, %v1328_v61, %v1326_v33  ;;  %v3159_v49 = vshrl.u32 %v420_v42, 16  ;;  %v169_v37 = vadd.s32 %v3715_v18, %v4180_v4 }
  0xb7   :  { %5721 = vst [vmem:[#allocation10_spill] sm:$0xff] %v4182_v51  ;;  %v3448_v26 = vpop.eup %3447  ;;  %v2175_v46 = vadd.f32 0.775, %v2143_v56  ;;  %v3352_v63 = vadd.f32 -1.0, %v1543_v28  ;;  %v515_v22 = vxor.u32 %v3158_v20, %v419_v57  ;;  %v934_v19 = vxor.u32 %v3255_v35, %v838_v58 }
  0xb8   :  { %5722 = vst [vmem:[#allocation11_spill] sm:$0xff] %v4193_v59  ;;  %v1336_v34 = vsel %vm1334_vm7, %v1335_v53, %v1333_v8  ;;  %v2176_v11 = vadd.f32 0.775, %v2144_v7  ;;  %v3353_v14 = vadd.f32 -1.0, %v1544_v24  ;;  %v965_v15 = vmul.u32 3266489909, %v933_v45 }
  0xb9   :  { %v4205_v50 = vadd.f32 %v2851_v54, %v2787_v10  ;;  %v516_v30 = vxor.u32 %v3159_v49, %v420_v42  ;;  %v966_v61 = vmul.u32 3266489909, %v934_v19  ;;  %v170_v52 = vadd.s32 %v3715_v18, %v4191_v38  ;;  %v2783_v19 = vld [vmem:[#allocation4 + $0x30] sm:$0xff] }
  0xba   :  { %v2815_v6 = vmul.f32 %v4122_v31, %v1329_v12  ;;  %v1234_v60 = vmul.f32 0.6931472, %v3446_v43  ;;  %v1236_v39 = vmul.f32 0.6931472, %v3448_v26  ;;  %v3100_v58 = vshrl.u32 %v169_v37, 16  ;;  %v2788_v26 = vld [vmem:[#allocation4 + $0x78] sm:$0xff] }
  0xbb   :  { %5723 = vst [vmem:[#allocation12_spill] sm:$0xff] %v4205_v50  ;;  %v2816_v9 = vmul.f32 %v4126_v62, %v1336_v34  ;;  %v1863_v32 = vsub.f32 0.5, %v3352_v63  ;;  %v3190_v0 = vshrl.u32 %v515_v22, 8  ;;  %v3286_v53 = vshrl.u32 %v965_v15, 16  ;;  %v2309_v62 = vpop.permute.xlu0 %2308 }
  0xbc   :  { %v2207_v17 = vmul.f32 %v2175_v46, %v4128_v16  ;;  %v2208_v54 = vmul.f32 %v2176_v11, %v4153_v44  ;;  %v1639_v40 = vand.u32 2147483647, %v3352_v63  ;;  %v1864_v47 = vsub.f32 0.5, %v3353_v14 }
  0xbd   :  { %v1640_v33 = vand.u32 2147483647, %v3353_v14  ;;  %v3191_v25 = vshrl.u32 %v516_v30, 8  ;;  %v3287_v57 = vshrl.u32 %v966_v61, 16  ;;  %v3101_v56 = vshrl.u32 %v170_v52, 16 }
  0xbe   :  { %v4213_v7 = vmul.f32 -2.0, %v1234_v60  ;;  %v4215_v31 = vmul.f32 -2.0, %v1236_v39  ;;  %v1607_v28 = vmul.f32 4.0, %v3352_v63  ;;  %v4217_v35 = vxor.u32 %v3100_v58, %v169_v37 }
  0xbf   :  { %v1608_v24 = vmul.f32 4.0, %v3353_v14  ;;  %v3384_v42 = vadd.f32 -2.0, %v1863_v32  ;;  %v611_v20 = vcvt.s32.f32 %v3190_v0  ;;  %v1061_v16 = vxor.u32 %v3286_v53, %v965_v15 }
  0xc0   :  { %v1671_v45 = vsub.f32 1.0, %v1639_v40  ;;  %vm1895_vm8 = vcmp.gt.f32.partialorder %v1863_v32, 1.0  ;;  %v3385_v44 = vadd.f32 -2.0, %v1864_v47  ;;  %v1062_v8 = vxor.u32 %v3287_v57, %v966_v61  ;;  %v2239_v57 = vld [vmem:[#allocation4 + $0x20] sm:$0xff] }
  0xc1   :  { %v1672_v43 = vsub.f32 1.0, %v1640_v33  ;;  %vm1896_vm9 = vcmp.gt.f32.partialorder %v1864_v47, 1.0  ;;  %v612_v10 = vcvt.s32.f32 %v3191_v25  ;;  %v3318_v49 = vshrl.u32 %v1061_v16, 8 }
  0xc2   :  { %v2271_v46 = vmul.f32 %v2207_v17, %v1329_v12  ;;  %v2847_v22 = vmul.f32 %v2815_v6, %v2309_v62  ;;  %3449 = vrsqrt.f32 %v4213_v7  ;;  %v3319_v37 = vshrl.u32 %v1062_v8, 8 }
  0xc3   :  { %v2272_v63 = vmul.f32 %v2208_v54, %v1336_v34  ;;  %v1959_v11 = vsel %vm1895_vm8, %v3384_v42, %v1863_v32  ;;  %v643_v14 = vadd.f32 0.5, %v611_v20  ;;  %v266_v30 = vxor.u32 %v3101_v56, %v170_v52  ;;  %v2784_v56 = vld [vmem:[#allocation4 + $0x38] sm:$0xff] }
  0xc4   :  { %3451 = vrsqrt.f32 %v4215_v31  ;;  %v4221_v15 = vmul.f32 %v1671_v45, %v1607_v28  ;;  %v1960_v61 = vsel %vm1896_vm9, %v3385_v44, %v1864_v47  ;;  %v1157_v60 = vcvt.s32.f32 %v3318_v49 }
  0xc5   :  { %v4224_v39 = vadd.f32 %v4185_v1, %v2788_v26  ;;  %v4226_v58 = vmul.f32 %v1672_v43, %v1608_v24  ;;  %v644_v12 = vadd.f32 0.5, %v612_v10  ;;  %v297_v6 = vmul.u32 2246822507, %v4217_v35 }
  0xc6   :  { %v2848_v0 = vmul.f32 %v2816_v9, %v2309_v62  ;;  %v4229_v34 = vadd.f32 %v2847_v22, %v2783_v19  ;;  %v2023_v32 = vand.u32 2147483647, %v1959_v11  ;;  %v1158_v53 = vcvt.s32.f32 %v3319_v37 }
  0xc7   :  { %5724 = vst [vmem:[#allocation13_spill] sm:$0xff] %v4224_v39  ;;  %v2383_v52 = vmul.f32 %v2309_v62, %v2271_v46  ;;  %v2024_v17 = vand.u32 2147483647, %v1960_v61  ;;  %v675_v54 = vmul.f32 5.9604645e-08, %v643_v14  ;;  %v298_v40 = vmul.u32 2246822507, %v266_v30 }
  0xc8   :  { %5725 = vst [vmem:[#allocation14_spill] sm:$0xff] %v4229_v34  ;;  %v2384_v33 = vmul.f32 %v2309_v62, %v2272_v63  ;;  %v1735_v47 = vand.u32 2147483647, %v4221_v15  ;;  %v1189_v25 = vmul.f32 5.9604645e-08, %v1157_v60  ;;  %v4233_v1 = vadd.s32 48, %v3677_v2  ;;  %v2240_v62 = vld [vmem:[#allocation4 + $0x28] sm:$0xff] }
  0xc9   :  { %v1736_v28 = vand.u32 2147483647, %v4226_v58  ;;  %v676_v9 = vmul.f32 5.9604645e-08, %v644_v12  ;;  %v3132_v35 = vshrl.u32 %v297_v6, 13  ;;  %v715_v24 = vadd.s32 %v3727_v21, %v4180_v4 }
  0xca   :  { %v1991_v42 = vmul.f32 4.0, %v1959_v11  ;;  %v1992_v20 = vmul.f32 4.0, %v1960_v61  ;;  %v2055_v16 = vsub.f32 1.0, %v2023_v32  ;;  %v1190_v45 = vmul.f32 5.9604645e-08, %v1158_v53 }
  0xcb   :  { %v2056_v44 = vsub.f32 1.0, %v2024_v17  ;;  %3453 = vlog2.f32 %v675_v54  ;;  %v3133_v8 = vshrl.u32 %v298_v40, 13  ;;  %v716_v43 = vadd.s32 %v3727_v21, %v4191_v38 }
  0xcc   :  { %v3450_v10 = vpop.eup %3449  ;;  %v4240_v49 = vadd.f32 %v2383_v52, %v2239_v57  ;;  %v4242_v26 = vadd.f32 %v2848_v0, %v2784_v56  ;;  %v1767_v46 = vmul.f32 0.225, %v1735_v47  ;;  %v1541_v22 = vmul.f32 2.0, %v1189_v25 }
  0xcd   :  { %v1768_v37 = vmul.f32 0.225, %v1736_v28  ;;  %3455 = vlog2.f32 %v676_v9  ;;  %v393_v4 = vxor.u32 %v3132_v35, %v297_v6  ;;  %v3228_v63 = vshrl.u32 %v715_v24, 16 }
  0xce   :  { %5726 = vst [vmem:[#allocation15_spill] sm:$0xff] %v4240_v49  ;;  %5727 = vst [vmem:[#allocation16_spill] sm:$0xff] %v4242_v26  ;;  %v3452_v19 = vpop.eup %3451  ;;  %v4244_v11 = vadd.f32 %v2384_v33, %v2240_v62  ;;  %v4246_v14 = vmul.f32 %v2055_v16, %v1991_v42  ;;  %v1542_v30 = vmul.f32 2.0, %v1190_v45  ;;  %v111_v61 = vmul.u32 512, %v4233_v1 }
  0xcf   :  { %v1380_v38 = vmul.f32 %v3450_v10, %v4213_v7  ;;  %v4250_v60 = vmul.f32 %v2056_v44, %v1992_v20  ;;  %v394_v12 = vxor.u32 %v3133_v8, %v298_v40  ;;  %v3229_v0 = vshrl.u32 %v716_v43, 16 }
  0xd0   :  { %5728 = vst [vmem:[#allocation17_spill] sm:$0xff] %v4244_v11  ;;  %vm1381_vm10 = vcmp.eq.f32.partialorder %v4213_v7, inf  ;;  %vm1383_vm11 = vcmp.eq.f32.partialorder %v4213_v7, 0.0  ;;  %v1799_v6 = vadd.f32 0.775, %v1767_v46  ;;  %v3350_v32 = vadd.f32 -1.0, %v1541_v22 }
  0xd1   :  { %v1387_v53 = vmul.f32 %v3452_v19, %v4215_v31  ;;  %v1800_v52 = vadd.f32 0.775, %v1768_v37  ;;  %v425_v17 = vmul.u32 3266489909, %v393_v4  ;;  %v811_v54 = vxor.u32 %v3228_v63, %v715_v24 }
  0xd2   :  { %v1384_v33 = vand.u32 2147483648, %v4213_v7  ;;  %vm1388_vm12 = vcmp.eq.f32.partialorder %v4215_v31, inf  ;;  %v2119_v47 = vand.u32 2147483647, %v4246_v14  ;;  %v3351_v25 = vadd.f32 -1.0, %v1542_v30 }
  0xd3   :  { %v1382_v40 = vsel %vm1381_vm10, %v4213_v7, %v1380_v38  ;;  %v2120_v1 = vand.u32 2147483647, %v4250_v60  ;;  %v426_v57 = vmul.u32 3266489909, %v394_v12  ;;  %v812_v56 = vxor.u32 %v3229_v0, %v716_v43 }
  0xd4   :  { %vm1390_vm13 = vcmp.eq.f32.partialorder %v4215_v31, 0.0  ;;  %v1391_v28 = vand.u32 2147483648, %v4215_v31  ;;  %v1831_v9 = vmul.f32 %v1799_v6, %v4221_v15  ;;  %v1861_v35 = vsub.f32 0.5, %v3350_v32 }
  0xd5   :  { %v3454_v24 = vpop.eup %3453  ;;  %v1389_v42 = vsel %vm1388_vm12, %v4215_v31, %v1387_v53  ;;  %v1832_v20 = vmul.f32 %v1800_v52, %v4226_v58  ;;  %v3164_v16 = vshrl.u32 %v425_v17, 16  ;;  %v843_v45 = vmul.u32 2246822507, %v811_v54 }
  0xd6   :  { %v4267_v62 = vsel %vm1383_vm11, %v1384_v33, %v1382_v40  ;;  %v2151_v44 = vmul.f32 0.225, %v2119_v47  ;;  %v1862_v8 = vsub.f32 0.5, %v3351_v25  ;;  %v4270_v43 = vadd.s32 %v111_v61, %v3679_v3 }
  0xd7   :  { %v3456_v10 = vpop.eup %3455  ;;  %v2152_v46 = vmul.f32 0.225, %v2120_v1  ;;  %v3165_v15 = vshrl.u32 %v426_v57, 16  ;;  %v844_v22 = vmul.u32 2246822507, %v812_v56  ;;  %v3260_v37 = vshrl.u32 %v843_v45, 13  ;;  %v4282_v56 = vpop.permute.xlu1 %2328 }
  0xd8   :  { %v4274_v4 = vsel %vm1390_vm13, %v1391_v28, %v1389_v42  ;;  %v1230_v58 = vmul.f32 0.6931472, %v3454_v24  ;;  %v1637_v63 = vand.u32 2147483647, %v3350_v32  ;;  %v3382_v19 = vadd.f32 -2.0, %v1861_v35 }
  0xd9   :  { %v1638_v7 = vand.u32 2147483647, %v3351_v25  ;;  %vm1893_vm14 = vcmp.gt.f32.partialorder %v1861_v35, 1.0  ;;  %v521_v30 = vxor.u32 %v3164_v16, %v425_v17  ;;  %v3261_v38 = vshrl.u32 %v844_v22, 13 }
  0xda   :  { %v1232_v12 = vmul.f32 0.6931472, %v3456_v10  ;;  %v3383_v0 = vadd.f32 -2.0, %v1862_v8  ;;  %v4277_v6 = vadd.s32 %v111_v61, %v3686_v5  ;;  %v167_v53 = vadd.s32 %v3715_v18, %v4270_v43 }
  0xdb   :  { %v2823_v52 = vmul.f32 %v1831_v9, %v4267_v62  ;;  %vm1894_vm15 = vcmp.gt.f32.partialorder %v1862_v8, 1.0  ;;  %v522_v31 = vxor.u32 %v3165_v15, %v426_v57  ;;  %v939_v54 = vxor.u32 %v3260_v37, %v843_v45 }
  0xdc   :  { %v1605_v33 = vmul.f32 4.0, %v3350_v32  ;;  %v1606_v47 = vmul.f32 4.0, %v3351_v25  ;;  %v1957_v40 = vsel %vm1893_vm14, %v3382_v19, %v1861_v35  ;;  %v940_v1 = vxor.u32 %v3261_v38, %v844_v22 }
  0xdd   :  { %v4284_v17 = vmul.f32 -2.0, %v1230_v58  ;;  %v1669_v28 = vsub.f32 1.0, %v1637_v63  ;;  %v1670_v24 = vsub.f32 1.0, %v1638_v7  ;;  %v3196_v61 = vshrl.u32 %v521_v30, 8 }
  0xde   :  { %v4286_v42 = vmul.f32 -2.0, %v1232_v12  ;;  %v1958_v16 = vsel %vm1894_vm15, %v3383_v0, %v1862_v8  ;;  %v168_v9 = vadd.s32 %v3715_v18, %v4277_v6  ;;  %v3098_v10 = vshrl.u32 %v167_v53, 16 }
  0xdf   :  { %v2824_v57 = vmul.f32 %v1832_v20, %v4274_v4  ;;  %v2021_v32 = vand.u32 2147483647, %v1957_v40  ;;  %v3197_v25 = vshrl.u32 %v522_v31, 8  ;;  %v971_v35 = vmul.u32 3266489909, %v939_v54 }
  0xe0   :  { %v2183_v45 = vadd.f32 0.775, %v2151_v44  ;;  %v2184_v15 = vadd.f32 0.775, %v2152_v46  ;;  %v2855_v22 = vmul.f32 %v2823_v52, %v4282_v56  ;;  %v972_v37 = vmul.u32 3266489909, %v940_v1 }
  0xe1   :  { %3457 = vrsqrt.f32 %v4284_v17  ;;  %v4293_v58 = vmul.f32 %v1669_v28, %v1605_v33  ;;  %v2022_v63 = vand.u32 2147483647, %v1958_v16  ;;  %v617_v8 = vcvt.s32.f32 %v3196_v61 }
  0xe2   :  { %3459 = vrsqrt.f32 %v4286_v42  ;;  %v4296_v19 = vmul.f32 %v1670_v24, %v1606_v47  ;;  %v3099_v7 = vshrl.u32 %v168_v9, 16  ;;  %v263_v20 = vxor.u32 %v3098_v10, %v167_v53  ;;  %v2791_v24 = vld [vmem:[#allocation4 + $0xb0] sm:$0xff] }
  0xe3   :  { %v1989_v30 = vmul.f32 4.0, %v1957_v40  ;;  %v2053_v38 = vsub.f32 1.0, %v2021_v32  ;;  %v618_v12 = vcvt.s32.f32 %v3197_v25  ;;  %v3292_v44 = vshrl.u32 %v971_v35, 16 }
  0xe4   :  { %v4299_v46 = vmul.f32 %v2824_v57, %v4282_v56  ;;  %v3293_v0 = vshrl.u32 %v972_v37, 16  ;;  %v264_v52 = vxor.u32 %v3099_v7, %v168_v9  ;;  %v295_v31 = vmul.u32 2246822507, %v263_v20 }
  0xe5   :  { %v2215_v54 = vmul.f32 %v2183_v45, %v4246_v14  ;;  %v1990_v33 = vmul.f32 4.0, %v1958_v16  ;;  %v2054_v1 = vsub.f32 1.0, %v2022_v63  ;;  %v649_v28 = vadd.f32 0.5, %v617_v8 }
  0xe6   :  { %v2216_v47 = vmul.f32 %v2184_v15, %v4250_v60  ;;  %v1733_v53 = vand.u32 2147483647, %v4293_v58  ;;  %v296_v40 = vmul.u32 2246822507, %v264_v52  ;;  %v3130_v61 = vshrl.u32 %v295_v31, 13 }
  0xe7   :  { %v1734_v10 = vand.u32 2147483647, %v4296_v19  ;;  %v4305_v32 = vmul.f32 %v2053_v38, %v1989_v30  ;;  %v650_v57 = vadd.f32 0.5, %v618_v12  ;;  %v1067_v25 = vxor.u32 %v3292_v44, %v971_v35 }
  0xe8   :  { %v1068_v9 = vxor.u32 %v3293_v0, %v972_v37  ;;  %v3131_v7 = vshrl.u32 %v296_v40, 13  ;;  %v391_v20 = vxor.u32 %v3130_v61, %v295_v31  ;;  %v713_v14 = vadd.s32 %v3727_v21, %v4270_v43 }
  0xe9   :  { %v2279_v16 = vmul.f32 %v2215_v54, %v4267_v62  ;;  %v4310_v60 = vadd.f32 %v2855_v22, %v2791_v24  ;;  %v4312_v45 = vmul.f32 %v2054_v1, %v1990_v33  ;;  %v681_v15 = vmul.f32 5.9604645e-08, %v649_v28 }
  0xea   :  { %v2280_v63 = vmul.f32 %v2216_v47, %v4274_v4  ;;  %v392_v8 = vxor.u32 %v3131_v7, %v296_v40  ;;  %v423_v30 = vmul.u32 3266489909, %v391_v20  ;;  %v714_v35 = vadd.s32 %v3727_v21, %v4277_v6 }
  0xeb   :  { %5729 = vst [vmem:[#allocation18_spill] sm:$0xff] %v4310_v60  ;;  %v3458_v37 = vpop.eup %3457  ;;  %vm1367_vm0 = vcmp.eq.f32.partialorder %v4284_v17, inf  ;;  %v1765_v38 = vmul.f32 0.225, %v1733_v53  ;;  %v1766_v12 = vmul.f32 0.225, %v1734_v10  ;;  %3461 = vlog2.f32 %v681_v15 }
  0xec   :  { %v3324_v43 = vshrl.u32 %v1067_v25, 8  ;;  %v3460_v44 = vpop.eup %3459  ;;  %v2117_v62 = vand.u32 2147483647, %v4305_v32  ;;  %v682_v22 = vmul.f32 5.9604645e-08, %v650_v57  ;;  %v3325_v0 = vshrl.u32 %v1068_v9, 8 }
  0xed   :  { %v3226_v52 = vshrl.u32 %v713_v14, 16  ;;  %v2118_v31 = vand.u32 2147483647, %v4312_v45  ;;  %v424_v4 = vmul.u32 3266489909, %v392_v8  ;;  %v3162_v54 = vshrl.u32 %v423_v30, 16 }
  0xee   :  { %v1366_v33 = vmul.f32 %v3458_v37, %v4284_v17  ;;  %vm1369_vm1 = vcmp.eq.f32.partialorder %v4284_v17, 0.0  ;;  %v1370_v6 = vand.u32 2147483648, %v4284_v17  ;;  %v3227_v1 = vshrl.u32 %v714_v35, 16 }
  0xef   :  { %v1373_v28 = vmul.f32 %v3460_v44, %v4286_v42  ;;  %vm1374_vm2 = vcmp.eq.f32.partialorder %v4286_v42, inf  ;;  %v1797_v47 = vadd.f32 0.775, %v1765_v38  ;;  %v1163_v24 = vcvt.s32.f32 %v3324_v43 }
  0xf0   :  { %v1798_v53 = vadd.f32 0.775, %v1766_v12  ;;  %v1164_v40 = vcvt.s32.f32 %v3325_v0  ;;  %3463 = vlog2.f32 %v682_v22  ;;  %v809_v61 = vxor.u32 %v3226_v52, %v713_v14 }
  0xf1   :  { %v2149_v10 = vmul.f32 0.225, %v2117_v62  ;;  %v2150_v57 = vmul.f32 0.225, %v2118_v31  ;;  %v3163_v25 = vshrl.u32 %v424_v4, 16  ;;  %v519_v9 = vxor.u32 %v3162_v54, %v423_v30 }
  0xf2   :  { %v1368_v7 = vsel %vm1367_vm0, %v4284_v17, %v1366_v33  ;;  %vm1376_vm3 = vcmp.eq.f32.partialorder %v4286_v42, 0.0  ;;  %v1377_v20 = vand.u32 2147483648, %v4286_v42  ;;  %v810_v15 = vxor.u32 %v3227_v1, %v714_v35  ;;  %v2247_v1 = vld [vmem:[#allocation4 + $0xa0] sm:$0xff] }
  0xf3   :  { %v1375_v8 = vsel %vm1374_vm2, %v4286_v42, %v1373_v28  ;;  %v1195_v37 = vmul.f32 5.9604645e-08, %v1163_v24  ;;  %v520_v38 = vxor.u32 %v3163_v25, %v424_v4  ;;  %v3194_v12 = vshrl.u32 %v519_v9, 8 }
  0xf4   :  { %v1829_v14 = vmul.f32 %v1797_v47, %v4293_v58  ;;  %v1830_v43 = vmul.f32 %v1798_v53, %v4296_v19  ;;  %v1196_v44 = vmul.f32 5.9604645e-08, %v1164_v40  ;;  %v841_v30 = vmul.u32 2246822507, %v809_v61  ;;  %v2792_v58 = vld [vmem:[#allocation4 + $0xb8] sm:$0xff] }
  0xf5   :  { %v1371_v62 = vsel %vm1369_vm1, %v1370_v6, %v1368_v7  ;;  %v2181_v22 = vadd.f32 0.775, %v2149_v10  ;;  %v2182_v0 = vadd.f32 0.775, %v2150_v57  ;;  %v3195_v52 = vshrl.u32 %v520_v38, 8  ;;  %v3462_v33 = vpop.eup %3461  ;;  %v2248_v6 = vld [vmem:[#allocation4 + $0xa8] sm:$0xff]  ;;  %v4342_v57 = vpop.permute.xlu0 %2323 }
  0xf6   :  { %v2391_v31 = vmul.f32 %v4282_v56, %v2279_v16  ;;  %v1378_v35 = vsel %vm1376_vm3, %v1377_v20, %v1375_v8  ;;  %v615_v54 = vcvt.s32.f32 %v3194_v12  ;;  %v842_v4 = vmul.u32 2246822507, %v810_v15 }
  0xf7   :  { %v2392_v19 = vmul.f32 %v4282_v56, %v2280_v63  ;;  %v1547_v28 = vmul.f32 2.0, %v1195_v37  ;;  %v616_v47 = vcvt.s32.f32 %v3195_v52  ;;  %v74_v17 = vadd.s32 72, %v3677_v2 }
  0xf8   :  { %v2821_v24 = vmul.f32 %v1829_v14, %v1371_v62  ;;  %v1548_v53 = vmul.f32 2.0, %v1196_v44  ;;  %v647_v40 = vadd.f32 0.5, %v615_v54  ;;  %v3258_v61 = vshrl.u32 %v841_v30, 13 }
  0xf9   :  { %v2213_v16 = vmul.f32 %v2181_v22, %v4305_v32  ;;  %v2214_v42 = vmul.f32 %v2182_v0, %v4312_v45  ;;  %v2822_v10 = vmul.f32 %v1830_v43, %v1378_v35  ;;  %v3259_v25 = vshrl.u32 %v842_v4, 13 }
  0xfa   :  { %v3464_v9 = vpop.eup %3463  ;;  %v4344_v7 = vadd.f32 %v2391_v31, %v2247_v1  ;;  %v4347_v56 = vadd.f32 %v4299_v46, %v2792_v58  ;;  %v1242_v63 = vmul.f32 0.6931472, %v3462_v33  ;;  %v648_v20 = vadd.f32 0.5, %v616_v47 }
  0xfb   :  { %v4349_v15 = vadd.f32 %v2392_v19, %v2248_v6  ;;  %v3356_v8 = vadd.f32 -1.0, %v1547_v28  ;;  %v679_v37 = vmul.f32 5.9604645e-08, %v647_v40  ;;  %v114_v38 = vmul.u32 512, %v74_v17 }
  0xfc   :  { %5730 = vst [vmem:[#allocation19_spill] sm:$0xff] %v4344_v7  ;;  %5731 = vst [vmem:[#allocation20_spill] sm:$0xff] %v4347_v56  ;;  %v2853_v32 = vmul.f32 %v2821_v24, %v4342_v57  ;;  %v3357_v45 = vadd.f32 -1.0, %v1548_v53  ;;  %v937_v12 = vxor.u32 %v3258_v61, %v841_v30  ;;  %v938_v14 = vxor.u32 %v3259_v25, %v842_v4 }
  0xfd   :  { %5732 = vst [vmem:[#allocation21_spill] sm:$0xff] %v4349_v15  ;;  %v2277_v43 = vmul.f32 %v2213_v16, %v1371_v62  ;;  %v2278_v44 = vmul.f32 %v2214_v42, %v1378_v35  ;;  %v2854_v22 = vmul.f32 %v2822_v10, %v4342_v57  ;;  %v1244_v0 = vmul.f32 0.6931472, %v3464_v9 }
  0xfe   :  { %v4353_v52 = vmul.f32 -2.0, %v1242_v63  ;;  %v680_v46 = vmul.f32 5.9604645e-08, %v648_v20  ;;  %v969_v31 = vmul.u32 3266489909, %v937_v12  ;;  %v970_v54 = vmul.u32 3266489909, %v938_v14 }
  0xff   :  { %v1611_v33 = vmul.f32 4.0, %v3356_v8  ;;  %v1867_v1 = vsub.f32 0.5, %v3356_v8  ;;  %3465 = vlog2.f32 %v679_v37  ;;  %v139_v58 = vadd.s32 %v114_v38, %v3679_v3  ;;  %v2789_v37 = vld [vmem:[#allocation4 + $0x90] sm:$0xff] }
 0x100   :  { %v1643_v19 = vand.u32 2147483647, %v3356_v8  ;;  %v1868_v28 = vsub.f32 0.5, %v3357_v45  ;;  %v3290_v47 = vshrl.u32 %v969_v31, 16  ;;  %v3291_v30 = vshrl.u32 %v970_v54, 16 }
 0x101   :  { %v4356_v4 = vmul.f32 -2.0, %v1244_v0  ;;  %v1612_v62 = vmul.f32 4.0, %v3357_v45  ;;  %v140_v35 = vadd.s32 %v114_v38, %v3686_v5  ;;  %v173_v17 = vadd.s32 %v3715_v18, %v139_v58  ;;  %v2790_v0 = vld [vmem:[#allocation4 + $0x98] sm:$0xff] }
 0x102   :  { %v1644_v6 = vand.u32 2147483647, %v3357_v45  ;;  %v1065_v24 = vxor.u32 %v3290_v47, %v969_v31  ;;  %v1066_v53 = vxor.u32 %v3291_v30, %v970_v54  ;;  %3467 = vlog2.f32 %v680_v46 }
 0x103   :  { %vm1899_vm4 = vcmp.gt.f32.partialorder %v1867_v1, 1.0  ;;  %v3388_v40 = vadd.f32 -2.0, %v1867_v1  ;;  %v174_v61 = vadd.s32 %v3715_v18, %v140_v35  ;;  %v3104_v16 = vshrl.u32 %v173_v17, 16 }
 0x104   :  { %v3389_v42 = vadd.f32 -2.0, %v1868_v28  ;;  %v3322_v10 = vshrl.u32 %v1065_v24, 8  ;;  %v3323_v25 = vshrl.u32 %v1066_v53, 8  ;;  %v719_v9 = vadd.s32 %v3727_v21, %v139_v58 }
 0x105   :  { %vm1900_vm5 = vcmp.gt.f32.partialorder %v1868_v28, 1.0  ;;  %v3105_v63 = vshrl.u32 %v174_v61, 16  ;;  %v269_v20 = vxor.u32 %v3104_v16, %v173_v17  ;;  %v720_v8 = vadd.s32 %v3727_v21, %v140_v35  ;;  %v2245_v16 = vld [vmem:[#allocation4 + $0x80] sm:$0xff] }
 0x106   :  { %v1675_v38 = vsub.f32 1.0, %v1643_v19  ;;  %v1676_v45 = vsub.f32 1.0, %v1644_v6  ;;  %v1161_v12 = vcvt.s32.f32 %v3322_v10  ;;  %v1162_v14 = vcvt.s32.f32 %v3323_v25 }
 0x107   :  { %3469 = vrsqrt.f32 %v4353_v52  ;;  %v1963_v46 = vsel %vm1899_vm4, %v3388_v40, %v1867_v1  ;;  %v270_v31 = vxor.u32 %v3105_v63, %v174_v61  ;;  %v301_v54 = vmul.u32 2246822507, %v269_v20 }
 0x108   :  { %v1964_v47 = vsel %vm1900_vm5, %v3389_v42, %v1868_v28  ;;  %v1193_v30 = vmul.f32 5.9604645e-08, %v1161_v12  ;;  %v1194_v58 = vmul.f32 5.9604645e-08, %v1162_v14  ;;  %v3232_v24 = vshrl.u32 %v719_v9, 16 }
 0x109   :  { %v3466_v53 = vpop.eup %3465  ;;  %v2389_v17 = vmul.f32 %v4342_v57, %v2277_v43  ;;  %v4366_v35 = vadd.f32 %v2853_v32, %v2789_v37  ;;  %v302_v19 = vmul.u32 2246822507, %v270_v31  ;;  %v3233_v6 = vshrl.u32 %v720_v8, 16 }
 0x10a   :  { %v2390_v10 = vmul.f32 %v4342_v57, %v2278_v44  ;;  %v4369_v25 = vadd.f32 %v2854_v22, %v2790_v0  ;;  %v4371_v56 = vmul.f32 %v1675_v38, %v1611_v33  ;;  %v4373_v1 = vmul.f32 %v1676_v45, %v1612_v62  ;;  %v2246_v45 = vld [vmem:[#allocation4 + $0x88] sm:$0xff] }
 0x10b   :  { %5733 = vst [vmem:[#allocation22_spill] sm:$0xff] %v4366_v35  ;;  %3471 = vrsqrt.f32 %v4356_v4  ;;  %v2027_v28 = vand.u32 2147483647, %v1963_v46  ;;  %v2028_v40 = vand.u32 2147483647, %v1964_v47  ;;  %v3136_v61 = vshrl.u32 %v301_v54, 13 }
 0x10c   :  { %5734 = vst [vmem:[#allocation23_spill] sm:$0xff] %v4369_v25  ;;  %v3468_v42 = vpop.eup %3467  ;;  %v1238_v43 = vmul.f32 0.6931472, %v3466_v53  ;;  %v1545_v32 = vmul.f32 2.0, %v1193_v30  ;;  %v1546_v63 = vmul.f32 2.0, %v1194_v58  ;;  %v815_v20 = vxor.u32 %v3232_v24, %v719_v9 }
 0x10d   :  { %v4376_v37 = vadd.f32 %v2389_v17, %v2245_v16  ;;  %vm1409_vm6 = vcmp.eq.f32.partialorder %v4353_v52, inf  ;;  %v3137_v57 = vshrl.u32 %v302_v19, 13  ;;  %v816_v44 = vxor.u32 %v3233_v6, %v720_v8 }
 0x10e   :  { %v1739_v22 = vand.u32 2147483647, %v4371_v56  ;;  %v1740_v33 = vand.u32 2147483647, %v4373_v1  ;;  %v1995_v62 = vmul.f32 4.0, %v1963_v46  ;;  %v1996_v38 = vmul.f32 4.0, %v1964_v47 }
 0x10f   :  { %5735 = vst [vmem:[#allocation24_spill] sm:$0xff] %v4376_v37  ;;  %v2059_v12 = vsub.f32 1.0, %v2027_v28  ;;  %v2060_v14 = vsub.f32 1.0, %v2028_v40  ;;  %v1240_v0 = vmul.f32 0.6931472, %v3468_v42  ;;  %v397_v31 = vxor.u32 %v3136_v61, %v301_v54 }
 0x110   :  { %v4381_v30 = vmul.f32 -2.0, %v1238_v43  ;;  %v3354_v9 = vadd.f32 -1.0, %v1545_v32  ;;  %v3355_v58 = vadd.f32 -1.0, %v1546_v63  ;;  %v847_v24 = vmul.u32 2246822507, %v815_v20 }
 0x111   :  { %v3470_v53 = vpop.eup %3469  ;;  %vm1411_vm7 = vcmp.eq.f32.partialorder %v4353_v52, 0.0  ;;  %v1412_v8 = vand.u32 2147483648, %v4353_v52  ;;  %v398_v17 = vxor.u32 %v3137_v57, %v302_v19  ;;  %v848_v6 = vmul.u32 2246822507, %v816_v44 }
 0x112   :  { %v4385_v16 = vadd.f32 %v2390_v10, %v2246_v45  ;;  %vm1416_vm8 = vcmp.eq.f32.partialorder %v4356_v4, inf  ;;  %v1771_v46 = vmul.f32 0.225, %v1739_v22  ;;  %v1641_v47 = vand.u32 2147483647, %v3354_v9 }
 0x113   :  { %v1642_v28 = vand.u32 2147483647, %v3355_v58  ;;  %v1772_v54 = vmul.f32 0.225, %v1740_v33  ;;  %v4388_v40 = vmul.f32 %v2059_v12, %v1995_v62  ;;  %v4390_v61 = vmul.f32 -2.0, %v1240_v0 }
 0x114   :  { %5736 = vst [vmem:[#allocation25_spill] sm:$0xff] %v4385_v16  ;;  %v429_v42 = vmul.u32 3266489909, %v397_v31  ;;  %v1408_v43 = vmul.f32 %v3470_v53, %v4353_v52  ;;  %v4393_v32 = vmul.f32 %v2060_v14, %v1996_v38  ;;  %3473 = vrsqrt.f32 %v4381_v30 }
 0x115   :  { %v3264_v19 = vshrl.u32 %v847_v24, 13  ;;  %v3472_v10 = vpop.eup %3471  ;;  %vm1418_vm9 = vcmp.eq.f32.partialorder %v4356_v4, 0.0  ;;  %v1609_v63 = vmul.f32 4.0, %v3354_v9  ;;  %v1865_v20 = vsub.f32 0.5, %v3354_v9 }
 0x116   :  { %v430_v57 = vmul.u32 3266489909, %v398_v17  ;;  %v3265_v44 = vshrl.u32 %v848_v6, 13  ;;  %v1610_v22 = vmul.f32 4.0, %v3355_v58  ;;  %v1673_v33 = vsub.f32 1.0, %v1641_v47 }
 0x117   :  { %v1674_v62 = vsub.f32 1.0, %v1642_v28  ;;  %v1866_v45 = vsub.f32 0.5, %v3355_v58  ;;  %v1803_v12 = vadd.f32 0.775, %v1771_v46  ;;  %v2123_v0 = vand.u32 2147483647, %v4388_v40 }
 0x118   :  { %3475 = vrsqrt.f32 %v4390_v61  ;;  %v3168_v38 = vshrl.u32 %v429_v42, 16  ;;  %v1410_v14 = vsel %vm1409_vm6, %v4353_v52, %v1408_v43  ;;  %v1804_v31 = vadd.f32 0.775, %v1772_v54 }
 0x119   :  { %v2124_v53 = vand.u32 2147483647, %v4393_v32  ;;  %v943_v9 = vxor.u32 %v3264_v19, %v847_v24  ;;  %v1415_v17 = vmul.f32 %v3472_v10, %v4356_v4  ;;  %v3386_v60 = vadd.f32 -2.0, %v1865_v20 }
 0x11a   :  { %v3169_v47 = vshrl.u32 %v430_v57, 16  ;;  %v944_v28 = vxor.u32 %v3265_v44, %v848_v6  ;;  %v4404_v58 = vmul.f32 %v1673_v33, %v1609_v63  ;;  %v4406_v46 = vmul.f32 %v1674_v62, %v1610_v22 }
 0x11b   :  { %vm1897_vm10 = vcmp.gt.f32.partialorder %v1865_v20, 1.0  ;;  %v3387_v15 = vadd.f32 -2.0, %v1866_v45  ;;  %v1835_v7 = vmul.f32 %v1803_v12, %v4371_v56  ;;  %v2155_v39 = vmul.f32 0.225, %v2123_v0 }
 0x11c   :  { %vm1898_vm11 = vcmp.gt.f32.partialorder %v1866_v45, 1.0  ;;  %v525_v43 = vxor.u32 %v3168_v38, %v429_v42  ;;  %v4411_v54 = vsel %vm1411_vm7, %v1412_v8, %v1410_v14  ;;  %v1419_v24 = vand.u32 2147483648, %v4356_v4 }
 0x11d   :  { %v2156_v19 = vmul.f32 0.225, %v2124_v53  ;;  %v975_v10 = vmul.u32 3266489909, %v943_v9  ;;  %v1417_v6 = vsel %vm1416_vm8, %v4356_v4, %v1415_v17  ;;  %v1961_v63 = vsel %vm1897_vm10, %v3386_v60, %v1865_v20 }
 0x11e   :  { %v526_v44 = vxor.u32 %v3169_v47, %v430_v57  ;;  %v976_v22 = vmul.u32 3266489909, %v944_v28  ;;  %v3474_v33 = vpop.eup %3473  ;;  %v1737_v56 = vand.u32 2147483647, %v4404_v58  ;;  %v1738_v42 = vand.u32 2147483647, %v4406_v46 }
 0x11f   :  { %v1962_v62 = vsel %vm1898_vm11, %v3387_v15, %v1866_v45  ;;  %v73_v52 = vadd.s32 64, %v3677_v2  ;;  %v1836_v8 = vmul.f32 %v1804_v31, %v4373_v1  ;;  %v2187_v12 = vadd.f32 0.775, %v2155_v39 }
 0x120   :  { %v2827_v0 = vmul.f32 %v1835_v7, %v4411_v54  ;;  %v3200_v38 = vshrl.u32 %v525_v43, 8  ;;  %v1420_v14 = vsel %vm1418_vm9, %v1419_v24, %v1417_v6  ;;  %v2188_v60 = vadd.f32 0.775, %v2156_v19 }
 0x121   :  { %v2025_v20 = vand.u32 2147483647, %v1961_v63  ;;  %v3296_v57 = vshrl.u32 %v975_v10, 16  ;;  %vm1395_vm12 = vcmp.eq.f32.partialorder %v4381_v30, inf  ;;  %v2026_v9 = vand.u32 2147483647, %v1962_v62 }
 0x122   :  { %v3476_v53 = vpop.eup %3475  ;;  %v3201_v17 = vshrl.u32 %v526_v44, 8  ;;  %v3297_v15 = vshrl.u32 %v976_v22, 16  ;;  %vm1397_vm13 = vcmp.eq.f32.partialorder %v4381_v30, 0.0  ;;  %v1769_v45 = vmul.f32 0.225, %v1737_v56 }
 0x123   :  { %v1770_v1 = vmul.f32 0.225, %v1738_v42  ;;  %v113_v39 = vmul.u32 512, %v73_v52  ;;  %v1394_v7 = vmul.f32 %v3474_v33, %v4381_v30  ;;  %v1398_v31 = vand.u32 2147483648, %v4381_v30 }
 0x124   :  { %v1993_v4 = vmul.f32 4.0, %v1961_v63  ;;  %v621_v47 = vcvt.s32.f32 %v3200_v38  ;;  %v1401_v28 = vmul.f32 %v3476_v53, %v4390_v61  ;;  %v2057_v43 = vsub.f32 1.0, %v2025_v20 }
 0x125   :  { %v1071_v24 = vxor.u32 %v3296_v57, %v975_v10  ;;  %v137_v19 = vadd.s32 %v113_v39, %v3679_v3  ;;  %vm1402_vm14 = vcmp.eq.f32.partialorder %v4390_v61, inf  ;;  %v1405_v6 = vand.u32 2147483648, %v4390_v61 }
 0x126   :  { %v622_v44 = vcvt.s32.f32 %v3201_v17  ;;  %v1072_v56 = vxor.u32 %v3297_v15, %v976_v22  ;;  %v1801_v42 = vadd.f32 0.775, %v1769_v45  ;;  %v1802_v52 = vadd.f32 0.775, %v1770_v1  ;;  %v2339_v45 = vpop.permute.xlu1 %2338 }
 0x127   :  { %v1994_v50 = vmul.f32 4.0, %v1962_v62  ;;  %v2058_v33 = vsub.f32 1.0, %v2026_v9  ;;  %v1396_v63 = vsel %vm1395_vm12, %v4381_v30, %v1394_v7  ;;  %v653_v38 = vadd.f32 0.5, %v621_v47 }
 0x128   :  { %v138_v20 = vadd.s32 %v113_v39, %v3686_v5  ;;  %v171_v10 = vadd.s32 %v3715_v18, %v137_v19  ;;  %v1403_v57 = vsel %vm1402_vm14, %v4390_v61, %v1401_v28  ;;  %vm1404_vm15 = vcmp.eq.f32.partialorder %v4390_v61, 0.0 }
 0x129   :  { %v4439_v53 = vmul.f32 %v2057_v43, %v1993_v4  ;;  %v3328_v22 = vshrl.u32 %v1071_v24, 8  ;;  %v2219_v17 = vmul.f32 %v2187_v12, %v4388_v40  ;;  %v2220_v62 = vmul.f32 %v2188_v60, %v4393_v32 }
 0x12a   :  { %v654_v9 = vadd.f32 0.5, %v622_v44  ;;  %v3329_v15 = vshrl.u32 %v1072_v56, 8  ;;  %v4445_v1 = vsel %vm1397_vm13, %v1398_v31, %v1396_v63  ;;  %v1833_v39 = vmul.f32 %v1801_v42, %v4404_v58  ;;  %v2795_v56 = vld [vmem:[#allocation4 + $0xf0] sm:$0xff]  ;;  %v4461_v63 = vpop.permute.xlu0 %2333 }
 0x12b   :  { %v1834_v7 = vmul.f32 %v1802_v52, %v4406_v46  ;;  %v4449_v47 = vmul.f32 %v2058_v33, %v1994_v50  ;;  %v4451_v61 = vsel %vm1404_vm15, %v1405_v6, %v1403_v57  ;;  %v685_v4 = vmul.f32 5.9604645e-08, %v653_v38 }
 0x12c   :  { %v172_v40 = vadd.s32 %v3715_v18, %v138_v20  ;;  %v3102_v12 = vshrl.u32 %v171_v10, 16  ;;  %v2121_v32 = vand.u32 2147483647, %v4439_v53  ;;  %v1167_v60 = vcvt.s32.f32 %v3328_v22 }
 0x12d   :  { %v717_v28 = vadd.s32 %v3727_v21, %v137_v19  ;;  %v718_v30 = vadd.s32 %v3727_v21, %v138_v20  ;;  %v2828_v31 = vmul.f32 %v1836_v8, %v1420_v14  ;;  %v2859_v43 = vmul.f32 %v2827_v0, %v2339_v45 }
 0x12e   :  { %v686_v58 = vmul.f32 5.9604645e-08, %v654_v9  ;;  %v1168_v24 = vcvt.s32.f32 %v3329_v15  ;;  %v2283_v50 = vmul.f32 %v2219_v17, %v4411_v54  ;;  %v2284_v46 = vmul.f32 %v2220_v62, %v1420_v14  ;;  %v2796_v14 = vld [vmem:[#allocation4 + $0xf8] sm:$0xff]  ;;  %v2251_v15 = vld [vmem:[#allocation4 + $0xe0] sm:$0xff] }
 0x12f   :  { %v2122_v6 = vand.u32 2147483647, %v4449_v47  ;;  %v2825_v44 = vmul.f32 %v1833_v39, %v4445_v1  ;;  %v2826_v42 = vmul.f32 %v1834_v7, %v4451_v61  ;;  %3477 = vlog2.f32 %v685_v4 }
 0x130   :  { %v3103_v52 = vshrl.u32 %v172_v40, 16  ;;  %v267_v33 = vxor.u32 %v3102_v12, %v171_v10  ;;  %v2153_v19 = vmul.f32 0.225, %v2121_v32  ;;  %v1199_v8 = vmul.f32 5.9604645e-08, %v1167_v60  ;;  %v2252_v12 = vld [vmem:[#allocation4 + $0xe8] sm:$0xff]  ;;  %v2793_v60 = vld [vmem:[#allocation4 + $0xd0] sm:$0xff] }
 0x131   :  { %v3230_v0 = vshrl.u32 %v717_v28, 16  ;;  %v3231_v38 = vshrl.u32 %v718_v30, 16  ;;  %v2860_v20 = vmul.f32 %v2828_v31, %v2339_v45  ;;  %v1200_v57 = vmul.f32 5.9604645e-08, %v1168_v24  ;;  %v2794_v31 = vld [vmem:[#allocation4 + $0xd8] sm:$0xff] }
 0x132   :  { %3479 = vlog2.f32 %v686_v58  ;;  %v76_v54 = vadd.s32 88, %v3677_v2  ;;  %v2395_v22 = vmul.f32 %v2339_v45, %v2283_v50  ;;  %v2396_v17 = vmul.f32 %v2339_v45, %v2284_v46 }
 0x133   :  { %v4464_v62 = vadd.f32 %v2859_v43, %v2795_v56  ;;  %v2154_v9 = vmul.f32 0.225, %v2122_v6  ;;  %v2857_v10 = vmul.f32 %v2825_v44, %v4461_v63  ;;  %v2858_v39 = vmul.f32 %v2826_v42, %v4461_v63 }
 0x134   :  { %v268_v7 = vxor.u32 %v3103_v52, %v172_v40  ;;  %v299_v4 = vmul.u32 2246822507, %v267_v33  ;;  %v2185_v32 = vadd.f32 0.775, %v2153_v19  ;;  %v1551_v58 = vmul.f32 2.0, %v1199_v8 }
 0x135   :  { %5737 = vst [vmem:[#allocation26_spill] sm:$0xff] %v4464_v62  ;;  %v813_v24 = vxor.u32 %v3230_v0, %v717_v28  ;;  %v814_v59 = vxor.u32 %v3231_v38, %v718_v30  ;;  %v4468_v51 = vadd.f32 %v2860_v20, %v2796_v14  ;;  %v1552_v45 = vmul.f32 2.0, %v1200_v57 }
 0x136   :  { %v300_v43 = vmul.u32 2246822507, %v268_v7  ;;  %v116_v50 = vmul.u32 512, %v76_v54  ;;  %v4470_v46 = vadd.f32 %v2395_v22, %v2251_v15  ;;  %v2186_v6 = vadd.f32 0.775, %v2154_v9 }
 0x137   :  { %5738 = vst [vmem:[#allocation27_spill] sm:$0xff] %v4468_v51  ;;  %v3134_v44 = vshrl.u32 %v299_v4, 13  ;;  %v845_v56 = vmul.u32 2246822507, %v813_v24  ;;  %v4472_v42 = vadd.f32 %v2396_v17, %v2252_v12  ;;  %v4474_v40 = vadd.f32 %v2857_v10, %v2793_v60 }
 0x138   :  { %5739 = vst [vmem:[#allocation28_spill] sm:$0xff] %v4470_v46  ;;  %v4476_v52 = vadd.f32 %v2858_v39, %v2794_v31  ;;  %v3135_v33 = vshrl.u32 %v300_v43, 13  ;;  %v2217_v28 = vmul.f32 %v2185_v32, %v4439_v53  ;;  %v3360_v30 = vadd.f32 -1.0, %v1551_v58 }
 0x139   :  { %5740 = vst [vmem:[#allocation29_spill] sm:$0xff] %v4472_v42  ;;  %5741 = vst [vmem:[#allocation30_spill] sm:$0xff] %v4474_v40  ;;  %v395_v19 = vxor.u32 %v3134_v44, %v299_v4  ;;  %v846_v8 = vmul.u32 2246822507, %v814_v59  ;;  %v3478_v0 = vpop.eup %3477  ;;  %v3361_v38 = vadd.f32 -1.0, %v1552_v45  ;;  %v3262_v57 = vshrl.u32 %v845_v56, 13 }
 0x13a   :  { %5742 = vst [vmem:[#allocation31_spill] sm:$0xff] %v4476_v52  ;;  %v396_v20 = vxor.u32 %v3135_v33, %v300_v43  ;;  %v143_v54 = vadd.s32 %v116_v50, %v3679_v3  ;;  %v4481_v14 = vmul.f32 %v2186_v6, %v4449_v47  ;;  %v144_v17 = vadd.s32 %v116_v50, %v3686_v5 }
 0x13b   :  { %v427_v22 = vmul.u32 3266489909, %v395_v19  ;;  %v4485_v9 = vadd.s32 80, %v3677_v2  ;;  %v3263_v10 = vshrl.u32 %v846_v8, 13  ;;  %v941_v39 = vxor.u32 %v3262_v57, %v845_v56 }
 0x13c   :  { %v3480_v15 = vpop.eup %3479  ;;  %v428_v53 = vmul.u32 3266489909, %v396_v20  ;;  %v4488_v59 = vadd.s32 104, %v3677_v2  ;;  %v4491_v7 = vmul.f32 %v2217_v28, %v4445_v1  ;;  %v1250_v4 = vmul.f32 0.6931472, %v3478_v0 }
 0x13d   :  { %v1871_v12 = vsub.f32 0.5, %v3360_v30  ;;  %v3166_v47 = vshrl.u32 %v427_v22, 16  ;;  %v1872_v32 = vsub.f32 0.5, %v3361_v38  ;;  %v942_v31 = vxor.u32 %v3263_v10, %v846_v8 }
 0x13e   :  { %v3167_v60 = vshrl.u32 %v428_v53, 16  ;;  %v177_v58 = vadd.s32 %v3715_v18, %v143_v54  ;;  %v1252_v24 = vmul.f32 0.6931472, %v3480_v15  ;;  %v1615_v45 = vmul.f32 4.0, %v3360_v30 }
 0x13f   :  { %v1647_v43 = vand.u32 2147483647, %v3360_v30  ;;  %v178_v50 = vadd.s32 %v3715_v18, %v144_v17  ;;  %v1616_v6 = vmul.f32 4.0, %v3361_v38  ;;  %v1648_v44 = vand.u32 2147483647, %v3361_v38 }
 0x140   :  { %v523_v56 = vxor.u32 %v3166_v47, %v427_v22  ;;  %v973_v33 = vmul.u32 3266489909, %v941_v39  ;;  %v4495_v19 = vmul.f32 -2.0, %v1250_v4  ;;  %vm1903_vm0 = vcmp.gt.f32.partialorder %v1871_v12, 1.0 }
 0x141   :  { %v3392_v1 = vadd.f32 -2.0, %v1871_v12  ;;  %v974_v28 = vmul.u32 3266489909, %v942_v31  ;;  %v3393_v0 = vadd.f32 -2.0, %v1872_v32  ;;  %v524_v20 = vxor.u32 %v3167_v60, %v428_v53 }
 0x142   :  { %v3294_v57 = vshrl.u32 %v973_v33, 16  ;;  %v3108_v8 = vshrl.u32 %v177_v58, 16  ;;  %v4497_v10 = vmul.f32 -2.0, %v1252_v24  ;;  %vm1904_vm1 = vcmp.gt.f32.partialorder %v1872_v32, 1.0 }
 0x143   :  { %v3198_v15 = vshrl.u32 %v523_v56, 8  ;;  %v3295_v30 = vshrl.u32 %v974_v28, 16  ;;  %v1679_v51 = vsub.f32 1.0, %v1647_v43  ;;  %v1680_v62 = vsub.f32 1.0, %v1648_v44 }
 0x144   :  { %v1069_v42 = vxor.u32 %v3294_v57, %v973_v33  ;;  %v723_v38 = vadd.s32 %v3727_v21, %v143_v54  ;;  %3481 = vrsqrt.f32 %v4495_v19  ;;  %v1967_v22 = vsel %vm1903_vm0, %v3392_v1, %v1871_v12 }
 0x145   :  { %v1070_v39 = vxor.u32 %v3295_v30, %v974_v28  ;;  %v3109_v4 = vshrl.u32 %v178_v50, 16  ;;  %v1968_v47 = vsel %vm1904_vm1, %v3393_v0, %v1872_v32  ;;  %v3199_v53 = vshrl.u32 %v524_v20, 8 }
 0x146   :  { %v3326_v60 = vshrl.u32 %v1069_v42, 8  ;;  %v273_v31 = vxor.u32 %v3108_v8, %v177_v58  ;;  %3483 = vrsqrt.f32 %v4497_v10  ;;  %v619_v24 = vcvt.s32.f32 %v3198_v15 }
 0x147   :  { %v3327_v56 = vshrl.u32 %v1070_v39, 8  ;;  %v274_v46 = vxor.u32 %v3109_v4, %v178_v50  ;;  %v724_v33 = vadd.s32 %v3727_v21, %v144_v17  ;;  %v3236_v54 = vshrl.u32 %v723_v38, 16 }
 0x148   :  { %v1165_v43 = vcvt.s32.f32 %v3326_v60  ;;  %v305_v44 = vmul.u32 2246822507, %v273_v31  ;;  %v4504_v57 = vmul.f32 %v1679_v51, %v1615_v45  ;;  %v2031_v52 = vand.u32 2147483647, %v1967_v22 }
 0x149   :  { %v2032_v12 = vand.u32 2147483647, %v1968_v47  ;;  %v306_v1 = vmul.u32 2246822507, %v274_v46  ;;  %v4506_v28 = vmul.f32 %v1680_v62, %v1616_v6  ;;  %v620_v32 = vcvt.s32.f32 %v3199_v53 }
 0x14a   :  { %v1166_v42 = vcvt.s32.f32 %v3327_v56  ;;  %v3140_v58 = vshrl.u32 %v305_v44, 13  ;;  %v1999_v0 = vmul.f32 4.0, %v1967_v22  ;;  %v651_v20 = vadd.f32 0.5, %v619_v24 }
 0x14b   :  { %v1197_v8 = vmul.f32 5.9604645e-08, %v1165_v43  ;;  %v3141_v15 = vshrl.u32 %v306_v1, 13  ;;  %v2000_v50 = vmul.f32 4.0, %v1968_v47  ;;  %v3237_v39 = vshrl.u32 %v724_v33, 16 }
 0x14c   :  { %v401_v30 = vxor.u32 %v3140_v58, %v305_v44  ;;  %v819_v4 = vxor.u32 %v3236_v54, %v723_v38  ;;  %v1743_v17 = vand.u32 2147483647, %v4504_v57  ;;  %v2063_v51 = vsub.f32 1.0, %v2031_v52 }
 0x14d   :  { %v2064_v45 = vsub.f32 1.0, %v2032_v12  ;;  %v402_v60 = vxor.u32 %v3141_v15, %v306_v1  ;;  %v1744_v46 = vand.u32 2147483647, %v4506_v28  ;;  %v652_v62 = vadd.f32 0.5, %v620_v32 }
 0x14e   :  { %v1198_v6 = vmul.f32 5.9604645e-08, %v1166_v42  ;;  %v433_v53 = vmul.u32 3266489909, %v401_v30  ;;  %v3482_v31 = vpop.eup %3481  ;;  %v2282_v22 = vmul.f32 %v4481_v14, %v4451_v61  ;;  %v4514_v47 = vmul.f32 %v4461_v63, %v4491_v7 }
 0x14f   :  { %v683_v24 = vmul.f32 5.9604645e-08, %v651_v20  ;;  %v1549_v38 = vmul.f32 2.0, %v1197_v8  ;;  %v434_v56 = vmul.u32 3266489909, %v402_v60  ;;  %v820_v52 = vxor.u32 %v3237_v39, %v724_v33 }
 0x150   :  { %v3172_v43 = vshrl.u32 %v433_v53, 16  ;;  %v851_v44 = vmul.u32 2246822507, %v819_v4  ;;  %v3484_v54 = vpop.eup %3483  ;;  %vm1437_vm2 = vcmp.eq.f32.partialorder %v4495_v19, inf  ;;  %v1775_v12 = vmul.f32 0.225, %v1743_v17 }
 0x151   :  { %v4517_v1 = vmul.f32 %v2063_v51, %v1999_v0  ;;  %v4519_v32 = vmul.f32 %v2064_v45, %v2000_v50  ;;  %v1776_v14 = vmul.f32 0.225, %v1744_v46  ;;  %v684_v42 = vmul.f32 5.9604645e-08, %v652_v62 }
 0x152   :  { %v1550_v7 = vmul.f32 2.0, %v1198_v6  ;;  %vm1444_vm3 = vcmp.eq.f32.partialorder %v4497_v10, inf  ;;  %v3358_v58 = vadd.f32 -1.0, %v1549_v38  ;;  %v529_v20 = vxor.u32 %v3172_v43, %v433_v53 }
 0x153   :  { %v115_v33 = vmul.u32 512, %v4485_v9  ;;  %3485 = vlog2.f32 %v683_v24  ;;  %v3173_v8 = vshrl.u32 %v434_v56, 16  ;;  %v852_v15 = vmul.u32 2246822507, %v820_v52 }
 0x154   :  { %v3268_v30 = vshrl.u32 %v851_v44, 13  ;;  %v4525_v0 = vmul.f32 %v4461_v63, %v2282_v22  ;;  %v1807_v50 = vadd.f32 0.775, %v1775_v12  ;;  %v2127_v39 = vand.u32 2147483647, %v4517_v1 }
 0x155   :  { %v2128_v4 = vand.u32 2147483647, %v4519_v32  ;;  %v1436_v17 = vmul.f32 %v3482_v31, %v4495_v19  ;;  %vm1439_vm4 = vcmp.eq.f32.partialorder %v4495_v19, 0.0  ;;  %v1808_v51 = vadd.f32 0.775, %v1776_v14 }
 0x156   :  { %3487 = vlog2.f32 %v684_v42  ;;  %v3359_v45 = vadd.f32 -1.0, %v1550_v7  ;;  %v1869_v9 = vsub.f32 0.5, %v3358_v58  ;;  %v3204_v60 = vshrl.u32 %v529_v20, 8 }
 0x157   :  { %v4532_v46 = vadd.s32 %v115_v33, %v3679_v3  ;;  %v4535_v63 = vadd.s32 %v115_v33, %v3686_v5  ;;  %vm1446_vm5 = vcmp.eq.f32.partialorder %v4497_v10, 0.0  ;;  %v530_v62 = vxor.u32 %v3173_v8, %v434_v56 }
 0x158   :  { %v3269_v6 = vshrl.u32 %v852_v15, 13  ;;  %v947_v53 = vxor.u32 %v3268_v30, %v851_v44  ;;  %v1443_v31 = vmul.f32 %v3484_v54, %v4497_v10  ;;  %v1447_v22 = vand.u32 2147483648, %v4497_v10 }
 0x159   :  { %v2159_v24 = vmul.f32 0.225, %v2127_v39  ;;  %v2160_v38 = vmul.f32 0.225, %v2128_v4  ;;  %v1438_v43 = vsel %vm1437_vm2, %v4495_v19, %v1436_v17  ;;  %v1839_v52 = vmul.f32 %v1807_v50, %v4504_v57 }
 0x15a   :  { %v1840_v12 = vmul.f32 %v1808_v51, %v4506_v28  ;;  %v1870_v14 = vsub.f32 0.5, %v3359_v45  ;;  %v3390_v42 = vadd.f32 -2.0, %v1869_v9  ;;  %v625_v7 = vcvt.s32.f32 %v3204_v60 }
 0x15b   :  { %v175_v56 = vadd.s32 %v3715_v18, %v4532_v46  ;;  %v176_v44 = vadd.s32 %v3715_v18, %v4535_v63  ;;  %vm1901_vm6 = vcmp.gt.f32.partialorder %v1869_v9, 1.0  ;;  %v3205_v54 = vshrl.u32 %v530_v62, 8 }
 0x15c   :  { %v948_v20 = vxor.u32 %v3269_v6, %v852_v15  ;;  %v979_v33 = vmul.u32 3266489909, %v947_v53  ;;  %v1445_v8 = vsel %vm1444_vm3, %v4497_v10, %v1443_v31  ;;  %v2191_v57 = vadd.f32 0.775, %v2159_v24 }
 0x15d   :  { %v2192_v30 = vadd.f32 0.775, %v2160_v38  ;;  %v1645_v28 = vand.u32 2147483647, %v3358_v58  ;;  %v3486_v50 = vpop.eup %3485  ;;  %v1646_v39 = vand.u32 2147483647, %v3359_v45  ;;  %v1965_v60 = vsel %vm1901_vm6, %v3390_v42, %v1869_v9 }
 0x15e   :  { %v3391_v4 = vadd.f32 -2.0, %v1870_v14  ;;  %v980_v17 = vmul.u32 3266489909, %v948_v20  ;;  %v3300_v51 = vshrl.u32 %v979_v33, 16  ;;  %vm1902_vm7 = vcmp.gt.f32.partialorder %v1870_v14, 1.0 }
 0x15f   :  { %v657_v61 = vadd.f32 0.5, %v625_v7  ;;  %v3106_v40 = vshrl.u32 %v175_v56, 16  ;;  %v626_v62 = vcvt.s32.f32 %v3205_v54  ;;  %v3107_v53 = vshrl.u32 %v176_v44, 16 }
 0x160   :  { %v3488_v25 = vpop.eup %3487  ;;  %v3301_v15 = vshrl.u32 %v980_v17, 16  ;;  %v1075_v6 = vxor.u32 %v3300_v51, %v979_v33  ;;  %v5743_v35 = vand.u32 2147483648, %v4495_v19  ;;  %v1448_v24 = vsel %vm1446_vm5, %v1447_v22, %v1445_v8 }
 0x161   :  { %v1246_v38 = vmul.f32 0.6931472, %v3486_v50  ;;  %v1613_v20 = vmul.f32 4.0, %v3358_v58  ;;  %v1677_v16 = vsub.f32 1.0, %v1645_v28  ;;  %v1966_v37 = vsel %vm1902_vm7, %v3391_v4, %v1870_v14  ;;  %v2249_v28 = vld [vmem:[#allocation4 + $0xc0] sm:$0xff] }
 0x162   :  { %v1441_v31 = vsel %vm1439_vm4, %v5743_v35, %v1438_v43  ;;  %v1076_v9 = vxor.u32 %v3301_v15, %v980_v17  ;;  %v271_v42 = vxor.u32 %v3106_v40, %v175_v56  ;;  %v1248_v7 = vmul.f32 0.6931472, %v3488_v25 }
 0x163   :  { %v2029_v26 = vand.u32 2147483647, %v1965_v60  ;;  %v689_v54 = vmul.f32 5.9604645e-08, %v657_v61  ;;  %v3332_v34 = vshrl.u32 %v1075_v6, 8  ;;  %v1614_v33 = vmul.f32 4.0, %v3359_v45 }
 0x164   :  { %v1678_v51 = vsub.f32 1.0, %v1646_v39  ;;  %v658_v11 = vadd.f32 0.5, %v626_v62  ;;  %v272_v49 = vxor.u32 %v3107_v53, %v176_v44  ;;  %v2223_v19 = vmul.f32 %v2191_v57, %v4517_v1  ;;  %v2799_v62 = vld [vmem:[#allocation4 + $0x130] sm:$0xff] }
 0x165   :  { %v2224_v35 = vmul.f32 %v2192_v30, %v4519_v32  ;;  %v4560_v10 = vmul.f32 -2.0, %v1246_v38  ;;  %v2030_v22 = vand.u32 2147483647, %v1966_v37  ;;  %v4562_v58 = vmul.f32 %v1677_v16, %v1613_v20  ;;  %v2349_v32 = vpop.permute.xlu1 %2348 }
 0x166   :  { %v1997_v43 = vmul.f32 4.0, %v1965_v60  ;;  %v3333_v14 = vshrl.u32 %v1076_v9, 8  ;;  %v303_v40 = vmul.u32 2246822507, %v271_v42  ;;  %v4564_v25 = vmul.f32 -2.0, %v1248_v7  ;;  %v2250_v60 = vld [vmem:[#allocation4 + $0xc8] sm:$0xff] }
 0x167   :  { %v2061_v61 = vsub.f32 1.0, %v2029_v26  ;;  %v1171_v56 = vcvt.s32.f32 %v3332_v34  ;;  %3489 = vlog2.f32 %v689_v54  ;;  %v2831_v45 = vmul.f32 %v1839_v52, %v1441_v31 }
 0x168   :  { %v4566_v8 = vmul.f32 %v1678_v51, %v1614_v33  ;;  %v690_v44 = vmul.f32 5.9604645e-08, %v658_v11  ;;  %v304_v1 = vmul.u32 2246822507, %v272_v49  ;;  %v2832_v57 = vmul.f32 %v1840_v12, %v1448_v24 }
 0x169   :  { %3491 = vrsqrt.f32 %v4560_v10  ;;  %v1998_v30 = vmul.f32 4.0, %v1966_v37  ;;  %v2062_v16 = vsub.f32 1.0, %v2030_v22  ;;  %v2287_v50 = vmul.f32 %v2223_v19, %v1441_v31 }
 0x16a   :  { %v2288_v39 = vmul.f32 %v2224_v35, %v1448_v24  ;;  %v1172_v4 = vcvt.s32.f32 %v3333_v14  ;;  %v3138_v17 = vshrl.u32 %v303_v40, 13  ;;  %3493 = vrsqrt.f32 %v4564_v25  ;;  %v2800_v24 = vld [vmem:[#allocation4 + $0x138] sm:$0xff] }
 0x16b   :  { %v1741_v34 = vand.u32 2147483647, %v4562_v58  ;;  %v4571_v26 = vmul.f32 %v2061_v61, %v1997_v43  ;;  %v1203_v11 = vmul.f32 5.9604645e-08, %v1171_v56  ;;  %v2863_v49 = vmul.f32 %v2831_v45, %v2349_v32 }
 0x16c   :  { %v1742_v52 = vand.u32 2147483647, %v4566_v8  ;;  %3495 = vlog2.f32 %v690_v44  ;;  %v3139_v12 = vshrl.u32 %v304_v1, 13  ;;  %v4575_v37 = vadd.f32 %v4514_v47, %v2249_v28 }
 0x16d   :  { %v2864_v15 = vmul.f32 %v2832_v57, %v2349_v32  ;;  %v4577_v6 = vmul.f32 %v2062_v16, %v1998_v30  ;;  %v721_v53 = vadd.s32 %v3727_v21, %v4532_v46  ;;  %v4582_v31 = vadd.f32 %v4525_v0, %v2250_v60  ;;  %v2255_v0 = vld [vmem:[#allocation4 + $0x120] sm:$0xff] }
 0x16e   :  { %v2399_v38 = vmul.f32 %v2349_v32, %v2287_v50  ;;  %v1204_v20 = vmul.f32 5.9604645e-08, %v1172_v4  ;;  %v399_v9 = vxor.u32 %v3138_v17, %v303_v40  ;;  %v1773_v42 = vmul.f32 0.225, %v1741_v34 }
 0x16f   :  { %v2125_v7 = vand.u32 2147483647, %v4571_v26  ;;  %v1555_v54 = vmul.f32 2.0, %v1203_v11  ;;  %v722_v47 = vadd.s32 %v3727_v21, %v4535_v63  ;;  %v4587_v33 = vmul.f32 %v2349_v32, %v2288_v39 }
 0x170   :  { %v4589_v51 = vadd.f32 %v2863_v49, %v2799_v62  ;;  %v1774_v19 = vmul.f32 0.225, %v1742_v52  ;;  %v400_v46 = vxor.u32 %v3139_v12, %v304_v1  ;;  %v4591_v22 = vadd.f32 %v2864_v15, %v2800_v24 }
 0x171   :  { %v3490_v35 = vpop.eup %3489  ;;  %vm1423_vm8 = vcmp.eq.f32.partialorder %v4560_v10, inf  ;;  %v2126_v43 = vand.u32 2147483647, %v4577_v6  ;;  %v3234_v14 = vshrl.u32 %v721_v53, 16  ;;  %vm1425_vm9 = vcmp.eq.f32.partialorder %v4560_v10, 0.0 }
 0x172   :  { %5744 = vst [vmem:[#allocation32_spill] sm:$0xff] %v4589_v51  ;;  %5745 = vst [vmem:[#allocation33_spill] sm:$0xff] %v4591_v22  ;;  %v1426_v40 = vand.u32 2147483648, %v4560_v10  ;;  %v1556_v63 = vmul.f32 2.0, %v1204_v20  ;;  %v431_v61 = vmul.u32 3266489909, %v399_v9  ;;  %v4597_v32 = vadd.f32 %v2399_v38, %v2255_v0 }
 0x173   :  { %v3492_v56 = vpop.eup %3491  ;;  %v1805_v45 = vadd.f32 0.775, %v1773_v42  ;;  %v2157_v44 = vmul.f32 0.225, %v2125_v7  ;;  %v3364_v57 = vadd.f32 -1.0, %v1555_v54  ;;  %v3235_v1 = vshrl.u32 %v722_v47, 16 }
 0x174   :  { %5746 = vst [vmem:[#allocation34_spill] sm:$0xff] %v4597_v32  ;;  %v1806_v30 = vadd.f32 0.775, %v1774_v19  ;;  %v1258_v16 = vmul.f32 0.6931472, %v3490_v35  ;;  %v3494_v50 = vpop.eup %3493  ;;  %vm1430_vm10 = vcmp.eq.f32.partialorder %v4564_v25, inf  ;;  %v817_v4 = vxor.u32 %v3234_v14, %v721_v53 }
 0x175   :  { %v432_v28 = vmul.u32 3266489909, %v400_v46  ;;  %vm1432_vm11 = vcmp.eq.f32.partialorder %v4564_v25, 0.0  ;;  %v2158_v39 = vmul.f32 0.225, %v2126_v43  ;;  %v1422_v60 = vmul.f32 %v3492_v56, %v4560_v10 }
 0x176   :  { %v3496_v17 = vpop.eup %3495  ;;  %v1433_v34 = vand.u32 2147483648, %v4564_v25  ;;  %v3365_v11 = vadd.f32 -1.0, %v1556_v63  ;;  %v3170_v49 = vshrl.u32 %v431_v61, 16  ;;  %v1837_v52 = vmul.f32 %v1805_v45, %v4562_v58 }
 0x177   :  { %v2189_v12 = vadd.f32 0.775, %v2157_v44  ;;  %v1875_v62 = vsub.f32 0.5, %v3364_v57  ;;  %v818_v15 = vxor.u32 %v3235_v1, %v722_v47  ;;  %v4605_v24 = vmul.f32 %v1806_v30, %v4566_v8 }
 0x178   :  { %v4607_v38 = vmul.f32 -2.0, %v1258_v16  ;;  %v1651_v20 = vand.u32 2147483647, %v3364_v57  ;;  %v3171_v9 = vshrl.u32 %v432_v28, 16  ;;  %v1429_v53 = vmul.f32 %v3494_v50, %v4564_v25 }
 0x179   :  { %v2190_v42 = vadd.f32 0.775, %v2158_v39  ;;  %v1260_v7 = vmul.f32 0.6931472, %v3496_v17  ;;  %v849_v54 = vmul.u32 2246822507, %v817_v4  ;;  %v1424_v19 = vsel %vm1423_vm8, %v4560_v10, %v1422_v60 }
 0x17a   :  { %v1652_v58 = vand.u32 2147483647, %v3365_v11  ;;  %v1876_v46 = vsub.f32 0.5, %v3365_v11  ;;  %v527_v35 = vxor.u32 %v3170_v49, %v431_v61  ;;  %v2221_v47 = vmul.f32 %v2189_v12, %v4571_v26 }
 0x17b   :  { %v1619_v8 = vmul.f32 4.0, %v3364_v57  ;;  %v3396_v0 = vadd.f32 -2.0, %v1875_v62  ;;  %v850_v43 = vmul.u32 2246822507, %v818_v15  ;;  %3497 = vrsqrt.f32 %v4607_v38 }
 0x17c   :  { %v1683_v14 = vsub.f32 1.0, %v1651_v20  ;;  %vm1907_vm12 = vcmp.gt.f32.partialorder %v1875_v62, 1.0  ;;  %v528_v63 = vxor.u32 %v3171_v9, %v432_v28  ;;  %v1427_v56 = vsel %vm1425_vm9, %v1426_v40, %v1424_v19 }
 0x17d   :  { %v1431_v45 = vsel %vm1430_vm10, %v4564_v25, %v1429_v53  ;;  %v4620_v44 = vmul.f32 -2.0, %v1260_v7  ;;  %v3266_v61 = vshrl.u32 %v849_v54, 13  ;;  %v1620_v1 = vmul.f32 4.0, %v3365_v11 }
 0x17e   :  { %v1684_v26 = vsub.f32 1.0, %v1652_v58  ;;  %v3397_v57 = vadd.f32 -2.0, %v1876_v46  ;;  %v3202_v30 = vshrl.u32 %v527_v35, 8  ;;  %vm1908_vm13 = vcmp.gt.f32.partialorder %v1876_v46, 1.0 }
 0x17f   :  { %v1971_v16 = vsel %vm1907_vm12, %v3396_v0, %v1875_v62  ;;  %v3267_v50 = vshrl.u32 %v850_v43, 13  ;;  %v945_v39 = vxor.u32 %v3266_v61, %v849_v54  ;;  %v4624_v28 = vsel %vm1432_vm11, %v1433_v34, %v1431_v45 }
 0x180   :  { %v4627_v10 = vmul.f32 %v2190_v42, %v4577_v6  ;;  %v4629_v40 = vmul.f32 %v1683_v14, %v1619_v8  ;;  %v3203_v4 = vshrl.u32 %v528_v63, 8  ;;  %v4631_v17 = vmul.f32 %v2221_v47, %v1427_v56 }
 0x181   :  { %3499 = vrsqrt.f32 %v4620_v44  ;;  %v946_v60 = vxor.u32 %v3267_v50, %v850_v43  ;;  %v977_v11 = vmul.u32 3266489909, %v945_v39  ;;  %v1972_v49 = vsel %vm1908_vm13, %v3397_v57, %v1876_v46 }
 0x182   :  { %v2035_v12 = vand.u32 2147483647, %v1971_v16  ;;  %v623_v62 = vcvt.s32.f32 %v3202_v30  ;;  %v118_v15 = vmul.u32 512, %v4488_v59  ;;  %v4635_v25 = vmul.f32 %v1837_v52, %v1427_v56 }
 0x183   :  { %v4637_v34 = vmul.f32 %v1684_v26, %v1620_v1  ;;  %v978_v6 = vmul.u32 3266489909, %v946_v60  ;;  %v3298_v20 = vshrl.u32 %v977_v11, 16  ;;  %v1747_v9 = vand.u32 2147483647, %v4629_v40 }
 0x184   :  { %v624_v53 = vcvt.s32.f32 %v3203_v4  ;;  %v147_v42 = vadd.s32 %v118_v15, %v3679_v3  ;;  %v148_v7 = vadd.s32 %v118_v15, %v3686_v5  ;;  %vm1465_vm14 = vcmp.eq.f32.partialorder %v4607_v38, inf }
 0x185   :  { %v2003_v54 = vmul.f32 4.0, %v1971_v16  ;;  %v2036_v19 = vand.u32 2147483647, %v1972_v49  ;;  %v3299_v58 = vshrl.u32 %v978_v6, 16  ;;  %v1073_v46 = vxor.u32 %v3298_v20, %v977_v11  ;;  %v3498_v59 = vpop.eup %3497 }
 0x186   :  { %v2067_v52 = vsub.f32 1.0, %v2035_v12  ;;  %v655_v35 = vadd.f32 0.5, %v623_v62  ;;  %v181_v47 = vadd.s32 %v3715_v18, %v147_v42  ;;  %v182_v8 = vadd.s32 %v3715_v18, %v148_v7 }
 0x187   :  { %v1074_v0 = vxor.u32 %v3299_v58, %v978_v6  ;;  %v3330_v43 = vshrl.u32 %v1073_v46, 8  ;;  %v727_v14 = vadd.s32 %v3727_v21, %v147_v42  ;;  %v728_v63 = vadd.s32 %v3727_v21, %v148_v7 }
 0x188   :  { %v1748_v56 = vand.u32 2147483647, %v4637_v34  ;;  %v656_v45 = vadd.f32 0.5, %v624_v53  ;;  %v3112_v61 = vshrl.u32 %v181_v47, 16  ;;  %v3113_v1 = vshrl.u32 %v182_v8, 16 }
 0x189   :  { %v1464_v26 = vmul.f32 %v3498_v59, %v4607_v38  ;;  %v1779_v57 = vmul.f32 0.225, %v1747_v9  ;;  %v2004_v30 = vmul.f32 4.0, %v1972_v49  ;;  %v3240_v16 = vshrl.u32 %v727_v14, 16 }
 0x18a   :  { %v3331_v50 = vshrl.u32 %v1074_v0, 8  ;;  %v1169_v39 = vcvt.s32.f32 %v3330_v43  ;;  %v277_v4 = vxor.u32 %v3112_v61, %v181_v47  ;;  %v278_v60 = vxor.u32 %v3113_v1, %v182_v8 }
 0x18b   :  { %v3500_v11 = vpop.eup %3499  ;;  %v2068_v12 = vsub.f32 1.0, %v2036_v19  ;;  %v4649_v62 = vmul.f32 %v2067_v52, %v2003_v54  ;;  %v687_v15 = vmul.f32 5.9604645e-08, %v655_v35  ;;  %v3241_v6 = vshrl.u32 %v728_v63, 16 }
 0x18c   :  { %v688_v20 = vmul.f32 5.9604645e-08, %v656_v45  ;;  %v309_v42 = vmul.u32 2246822507, %v277_v4  ;;  %v310_v53 = vmul.u32 2246822507, %v278_v60  ;;  %v823_v7 = vxor.u32 %v3240_v16, %v727_v14  ;;  %v2344_v45 = vpop.permute.xlu0 %2343 }
 0x18d   :  { %vm1467_vm15 = vcmp.eq.f32.partialorder %v4607_v38, 0.0  ;;  %v1468_v9 = vand.u32 2147483648, %v4607_v38  ;;  %v1780_v49 = vmul.f32 0.225, %v1748_v56  ;;  %v1811_v58 = vadd.f32 0.775, %v1779_v57 }
 0x18e   :  { %v1170_v46 = vcvt.s32.f32 %v3331_v50  ;;  %v1201_v59 = vmul.f32 5.9604645e-08, %v1169_v39  ;;  %v3144_v47 = vshrl.u32 %v309_v42, 13  ;;  %v3145_v8 = vshrl.u32 %v310_v53, 13 }
 0x18f   :  { %v1471_v19 = vmul.f32 %v3500_v11, %v4620_v44  ;;  %v4654_v54 = vmul.f32 %v2068_v12, %v2004_v30  ;;  %3501 = vlog2.f32 %v687_v15  ;;  %v824_v52 = vxor.u32 %v3241_v6, %v728_v63  ;;  %v2256_v12 = vld [vmem:[#allocation4 + $0x128] sm:$0xff] }
 0x190   :  { %v1466_v35 = vsel %vm1465_vm14, %v4607_v38, %v1464_v26  ;;  %v2131_v0 = vand.u32 2147483647, %v4649_v62  ;;  %3503 = vlog2.f32 %v688_v20  ;;  %v855_v43 = vmul.u32 2246822507, %v823_v7 }
 0x191   :  { %vm1472_vm0 = vcmp.eq.f32.partialorder %v4620_v44, inf  ;;  %vm1474_vm1 = vcmp.eq.f32.partialorder %v4620_v44, 0.0  ;;  %v405_v14 = vxor.u32 %v3144_v47, %v309_v42  ;;  %v406_v56 = vxor.u32 %v3145_v8, %v310_v53 }
 0x192   :  { %v1475_v61 = vand.u32 2147483648, %v4620_v44  ;;  %v1812_v1 = vadd.f32 0.775, %v1780_v49  ;;  %v1202_v57 = vmul.f32 5.9604645e-08, %v1170_v46  ;;  %v1553_v63 = vmul.f32 2.0, %v1201_v59 }
 0x193   :  { %v1469_v30 = vsel %vm1467_vm15, %v1468_v9, %v1466_v35  ;;  %v1843_v26 = vmul.f32 %v1811_v58, %v4629_v40  ;;  %v2132_v16 = vand.u32 2147483647, %v4654_v54  ;;  %v856_v50 = vmul.u32 2246822507, %v824_v52  ;;  %v2253_v9 = vld [vmem:[#allocation4 + $0x100] sm:$0xff] }
 0x194   :  { %v1473_v39 = vsel %vm1472_vm0, %v4620_v44, %v1471_v19  ;;  %v2163_v4 = vmul.f32 0.225, %v2131_v0  ;;  %v437_v60 = vmul.u32 3266489909, %v405_v14  ;;  %v3272_v11 = vshrl.u32 %v855_v43, 13  ;;  %v2254_v0 = vld [vmem:[#allocation4 + $0x108] sm:$0xff] }
 0x195   :  { %v2286_v15 = vmul.f32 %v4627_v10, %v4624_v28  ;;  %v2830_v6 = vmul.f32 %v4605_v24, %v4624_v28  ;;  %v2397_v38 = vmul.f32 %v2344_v45, %v4631_v17  ;;  %v438_v20 = vmul.u32 3266489909, %v406_v56  ;;  %v2797_v24 = vld [vmem:[#allocation4 + $0x110] sm:$0xff]  ;;  %v4682_v17 = vpop.permute.xlu1 %2358 }
 0x196   :  { %v2861_v40 = vmul.f32 %v4635_v25, %v2344_v45  ;;  %v1844_v42 = vmul.f32 %v1812_v1, %v4637_v34  ;;  %v1554_v53 = vmul.f32 2.0, %v1202_v57  ;;  %v4675_v7 = vadd.f32 -1.0, %v1553_v63  ;;  %v2798_v1 = vld [vmem:[#allocation4 + $0x118] sm:$0xff] }
 0x197   :  { %v1476_v49 = vsel %vm1474_vm1, %v1475_v61, %v1473_v39  ;;  %v2164_v58 = vmul.f32 0.225, %v2132_v16  ;;  %v2835_v46 = vmul.f32 %v1843_v26, %v1469_v30  ;;  %v3273_v10 = vshrl.u32 %v856_v50, 13  ;;  %v2803_v16 = vld [vmem:[#allocation4 + $0x170] sm:$0xff] }
 0x198   :  { %v4680_v59 = vadd.f32 %v4587_v33, %v2256_v12  ;;  %v2195_v28 = vadd.f32 0.775, %v2163_v4  ;;  %v3176_v25 = vshrl.u32 %v437_v60, 16  ;;  %v951_v47 = vxor.u32 %v3272_v11, %v855_v43 }
 0x199   :  { %v3502_v34 = vpop.eup %3501  ;;  %v2398_v8 = vmul.f32 %v2344_v45, %v2286_v15  ;;  %v2862_v19 = vmul.f32 %v2830_v6, %v2344_v45  ;;  %v3177_v52 = vshrl.u32 %v438_v20, 16  ;;  %v77_v35 = vadd.s32 96, %v3677_v2 }
 0x19a   :  { %5747 = vst [vmem:[#allocation35_spill] sm:$0xff] %v4680_v59  ;;  %v3504_v44 = vpop.eup %3503  ;;  %v4685_v14 = vadd.f32 %v2397_v38, %v2253_v9  ;;  %v2836_v56 = vmul.f32 %v1844_v42, %v1476_v49  ;;  %v3363_v61 = vadd.f32 -1.0, %v1554_v53  ;;  %v1873_v33 = vsub.f32 0.5, %v4675_v7 }
 0x19b   :  { %v4688_v57 = vadd.f32 %v2861_v40, %v2797_v24  ;;  %v2196_v63 = vadd.f32 0.775, %v2164_v58  ;;  %v2867_v43 = vmul.f32 %v2835_v46, %v4682_v17  ;;  %v952_v26 = vxor.u32 %v3273_v10, %v856_v50 }
 0x19c   :  { %v2227_v45 = vmul.f32 %v2195_v28, %v4649_v62  ;;  %v1254_v39 = vmul.f32 0.6931472, %v3502_v34  ;;  %v533_v4 = vxor.u32 %v3176_v25, %v437_v60  ;;  %v983_v11 = vmul.u32 3266489909, %v951_v47 }
 0x19d   :  { %v4692_v12 = vadd.f32 %v2398_v8, %v2254_v0  ;;  %v1256_v15 = vmul.f32 0.6931472, %v3504_v44  ;;  %v534_v6 = vxor.u32 %v3177_v52, %v438_v20  ;;  %v117_v38 = vmul.u32 512, %v77_v35 }
 0x19e   :  { %v4694_v42 = vadd.f32 %v2862_v19, %v2798_v1  ;;  %v2868_v40 = vmul.f32 %v2836_v56, %v4682_v17  ;;  %v1874_v53 = vsub.f32 0.5, %v3363_v61  ;;  %v3394_v9 = vadd.f32 -2.0, %v1873_v33 }
 0x19f   :  { %v2228_v58 = vmul.f32 %v2196_v63, %v4654_v54  ;;  %v4698_v50 = vadd.f32 %v2867_v43, %v2803_v16  ;;  %vm1905_vm2 = vcmp.gt.f32.partialorder %v1873_v33, 1.0  ;;  %v984_v62 = vmul.u32 3266489909, %v952_v26 }
 0x1a0   :  { %5748 = vst [vmem:[#allocation36_spill] sm:$0xff] %v4694_v42  ;;  %v2291_v46 = vmul.f32 %v2227_v45, %v1469_v30  ;;  %v4700_v60 = vmul.f32 -2.0, %v1254_v39  ;;  %v3208_v10 = vshrl.u32 %v533_v4, 8  ;;  %v3304_v24 = vshrl.u32 %v983_v11, 16  ;;  %v2804_v39 = vld [vmem:[#allocation4 + $0x178] sm:$0xff] }
 0x1a1   :  { %5749 = vst [vmem:[#allocation37_spill] sm:$0xff] %v4698_v50  ;;  %v4702_v28 = vmul.f32 -2.0, %v1256_v15  ;;  %v3209_v20 = vshrl.u32 %v534_v6, 8  ;;  %v3305_v25 = vshrl.u32 %v984_v62, 16  ;;  %v145_v47 = vadd.s32 %v117_v38, %v3679_v3 }
 0x1a2   :  { %v1649_v34 = vand.u32 2147483647, %v4675_v7  ;;  %v3395_v8 = vadd.f32 -2.0, %v1874_v53  ;;  %v1969_v19 = vsel %vm1905_vm2, %v3394_v9, %v1873_v33  ;;  %v1079_v54 = vxor.u32 %v3304_v24, %v983_v11 }
 0x1a3   :  { %v1650_v52 = vand.u32 2147483647, %v3363_v61  ;;  %vm1906_vm3 = vcmp.gt.f32.partialorder %v1874_v53, 1.0  ;;  %v1080_v35 = vxor.u32 %v3305_v25, %v984_v62  ;;  %v146_v30 = vadd.s32 %v117_v38, %v3686_v5 }
 0x1a4   :  { %v2292_v44 = vmul.f32 %v2228_v58, %v1476_v49  ;;  %3505 = vrsqrt.f32 %v4700_v60  ;;  %v629_v0 = vcvt.s32.f32 %v3208_v10  ;;  %v3336_v56 = vshrl.u32 %v1079_v54, 8 }
 0x1a5   :  { %3507 = vrsqrt.f32 %v4702_v28  ;;  %v1617_v1 = vmul.f32 4.0, %v4675_v7  ;;  %v2033_v63 = vand.u32 2147483647, %v1969_v19  ;;  %v630_v43 = vcvt.s32.f32 %v3209_v20 }
 0x1a6   :  { %v1681_v26 = vsub.f32 1.0, %v1649_v34  ;;  %v1970_v45 = vsel %vm1906_vm3, %v3395_v8, %v1874_v53  ;;  %v3337_v33 = vshrl.u32 %v1080_v35, 8  ;;  %v179_v16 = vadd.s32 %v3715_v18, %v145_v47 }
 0x1a7   :  { %v1618_v4 = vmul.f32 4.0, %v3363_v61  ;;  %v1682_v11 = vsub.f32 1.0, %v1650_v52  ;;  %v1175_v15 = vcvt.s32.f32 %v3336_v56  ;;  %v180_v49 = vadd.s32 %v3715_v18, %v146_v30  ;;  %v2259_v56 = vld [vmem:[#allocation4 + $0x160] sm:$0xff] }
 0x1a8   :  { %v2001_v6 = vmul.f32 4.0, %v1969_v19  ;;  %v661_v38 = vadd.f32 0.5, %v629_v0  ;;  %v3110_v9 = vshrl.u32 %v179_v16, 16  ;;  %v725_v58 = vadd.s32 %v3727_v21, %v145_v47 }
 0x1a9   :  { %v2034_v62 = vand.u32 2147483647, %v1970_v45  ;;  %v2065_v7 = vsub.f32 1.0, %v2033_v63  ;;  %v662_v10 = vadd.f32 0.5, %v630_v43  ;;  %v3111_v24 = vshrl.u32 %v180_v49, 16  ;;  %v2260_v63 = vld [vmem:[#allocation4 + $0x168] sm:$0xff] }
 0x1aa   :  { %v4713_v20 = vadd.f32 %v2868_v40, %v2804_v39  ;;  %v4715_v53 = vmul.f32 %v1681_v26, %v1617_v1  ;;  %v1176_v25 = vcvt.s32.f32 %v3337_v33  ;;  %v275_v34 = vxor.u32 %v3110_v9, %v179_v16 }
 0x1ab   :  { %v4717_v61 = vmul.f32 %v1682_v11, %v1618_v4  ;;  %v1207_v8 = vmul.f32 5.9604645e-08, %v1175_v15  ;;  %v276_v54 = vxor.u32 %v3111_v24, %v180_v49  ;;  %v726_v19 = vadd.s32 %v3727_v21, %v146_v30 }
 0x1ac   :  { %5750 = vst [vmem:[#allocation38_spill] sm:$0xff] %v4713_v20  ;;  %v2403_v52 = vmul.f32 %v4682_v17, %v2291_v46  ;;  %v2404_v47 = vmul.f32 %v4682_v17, %v2292_v44  ;;  %v693_v35 = vmul.f32 5.9604645e-08, %v661_v38  ;;  %v3238_v0 = vshrl.u32 %v725_v58, 16 }
 0x1ad   :  { %v2002_v40 = vmul.f32 4.0, %v1970_v45  ;;  %v2066_v43 = vsub.f32 1.0, %v2034_v62  ;;  %v4722_v1 = vmul.f32 %v2065_v7, %v2001_v6  ;;  %v694_v26 = vmul.f32 5.9604645e-08, %v662_v10 }
 0x1ae   :  { %v3506_v33 = vpop.eup %3505  ;;  %v1745_v16 = vand.u32 2147483647, %v4715_v53  ;;  %v1208_v39 = vmul.f32 5.9604645e-08, %v1176_v25  ;;  %v307_v4 = vmul.u32 2246822507, %v275_v34  ;;  %v4726_v30 = vadd.s32 120, %v3677_v2 }
 0x1af   :  { %v3508_v46 = vpop.eup %3507  ;;  %v1746_v17 = vand.u32 2147483647, %v4717_v61  ;;  %v1559_v44 = vmul.f32 2.0, %v1207_v8  ;;  %v308_v11 = vmul.u32 2246822507, %v276_v54  ;;  %v3239_v15 = vshrl.u32 %v726_v19, 16 }
 0x1b0   :  { %v4729_v49 = vadd.f32 %v2403_v52, %v2259_v56  ;;  %v4731_v45 = vadd.f32 %v2404_v47, %v2260_v63  ;;  %3509 = vlog2.f32 %v693_v35  ;;  %v821_v6 = vxor.u32 %v3238_v0, %v725_v58 }
 0x1b1   :  { %vm1451_vm4 = vcmp.eq.f32.partialorder %v4700_v60, inf  ;;  %v4734_v38 = vmul.f32 %v2066_v43, %v2002_v40  ;;  %v2129_v9 = vand.u32 2147483647, %v4722_v1  ;;  %3511 = vlog2.f32 %v694_v26 }
 0x1b2   :  { %5751 = vst [vmem:[#allocation39_spill] sm:$0xff] %v4729_v49  ;;  %5752 = vst [vmem:[#allocation40_spill] sm:$0xff] %v4731_v45  ;;  %v1450_v62 = vmul.f32 %v3506_v33, %v4700_v60  ;;  %v1777_v7 = vmul.f32 0.225, %v1745_v16  ;;  %v1560_v10 = vmul.f32 2.0, %v1208_v39  ;;  %v3142_v24 = vshrl.u32 %v307_v4, 13 }
 0x1b3   :  { %v1778_v25 = vmul.f32 0.225, %v1746_v17  ;;  %v4738_v34 = vadd.f32 -1.0, %v1559_v44  ;;  %v3143_v8 = vshrl.u32 %v308_v11, 13  ;;  %v822_v54 = vxor.u32 %v3239_v15, %v726_v19 }
 0x1b4   :  { %vm1453_vm5 = vcmp.eq.f32.partialorder %v4700_v60, 0.0  ;;  %v1454_v58 = vand.u32 2147483648, %v4700_v60  ;;  %v1457_v52 = vmul.f32 %v3508_v46, %v4702_v28  ;;  %v853_v47 = vmul.u32 2246822507, %v821_v6 }
 0x1b5   :  { %vm1458_vm6 = vcmp.eq.f32.partialorder %v4702_v28, inf  ;;  %v1461_v35 = vand.u32 2147483648, %v4702_v28  ;;  %v2130_v0 = vand.u32 2147483647, %v4734_v38  ;;  %v2161_v56 = vmul.f32 0.225, %v2129_v9 }
 0x1b6   :  { %v1452_v63 = vsel %vm1451_vm4, %v4700_v60, %v1450_v62  ;;  %v1809_v40 = vadd.f32 0.775, %v1777_v7  ;;  %v3369_v19 = vadd.f32 -1.0, %v1560_v10  ;;  %v403_v43 = vxor.u32 %v3142_v24, %v307_v4 }
 0x1b7   :  { %v1810_v26 = vadd.f32 0.775, %v1778_v25  ;;  %v1879_v33 = vsub.f32 0.5, %v4738_v34  ;;  %v404_v16 = vxor.u32 %v3143_v8, %v308_v11  ;;  %v854_v39 = vmul.u32 2246822507, %v822_v54 }
 0x1b8   :  { %v1459_v46 = vsel %vm1458_vm6, %v4702_v28, %v1457_v52  ;;  %vm1460_vm7 = vcmp.eq.f32.partialorder %v4702_v28, 0.0  ;;  %v435_v17 = vmul.u32 3266489909, %v403_v43  ;;  %v3270_v44 = vshrl.u32 %v853_v47, 13 }
 0x1b9   :  { %v1455_v15 = vsel %vm1453_vm5, %v1454_v58, %v1452_v63  ;;  %v2162_v6 = vmul.f32 0.225, %v2130_v0  ;;  %v2193_v9 = vadd.f32 0.775, %v2161_v56  ;;  %v436_v62 = vmul.u32 3266489909, %v404_v16 }
 0x1ba   :  { %v3510_v7 = vpop.eup %3509  ;;  %v1841_v4 = vmul.f32 %v1809_v40, %v4715_v53  ;;  %v1880_v10 = vsub.f32 0.5, %v3369_v19  ;;  %v3174_v24 = vshrl.u32 %v435_v17, 16  ;;  %v3271_v25 = vshrl.u32 %v854_v39, 13 }
 0x1bb   :  { %v3512_v11 = vpop.eup %3511  ;;  %v1462_v8 = vsel %vm1460_vm7, %v1461_v35, %v1459_v46  ;;  %v1842_v54 = vmul.f32 %v1810_v26, %v4717_v61  ;;  %v3400_v52 = vadd.f32 -2.0, %v1879_v33  ;;  %v949_v28 = vxor.u32 %v3270_v44, %v853_v47 }
 0x1bc   :  { %vm1911_vm8 = vcmp.gt.f32.partialorder %v1879_v33, 1.0  ;;  %v3175_v43 = vshrl.u32 %v436_v62, 16  ;;  %v531_v20 = vxor.u32 %v3174_v24, %v435_v17  ;;  %v950_v60 = vxor.u32 %v3271_v25, %v854_v39 }
 0x1bd   :  { %v2194_v58 = vadd.f32 0.775, %v2162_v6  ;;  %v2225_v0 = vmul.f32 %v2193_v9, %v4722_v1  ;;  %v1266_v56 = vmul.f32 0.6931472, %v3510_v7  ;;  %v981_v63 = vmul.u32 3266489909, %v949_v28 }
 0x1be   :  { %v2833_v16 = vmul.f32 %v1841_v4, %v1455_v15  ;;  %v1268_v53 = vmul.f32 0.6931472, %v3512_v11  ;;  %v1655_v40 = vand.u32 2147483647, %v4738_v34  ;;  %v3401_v50 = vadd.f32 -2.0, %v1880_v10 }
 0x1bf   :  { %vm1912_vm9 = vcmp.gt.f32.partialorder %v1880_v10, 1.0  ;;  %v1975_v35 = vsel %vm1911_vm8, %v3400_v52, %v1879_v33  ;;  %v982_v46 = vmul.u32 3266489909, %v950_v60  ;;  %v3302_v61 = vshrl.u32 %v981_v63, 16  ;;  %v2354_v52 = vpop.permute.xlu0 %2353 }
 0x1c0   :  { %v2834_v26 = vmul.f32 %v1842_v54, %v1462_v8  ;;  %v1656_v47 = vand.u32 2147483647, %v3369_v19  ;;  %v532_v44 = vxor.u32 %v3175_v43, %v436_v62  ;;  %v3206_v45 = vshrl.u32 %v531_v20, 8 }
 0x1c1   :  { %v2226_v39 = vmul.f32 %v2194_v58, %v4734_v38  ;;  %v2289_v17 = vmul.f32 %v2225_v0, %v1455_v15  ;;  %v4759_v6 = vmul.f32 -2.0, %v1266_v56  ;;  %v3303_v1 = vshrl.u32 %v982_v46, 16 }
 0x1c2   :  { %v4761_v9 = vmul.f32 -2.0, %v1268_v53  ;;  %v1623_v7 = vmul.f32 4.0, %v4738_v34  ;;  %v1976_v4 = vsel %vm1912_vm9, %v3401_v50, %v1880_v10  ;;  %v2039_v24 = vand.u32 2147483647, %v1975_v35  ;;  %v2801_v53 = vld [vmem:[#allocation4 + $0x150] sm:$0xff] }
 0x1c3   :  { %v1624_v25 = vmul.f32 4.0, %v3369_v19  ;;  %v1687_v33 = vsub.f32 1.0, %v1655_v40  ;;  %v1077_v11 = vxor.u32 %v3302_v61, %v981_v63  ;;  %v120_v54 = vmul.u32 512, %v4726_v30 }
 0x1c4   :  { %v1688_v62 = vsub.f32 1.0, %v1656_v47  ;;  %v3207_v20 = vshrl.u32 %v532_v44, 8  ;;  %v627_v28 = vcvt.s32.f32 %v3206_v45  ;;  %v1078_v38 = vxor.u32 %v3303_v1, %v982_v46  ;;  %v2257_v1 = vld [vmem:[#allocation4 + $0x140] sm:$0xff] }
 0x1c5   :  { %v2290_v15 = vmul.f32 %v2226_v39, %v1462_v8  ;;  %3513 = vrsqrt.f32 %v4759_v6  ;;  %v2040_v43 = vand.u32 2147483647, %v1976_v4  ;;  %v3334_v60 = vshrl.u32 %v1077_v11, 8  ;;  %v2258_v11 = vld [vmem:[#allocation4 + $0x148] sm:$0xff] }
 0x1c6   :  { %3515 = vrsqrt.f32 %v4761_v9  ;;  %v2007_v34 = vmul.f32 4.0, %v1975_v35  ;;  %v2071_v50 = vsub.f32 1.0, %v2039_v24  ;;  %v3335_v10 = vshrl.u32 %v1078_v38, 8 }
 0x1c7   :  { %v2865_v19 = vmul.f32 %v2833_v16, %v2354_v52  ;;  %v4767_v58 = vmul.f32 %v1687_v33, %v1623_v7  ;;  %v1173_v0 = vcvt.s32.f32 %v3334_v60  ;;  %v151_v30 = vadd.s32 %v120_v54, %v3679_v3  ;;  %v2802_v7 = vld [vmem:[#allocation4 + $0x158] sm:$0xff] }
 0x1c8   :  { %v2866_v56 = vmul.f32 %v2834_v26, %v2354_v52  ;;  %v4770_v63 = vmul.f32 %v1688_v62, %v1624_v25  ;;  %v628_v45 = vcvt.s32.f32 %v3207_v20  ;;  %v659_v8 = vadd.f32 0.5, %v627_v28 }
 0x1c9   :  { %v2008_v40 = vmul.f32 4.0, %v1976_v4  ;;  %v2072_v46 = vsub.f32 1.0, %v2040_v43  ;;  %v152_v61 = vadd.s32 %v120_v54, %v3686_v5  ;;  %v185_v35 = vadd.s32 %v3715_v18, %v151_v30 }
 0x1ca   :  { %v2401_v47 = vmul.f32 %v2354_v52, %v2289_v17  ;;  %v2402_v44 = vmul.f32 %v2354_v52, %v2290_v15  ;;  %v4774_v16 = vmul.f32 %v2071_v50, %v2007_v34  ;;  %v1174_v39 = vcvt.s32.f32 %v3335_v10 }
 0x1cb   :  { %v1751_v26 = vand.u32 2147483647, %v4767_v58  ;;  %v1205_v24 = vmul.f32 5.9604645e-08, %v1173_v0  ;;  %v186_v25 = vadd.s32 %v3715_v18, %v152_v61  ;;  %v3116_v33 = vshrl.u32 %v185_v35, 16 }
 0x1cc   :  { %v4778_v4 = vadd.f32 %v2865_v19, %v2801_v53  ;;  %v1752_v54 = vand.u32 2147483647, %v4770_v63  ;;  %v660_v62 = vadd.f32 0.5, %v628_v45  ;;  %v691_v20 = vmul.f32 5.9604645e-08, %v659_v8 }
 0x1cd   :  { %v4781_v17 = vmul.f32 %v2072_v46, %v2008_v40  ;;  %v3117_v52 = vshrl.u32 %v186_v25, 16  ;;  %v281_v28 = vxor.u32 %v3116_v33, %v185_v35  ;;  %v731_v38 = vadd.s32 %v3727_v21, %v151_v30 }
 0x1ce   :  { %5753 = vst [vmem:[#allocation41_spill] sm:$0xff] %v4778_v4  ;;  %v4784_v15 = vadd.f32 %v2401_v47, %v2257_v1  ;;  %v4786_v43 = vadd.f32 %v2866_v56, %v2802_v7  ;;  %v2135_v60 = vand.u32 2147483647, %v4774_v16  ;;  %v1206_v34 = vmul.f32 5.9604645e-08, %v1174_v39 }
 0x1cf   :  { %v3514_v50 = vpop.eup %3513  ;;  %v4789_v10 = vadd.f32 %v2402_v44, %v2258_v11  ;;  %vm1493_vm10 = vcmp.eq.f32.partialorder %v4759_v6, inf  ;;  %v1783_v19 = vmul.f32 0.225, %v1751_v26  ;;  %v1557_v0 = vmul.f32 2.0, %v1205_v24 }
 0x1d0   :  { %5754 = vst [vmem:[#allocation42_spill] sm:$0xff] %v4784_v15  ;;  %5755 = vst [vmem:[#allocation43_spill] sm:$0xff] %v4786_v43  ;;  %v3516_v45 = vpop.eup %3515  ;;  %v1784_v8 = vmul.f32 0.225, %v1752_v54  ;;  %v692_v53 = vmul.f32 5.9604645e-08, %v660_v62  ;;  %3517 = vlog2.f32 %v691_v20  ;;  %v282_v46 = vxor.u32 %v3117_v52, %v186_v25 }
 0x1d1   :  { %5756 = vst [vmem:[#allocation44_spill] sm:$0xff] %v4789_v10  ;;  %v313_v40 = vmul.u32 2246822507, %v281_v28  ;;  %v2136_v30 = vand.u32 2147483647, %v4781_v17  ;;  %v732_v56 = vadd.s32 %v3727_v21, %v152_v61  ;;  %v3244_v35 = vshrl.u32 %v731_v38, 16 }
 0x1d2   :  { %vm1495_vm11 = vcmp.eq.f32.partialorder %v4759_v6, 0.0  ;;  %vm1500_vm12 = vcmp.eq.f32.partialorder %v4761_v9, inf  ;;  %v2167_v47 = vmul.f32 0.225, %v2135_v60  ;;  %v1558_v44 = vmul.f32 2.0, %v1206_v34 }
 0x1d3   :  { %v1492_v39 = vmul.f32 %v3514_v50, %v4759_v6  ;;  %v1499_v1 = vmul.f32 %v3516_v45, %v4761_v9  ;;  %v1815_v7 = vadd.f32 0.775, %v1783_v19  ;;  %v4798_v26 = vadd.f32 -1.0, %v1557_v0 }
 0x1d4   :  { %v1816_v24 = vadd.f32 0.775, %v1784_v8  ;;  %3519 = vlog2.f32 %v692_v53  ;;  %v3148_v33 = vshrl.u32 %v313_v40, 13  ;;  %v79_v25 = vadd.s32 112, %v3677_v2 }
 0x1d5   :  { %v2168_v61 = vmul.f32 0.225, %v2136_v30  ;;  %v314_v11 = vmul.u32 2246822507, %v282_v46  ;;  %v3245_v54 = vshrl.u32 %v732_v56, 16  ;;  %v827_v62 = vxor.u32 %v3244_v35, %v731_v38 }
 0x1d6   :  { %v1496_v20 = vand.u32 2147483648, %v4759_v6  ;;  %v1503_v52 = vand.u32 2147483648, %v4761_v9  ;;  %v2199_v28 = vadd.f32 0.775, %v2167_v47  ;;  %v3367_v60 = vadd.f32 -1.0, %v1558_v44 }
 0x1d7   :  { %v1494_v34 = vsel %vm1493_vm10, %v4759_v6, %v1492_v39  ;;  %v1501_v50 = vsel %vm1500_vm12, %v4761_v9, %v1499_v1  ;;  %vm1502_vm13 = vcmp.eq.f32.partialorder %v4761_v9, 0.0  ;;  %v1877_v2 = vsub.f32 0.5, %v4798_v26 }
 0x1d8   :  { %v1847_v38 = vmul.f32 %v1815_v7, %v4767_v58  ;;  %v4813_v19 = vmul.f32 %v1816_v24, %v4770_v63  ;;  %v409_v0 = vxor.u32 %v3148_v33, %v313_v40  ;;  %v119_v45 = vmul.u32 512, %v79_v25 }
 0x1d9   :  { %v2200_v8 = vadd.f32 0.775, %v2168_v61  ;;  %v3149_v53 = vshrl.u32 %v314_v11, 13  ;;  %v828_v30 = vxor.u32 %v3245_v54, %v732_v56  ;;  %v859_v46 = vmul.u32 2246822507, %v827_v62 }
 0x1da   :  { %v3518_v35 = vpop.eup %3517  ;;  %v4817_v47 = vsel %vm1495_vm11, %v1496_v20, %v1494_v34  ;;  %v4819_v44 = vsel %vm1502_vm13, %v1503_v52, %v1501_v50  ;;  %v4822_v9 = vmul.f32 %v2199_v28, %v4774_v16  ;;  %v1878_v58 = vsub.f32 0.5, %v3367_v60 }
 0x1db   :  { %v3398_v39 = vadd.f32 -2.0, %v1877_v2  ;;  %v410_v63 = vxor.u32 %v3149_v53, %v314_v11  ;;  %v441_v1 = vmul.u32 3266489909, %v409_v0  ;;  %v860_v40 = vmul.u32 2246822507, %v828_v30 }
 0x1dc   :  { %vm1909_vm14 = vcmp.gt.f32.partialorder %v1877_v2, 1.0  ;;  %v3276_v7 = vshrl.u32 %v859_v46, 13  ;;  %v4825_v56 = vadd.s32 %v119_v45, %v3679_v3  ;;  %v4828_v24 = vadd.s32 %v119_v45, %v3686_v5 }
 0x1dd   :  { %v1262_v6 = vmul.f32 0.6931472, %v3518_v35  ;;  %v442_v33 = vmul.u32 3266489909, %v410_v63  ;;  %v3180_v25 = vshrl.u32 %v441_v1, 16  ;;  %v3277_v61 = vshrl.u32 %v860_v40, 13 }
 0x1de   :  { %v3520_v54 = vpop.eup %3519  ;;  %v1621_v16 = vmul.f32 4.0, %v4798_v26  ;;  %vm1910_vm15 = vcmp.gt.f32.partialorder %v1878_v58, 1.0  ;;  %v3399_v62 = vadd.f32 -2.0, %v1878_v58  ;;  %v955_v11 = vxor.u32 %v3276_v7, %v859_v46 }
 0x1df   :  { %v1973_v20 = vsel %vm1909_vm14, %v3398_v39, %v1877_v2  ;;  %v3181_v52 = vshrl.u32 %v442_v33, 16  ;;  %v537_v28 = vxor.u32 %v3180_v25, %v441_v1  ;;  %v956_v34 = vxor.u32 %v3277_v61, %v860_v40 }
 0x1e0   :  { %v2232_v3 = vmul.f32 %v2200_v8, %v4781_v17  ;;  %v1653_v50 = vand.u32 2147483647, %v4798_v26  ;;  %v1654_v5 = vand.u32 2147483647, %v3367_v60  ;;  %v987_v0 = vmul.u32 3266489909, %v955_v11 }
 0x1e1   :  { %v1264_v45 = vmul.f32 0.6931472, %v3520_v54  ;;  %v4833_v53 = vmul.f32 -2.0, %v1262_v6  ;;  %v538_v30 = vxor.u32 %v3181_v52, %v442_v33  ;;  %v3212_v35 = vshrl.u32 %v537_v28, 8 }
 0x1e2   :  { %v1974_v63 = vsel %vm1910_vm15, %v3399_v62, %v1878_v58  ;;  %v2037_v49 = vand.u32 2147483647, %v1973_v20  ;;  %v988_v22 = vmul.u32 3266489909, %v956_v34  ;;  %v3308_v51 = vshrl.u32 %v987_v0, 16 }
 0x1e3   :  { %v3213_v46 = vshrl.u32 %v538_v30, 8  ;;  %v633_v2 = vcvt.s32.f32 %v3212_v35  ;;  %v183_v39 = vadd.s32 %v3715_v18, %v4825_v56  ;;  %v184_v17 = vadd.s32 %v3715_v18, %v4828_v24  ;;  %v2369_v35 = vpop.permute.xlu1 %2368 }
 0x1e4   :  { %v1622_v26 = vmul.f32 4.0, %v3367_v60  ;;  %v1685_v8 = vsub.f32 1.0, %v1653_v50  ;;  %v1686_v1 = vsub.f32 1.0, %v1654_v5  ;;  %v3309_v40 = vshrl.u32 %v988_v22, 16 }
 0x1e5   :  { %v4839_v7 = vmul.f32 -2.0, %v1264_v45  ;;  %3521 = vrsqrt.f32 %v4833_v53  ;;  %v2005_v58 = vmul.f32 4.0, %v1973_v20  ;;  %v2038_v6 = vand.u32 2147483647, %v1974_v63 }
 0x1e6   :  { %v2069_v33 = vsub.f32 1.0, %v2037_v49  ;;  %v634_v25 = vcvt.s32.f32 %v3213_v46  ;;  %v665_v61 = vadd.f32 0.5, %v633_v2  ;;  %v1083_v54 = vxor.u32 %v3308_v51, %v987_v0 }
 0x1e7   :  { %v2839_v62 = vmul.f32 %v1847_v38, %v4817_v47  ;;  %v1084_v11 = vxor.u32 %v3309_v40, %v988_v22  ;;  %v3114_v52 = vshrl.u32 %v183_v39, 16  ;;  %v3115_v28 = vshrl.u32 %v184_v17, 16 }
 0x1e8   :  { %v2840_v18 = vmul.f32 %v4813_v19, %v4819_v44  ;;  %v4845_v60 = vmul.f32 %v1685_v8, %v1621_v16  ;;  %v4847_v34 = vmul.f32 %v1686_v1, %v1622_v26  ;;  %v3340_v50 = vshrl.u32 %v1083_v54, 8 }
 0x1e9   :  { %3523 = vrsqrt.f32 %v4839_v7  ;;  %v2006_v20 = vmul.f32 4.0, %v1974_v63  ;;  %v2070_v49 = vsub.f32 1.0, %v2038_v6  ;;  %v3341_v5 = vshrl.u32 %v1084_v11, 8  ;;  %v4864_v11 = vpop.permute.xlu0 %2363 }
 0x1ea   :  { %v4850_v45 = vmul.f32 %v2069_v33, %v2005_v58  ;;  %v666_v51 = vadd.f32 0.5, %v634_v25  ;;  %v697_v38 = vmul.f32 5.9604645e-08, %v665_v61  ;;  %v1179_v22 = vcvt.s32.f32 %v3340_v50 }
 0x1eb   :  { %v2295_v0 = vmul.f32 %v4822_v9, %v4817_v47  ;;  %v1180_v30 = vcvt.s32.f32 %v3341_v5  ;;  %v279_v19 = vxor.u32 %v3114_v52, %v183_v39  ;;  %v280_v16 = vxor.u32 %v3115_v28, %v184_v17 }
 0x1ec   :  { %v1749_v46 = vand.u32 2147483647, %v4845_v60  ;;  %v1750_v2 = vand.u32 2147483647, %v4847_v34  ;;  %v1211_v26 = vmul.f32 5.9604645e-08, %v1179_v22  ;;  %v729_v63 = vadd.s32 %v3727_v21, %v4825_v56 }
 0x1ed   :  { %v4858_v8 = vmul.f32 %v2070_v49, %v2006_v20  ;;  %v1212_v1 = vmul.f32 5.9604645e-08, %v1180_v30  ;;  %v311_v40 = vmul.u32 2246822507, %v279_v19  ;;  %v312_v58 = vmul.u32 2246822507, %v280_v16 }
 0x1ee   :  { %v2133_v6 = vand.u32 2147483647, %v4850_v45  ;;  %v698_v47 = vmul.f32 5.9604645e-08, %v666_v51  ;;  %3525 = vlog2.f32 %v697_v38  ;;  %v1563_v9 = vmul.f32 2.0, %v1211_v26  ;;  %v4879_v26 = vpop.permute.xlu1 %2378 }
 0x1ef   :  { %v3522_v39 = vpop.eup %3521  ;;  %v2296_v17 = vmul.f32 %v2232_v3, %v4819_v44  ;;  %v4862_v33 = vmul.f32 %v2839_v62, %v2369_v35  ;;  %v1564_v25 = vmul.f32 2.0, %v1212_v1  ;;  %v3146_v61 = vshrl.u32 %v311_v40, 13 }
 0x1f0   :  { %v1781_v54 = vmul.f32 0.225, %v1749_v46  ;;  %v3147_v56 = vshrl.u32 %v312_v58, 13  ;;  %v730_v52 = vadd.s32 %v3727_v21, %v4828_v24  ;;  %v3242_v28 = vshrl.u32 %v729_v63, 16 }
 0x1f1   :  { %v1782_v50 = vmul.f32 0.225, %v1750_v2  ;;  %v2134_v20 = vand.u32 2147483647, %v4858_v8  ;;  %v3372_v49 = vadd.f32 -1.0, %v1563_v9  ;;  %v407_v5 = vxor.u32 %v3146_v61, %v311_v40 }
 0x1f2   :  { %v4869_v51 = vmul.f32 %v2369_v35, %v2295_v0  ;;  %v4871_v44 = vmul.f32 %v2840_v18, %v2369_v35  ;;  %v2165_v3 = vmul.f32 0.225, %v2133_v6  ;;  %3527 = vlog2.f32 %v698_v47  ;;  %v4884_v6 = vpop.permute.xlu0 %2373 }
 0x1f3   :  { %v3524_v62 = vpop.eup %3523  ;;  %v1478_v38 = vmul.f32 %v3522_v39, %v4833_v53  ;;  %vm1479_vm0 = vcmp.eq.f32.partialorder %v4833_v53, inf  ;;  %v4875_v22 = vadd.f32 -1.0, %v1564_v25  ;;  %v439_v21 = vmul.u32 3266489909, %v407_v5 }
 0x1f4   :  { %v1813_v24 = vadd.f32 0.775, %v1781_v54  ;;  %v408_v30 = vxor.u32 %v3147_v56, %v312_v58  ;;  %v3243_v19 = vshrl.u32 %v730_v52, 16  ;;  %v825_v16 = vxor.u32 %v3242_v28, %v729_v63 }
 0x1f5   :  { %v4877_v46 = vmul.f32 %v2369_v35, %v2296_v17  ;;  %v1814_v0 = vadd.f32 0.775, %v1782_v50  ;;  %v2166_v2 = vmul.f32 0.225, %v2134_v20  ;;  %v1883_v18 = vsub.f32 0.5, %v3372_v49 }
 0x1f6   :  { %vm1481_vm1 = vcmp.eq.f32.partialorder %v4833_v53, 0.0  ;;  %v1482_v1 = vand.u32 2147483648, %v4833_v53  ;;  %vm1486_vm2 = vcmp.eq.f32.partialorder %v4839_v7, inf  ;;  %v2197_v40 = vadd.f32 0.775, %v2165_v3 }
 0x1f7   :  { %v1480_v63 = vsel %vm1479_vm0, %v4833_v53, %v1478_v38  ;;  %v1485_v35 = vmul.f32 %v3524_v62, %v4839_v7  ;;  %v1884_v58 = vsub.f32 0.5, %v4875_v22  ;;  %v3178_v47 = vshrl.u32 %v439_v21, 16 }
 0x1f8   :  { %v3526_v9 = vpop.eup %3525  ;;  %v1489_v39 = vand.u32 2147483648, %v4839_v7  ;;  %v440_v17 = vmul.u32 3266489909, %v408_v30  ;;  %v826_v25 = vxor.u32 %v3243_v19, %v730_v52  ;;  %v857_v61 = vmul.u32 2246822507, %v825_v16  ;;  %v4905_v16 = vpop.permute.xlu0 %2415 }
 0x1f9   :  { %v1845_v54 = vmul.f32 %v1813_v24, %v4845_v60  ;;  %v4894_v56 = vmul.f32 %v1814_v0, %v4847_v34  ;;  %v2198_v28 = vadd.f32 0.775, %v2166_v2  ;;  %v3404_v50 = vadd.f32 -2.0, %v1883_v18  ;;  %v4903_v34 = vpop.permute.xlu1 %2420 }
 0x1fa   :  { %v1483_v20 = vsel %vm1481_vm1, %v1482_v1, %v1480_v63  ;;  %vm1488_vm3 = vcmp.eq.f32.partialorder %v4839_v7, 0.0  ;;  %v2229_v5 = vmul.f32 %v2197_v40, %v4850_v45  ;;  %v1659_v3 = vand.u32 2147483647, %v3372_v49 }
 0x1fb   :  { %vm1915_vm4 = vcmp.gt.f32.partialorder %v1883_v18, 1.0  ;;  %v1487_v52 = vsel %vm1486_vm2, %v4839_v7, %v1485_v35  ;;  %v1274_v62 = vmul.f32 0.6931472, %v3526_v9  ;;  %v3405_v60 = vadd.f32 -2.0, %v1884_v58  ;;  %v4932_v7 = vld [vmem:[#allocation4 + $0x1a0] sm:$0xff] }
 0x1fc   :  { %v535_v38 = vxor.u32 %v3178_v47, %v439_v21  ;;  %v3528_v24 = vpop.eup %3527  ;;  %vm1916_vm5 = vcmp.gt.f32.partialorder %v1884_v58, 1.0  ;;  %v3179_v30 = vshrl.u32 %v440_v17, 16  ;;  %v858_v53 = vmul.u32 2246822507, %v826_v25  ;;  %5759 = vst [vmem:[#allocation47_spill] sm:$0xff] %v4932_v7 }
 0x1fd   :  { %v3274_v19 = vshrl.u32 %v857_v61, 13  ;;  %v1627_v0 = vmul.f32 4.0, %v3372_v49  ;;  %v1660_v45 = vand.u32 2147483647, %v4875_v22  ;;  %v1979_v2 = vsel %vm1915_vm4, %v3404_v50, %v1883_v18  ;;  %v4912_v50 = vpop.permute.xlu1 %2430 }
 0x1fe   :  { %v3210_v1 = vshrl.u32 %v535_v38, 8  ;;  %v1691_v40 = vsub.f32 1.0, %v1659_v3  ;;  %v536_v63 = vxor.u32 %v3179_v30, %v440_v17  ;;  %v3275_v35 = vshrl.u32 %v858_v53, 13  ;;  %v4916_v38 = vpop.permute.xlu0 %2425 }
 0x1ff   :  { %v953_v9 = vxor.u32 %v3274_v19, %v857_v61  ;;  %v1276_v59 = vmul.f32 0.6931472, %v3528_v24  ;;  %v4908_v21 = vmul.f32 -2.0, %v1274_v62  ;;  %v1980_v47 = vsel %vm1916_vm5, %v3405_v60, %v1884_v58 }
 0x200   :  { %v631_v32 = vcvt.s32.f32 %v3210_v1  ;;  %v2043_v43 = vand.u32 2147483647, %v1979_v2  ;;  %v3211_v4 = vshrl.u32 %v536_v63, 8  ;;  %v954_v25 = vxor.u32 %v3275_v35, %v858_v53  ;;  %v4927_v1 = vld [vmem:[#allocation4 + $0x1b8] sm:$0xff] }
 0x201   :  { %v985_v10 = vmul.u32 3266489909, %v953_v9  ;;  %v2230_v15 = vmul.f32 %v2198_v28, %v4858_v8  ;;  %v1628_v49 = vmul.f32 4.0, %v4875_v22  ;;  %v1692_v42 = vsub.f32 1.0, %v1660_v45  ;;  %5758 = vst [vmem:[#allocation46_spill] sm:$0xff] %v4927_v1  ;;  %v4930_v9 = vpop.permute.xlu1 %2440 }
 0x202   :  { %v663_v18 = vadd.f32 0.5, %v631_v32  ;;  %v4914_v17 = vmul.f32 %v1691_v40, %v1627_v0  ;;  %v632_v61 = vcvt.s32.f32 %v3211_v4  ;;  %v986_v3 = vmul.u32 3266489909, %v954_v25  ;;  %v4923_v4 = vld [vmem:[#allocation4 + $0x1b0] sm:$0xff] }
 0x203   :  { %v3306_v62 = vshrl.u32 %v985_v10, 16  ;;  %v4918_v58 = vmul.f32 -2.0, %v1276_v59  ;;  %v2011_v60 = vmul.f32 4.0, %v1979_v2  ;;  %v2044_v24 = vand.u32 2147483647, %v1980_v47  ;;  %5757 = vst [vmem:[#allocation45_spill] sm:$0xff] %v4923_v4 }
 0x204   :  { %v695_v30 = vmul.f32 5.9604645e-08, %v663_v18  ;;  %3529 = vrsqrt.f32 %v4908_v21  ;;  %v2075_v8 = vsub.f32 1.0, %v2043_v43  ;;  %v664_v22 = vadd.f32 0.5, %v632_v61 }
 0x205   :  { %v3307_v28 = vshrl.u32 %v986_v3, 16  ;;  %v1490_v32 = vsel %vm1488_vm3, %v1489_v39, %v1487_v52  ;;  %v2293_v53 = vmul.f32 %v2229_v5, %v1483_v20  ;;  %v1081_v19 = vxor.u32 %v3306_v62, %v985_v10 }
 0x206   :  { %3531 = vlog2.f32 %v695_v30  ;;  %v2837_v0 = vmul.f32 %v1845_v54, %v1483_v20  ;;  %v4925_v45 = vmul.f32 %v1692_v42, %v1628_v49  ;;  %v696_v59 = vmul.f32 5.9604645e-08, %v664_v22  ;;  %v4937_v54 = vpop.permute.xlu0 %2435  ;;  %v4939_v20 = vld [vmem:[#allocation4 + $0x1a8] sm:$0xff]  ;;  %v4951_v49 = vld [vmem:[#allocation4 + $0x180] sm:$0xff] }
 0x207   :  { %v1082_v2 = vxor.u32 %v3307_v28, %v986_v3  ;;  %v1755_v40 = vand.u32 2147483647, %v4914_v17  ;;  %v2012_v43 = vmul.f32 4.0, %v1980_v47  ;;  %v2076_v63 = vsub.f32 1.0, %v2044_v24  ;;  %5760 = vst [vmem:[#allocation48_spill] sm:$0xff] %v4939_v20  ;;  %5763 = vst [vmem:[#allocation51_spill] sm:$0xff] %v4951_v49 }
 0x208   :  { %v3338_v35 = vshrl.u32 %v1081_v19, 8  ;;  %v2294_v10 = vmul.f32 %v2230_v15, %v1490_v32  ;;  %3533 = vrsqrt.f32 %v4918_v58  ;;  %v4935_v39 = vmul.f32 %v2075_v8, %v2011_v60 }
 0x209   :  { %v3339_v42 = vshrl.u32 %v1082_v2, 8  ;;  %v2838_v5 = vmul.f32 %v4894_v56, %v1490_v32  ;;  %v2405_v52 = vmul.f32 %v4864_v11, %v2293_v53  ;;  %3535 = vlog2.f32 %v696_v59  ;;  %v4977_v32 = vpop.permute.xlu1 %2450 }
 0x20a   :  { %v1177_v47 = vcvt.s32.f32 %v3338_v35  ;;  %v4945_v25 = vadd.f32 %v4862_v33, %v4923_v4  ;;  %v4949_v15 = vadd.f32 %v4871_v44, %v4927_v1  ;;  %v1756_v18 = vand.u32 2147483647, %v4925_v45  ;;  %v4981_v59 = vpop.permute.xlu0 %2445 }
 0x20b   :  { %v1178_v61 = vcvt.s32.f32 %v3339_v42  ;;  %v4956_v56 = vadd.f32 %v4869_v51, %v4932_v7  ;;  %v1787_v3 = vmul.f32 0.225, %v1755_v40  ;;  %v4958_v62 = vmul.f32 %v2076_v63, %v2012_v43  ;;  %v5002_v7 = vld [vmem:[#allocation4 + $0x188] sm:$0xff] }
 0x20c   :  { %5761 = vst [vmem:[#allocation49_spill] sm:$0xff] %v4945_v25  ;;  %5762 = vst [vmem:[#allocation50_spill] sm:$0xff] %v4949_v15  ;;  %v1209_v60 = vmul.f32 5.9604645e-08, %v1177_v47  ;;  %v4962_v33 = vadd.f32 %v4877_v46, %v4939_v20  ;;  %v4965_v44 = vmul.f32 %v2837_v0, %v4864_v11  ;;  %v2139_v24 = vand.u32 2147483647, %v4935_v39 }
 0x20d   :  { %5764 = vst [vmem:[#allocation52_spill] sm:$0xff] %v4956_v56  ;;  %v1210_v30 = vmul.f32 5.9604645e-08, %v1178_v61  ;;  %v4969_v8 = vmul.f32 %v4864_v11, %v2294_v10  ;;  %v4972_v51 = vadd.f32 %v2405_v52, %v4951_v49  ;;  %v4975_v22 = vmul.f32 %v2838_v5, %v4864_v11 }
 0x20e   :  { %5765 = vst [vmem:[#allocation53_spill] sm:$0xff] %v4962_v33  ;;  %v1561_v28 = vmul.f32 2.0, %v1209_v60  ;;  %v3530_v46 = vpop.eup %3529  ;;  %vm1521_vm6 = vcmp.eq.f32.partialorder %v4908_v21, inf  ;;  %v1524_v53 = vand.u32 2147483648, %v4908_v21  ;;  %v1788_v19 = vmul.f32 0.225, %v1756_v18 }
 0x20f   :  { %5766 = vst [vmem:[#allocation54_spill] sm:$0xff] %v4972_v51  ;;  %v1562_v0 = vmul.f32 2.0, %v1210_v30  ;;  %vm1523_vm7 = vcmp.eq.f32.partialorder %v4908_v21, 0.0  ;;  %vm1528_vm8 = vcmp.eq.f32.partialorder %v4918_v58, inf  ;;  %v1819_v40 = vadd.f32 0.775, %v1787_v3 }
 0x210   :  { %v3532_v2 = vpop.eup %3531  ;;  %v2140_v11 = vand.u32 2147483647, %v4958_v62  ;;  %v3370_v43 = vadd.f32 -1.0, %v1561_v28  ;;  %v2171_v35 = vmul.f32 0.225, %v2139_v24  ;;  %v1520_v5 = vmul.f32 %v3530_v46, %v4908_v21  ;;  %v5004_v51 = vld [vmem:[#allocation4 + $0x190] sm:$0xff] }
 0x211   :  { %v1270_v10 = vmul.f32 0.6931472, %v3532_v2  ;;  %v3371_v42 = vadd.f32 -1.0, %v1562_v0  ;;  %vm1530_vm9 = vcmp.eq.f32.partialorder %v4918_v58, 0.0  ;;  %v1820_v60 = vadd.f32 0.775, %v1788_v19  ;;  %v4991_v2 = vpop.permute.xlu1 %2460 }
 0x212   :  { %v1625_v52 = vmul.f32 4.0, %v3370_v43  ;;  %v1657_v47 = vand.u32 2147483647, %v3370_v43  ;;  %v1881_v18 = vsub.f32 0.5, %v3370_v43  ;;  %v3534_v61 = vpop.eup %3533  ;;  %v2172_v0 = vmul.f32 0.225, %v2140_v11  ;;  %v4994_v43 = vpop.permute.xlu0 %2455 }
 0x213   :  { %v4989_v30 = vmul.f32 -2.0, %v1270_v10  ;;  %v1658_v3 = vand.u32 2147483647, %v3371_v42  ;;  %v1882_v15 = vsub.f32 0.5, %v3371_v42  ;;  %v3536_v25 = vpop.eup %3535  ;;  %v1626_v28 = vmul.f32 4.0, %v3371_v42 }
 0x214   :  { %v1689_v33 = vsub.f32 1.0, %v1657_v47  ;;  %vm1913_vm10 = vcmp.gt.f32.partialorder %v1881_v18, 1.0  ;;  %v3402_v24 = vadd.f32 -2.0, %v1881_v18  ;;  %v2203_v46 = vadd.f32 0.775, %v2171_v35 }
 0x215   :  { %v1272_v63 = vmul.f32 0.6931472, %v3536_v25  ;;  %3537 = vrsqrt.f32 %v4989_v30  ;;  %v1522_v19 = vsel %vm1521_vm6, %v4908_v21, %v1520_v5  ;;  %v1527_v10 = vmul.f32 %v3534_v61, %v4918_v58 }
 0x216   :  { %v1690_v56 = vsub.f32 1.0, %v1658_v3  ;;  %v1721_v42 = vmul.f32 %v1689_v33, %v1625_v52  ;;  %vm1914_vm11 = vcmp.gt.f32.partialorder %v1882_v15, 1.0  ;;  %v3403_v1 = vadd.f32 -2.0, %v1882_v15 }
 0x217   :  { %v5000_v47 = vmul.f32 -2.0, %v1272_v63  ;;  %v1977_v4 = vsel %vm1913_vm10, %v3402_v24, %v1881_v18  ;;  %v1851_v49 = vmul.f32 %v1819_v40, %v4914_v17  ;;  %v2204_v5 = vadd.f32 0.775, %v2172_v0  ;;  %v5009_v18 = vpop.permute.xlu1 %2470  ;;  %v5016_v40 = vpop.permute.xlu0 %2465 }
 0x218   :  { %v1722_v11 = vmul.f32 %v1690_v56, %v1626_v28  ;;  %v1753_v35 = vand.u32 2147483647, %v1721_v42  ;;  %v2009_v25 = vmul.f32 4.0, %v1977_v4  ;;  %v2041_v20 = vand.u32 2147483647, %v1977_v4 }
 0x219   :  { %v2235_v61 = vmul.f32 %v2203_v46, %v4935_v39  ;;  %3539 = vrsqrt.f32 %v5000_v47  ;;  %v1978_v52 = vsel %vm1914_vm11, %v3403_v1, %v1882_v15  ;;  %v1525_v4 = vsel %vm1523_vm7, %v1524_v53, %v1522_v19  ;;  %v5018_v39 = vld [vmem:[#allocation4 + $0x198] sm:$0xff] }
 0x21a   :  { %v1754_v33 = vand.u32 2147483647, %v1722_v11  ;;  %v1785_v63 = vmul.f32 0.225, %v1753_v35  ;;  %v2073_v3 = vsub.f32 1.0, %v2041_v20  ;;  %v1529_v56 = vsel %vm1528_vm8, %v4918_v58, %v1527_v10 }
 0x21b   :  { %v2010_v28 = vmul.f32 4.0, %v1978_v52  ;;  %v2042_v17 = vand.u32 2147483647, %v1978_v52  ;;  %v5022_v24 = vadd.f32 %v4969_v8, %v5002_v7  ;;  %v5026_v1 = vadd.f32 %v4965_v44, %v5004_v51 }
 0x21c   :  { %v1786_v21 = vmul.f32 0.225, %v1754_v33  ;;  %v2105_v20 = vmul.f32 %v2073_v3, %v2009_v25  ;;  %v1852_v15 = vmul.f32 %v1820_v60, %v4925_v45  ;;  %v2236_v53 = vmul.f32 %v2204_v5, %v4958_v62  ;;  %v5042_v5 = vpop.permute.xlu1 %2480  ;;  %v5044_v3 = vpop.permute.xlu0 %2475 }
 0x21d   :  { %5767 = vst [vmem:[#allocation55_spill] sm:$0xff] %v5022_v24  ;;  %v1817_v0 = vadd.f32 0.775, %v1785_v63  ;;  %v2074_v46 = vsub.f32 1.0, %v2042_v17  ;;  %v5768_v19 = vand.u32 2147483648, %v4918_v58  ;;  %v2299_v35 = vmul.f32 %v2235_v61, %v1525_v4 }
 0x21e   :  { %v2843_v8 = vmul.f32 %v1851_v49, %v1525_v4  ;;  %v2137_v52 = vand.u32 2147483647, %v2105_v20  ;;  %v5036_v44 = vadd.f32 %v4975_v22, %v5018_v39  ;;  %vm1507_vm12 = vcmp.eq.f32.partialorder %v4989_v30, inf }
 0x21f   :  { %v1532_v10 = vsel %vm1530_vm9, %v5768_v19, %v1529_v56  ;;  %v3538_v24 = vpop.eup %3537  ;;  %v1510_v45 = vand.u32 2147483648, %v4989_v30  ;;  %v2106_v62 = vmul.f32 %v2074_v46, %v2010_v28  ;;  %vm1509_vm13 = vcmp.eq.f32.partialorder %v4989_v30, 0.0  ;;  %v5055_v19 = vld [vmem:[#allocation4 + $0x1f0] sm:$0xff] }
 0x220   :  { %v1506_v60 = vmul.f32 %v3538_v24, %v4989_v30  ;;  %v1818_v25 = vadd.f32 0.775, %v1786_v21  ;;  %v2169_v58 = vmul.f32 0.225, %v2137_v52  ;;  %v2300_v49 = vmul.f32 %v2236_v53, %v1532_v10  ;;  %5770 = vst [vmem:[#allocation57_spill] sm:$0xff] %v5055_v19 }
 0x221   :  { %v2844_v61 = vmul.f32 %v1852_v15, %v1532_v10  ;;  %v1849_v33 = vmul.f32 %v1817_v0, %v1721_v42  ;;  %v2138_v63 = vand.u32 2147483647, %v2106_v62  ;;  %v2411_v22 = vmul.f32 %v4879_v26, %v2299_v35  ;;  %v5053_v0 = vld [vmem:[#allocation4 + $0x1e0] sm:$0xff] }
 0x222   :  { %v2875_v4 = vmul.f32 %v2843_v8, %v4879_v26  ;;  %v1508_v56 = vsel %vm1507_vm12, %v4989_v30, %v1506_v60  ;;  %v2201_v28 = vadd.f32 0.775, %v2169_v58  ;;  %vm1514_vm14 = vcmp.eq.f32.partialorder %v5000_v47, inf  ;;  %5769 = vst [vmem:[#allocation56_spill] sm:$0xff] %v5053_v0  ;;  %v3541_v35 = vld [vmem:[#allocation4] sm:$0xff]  ;;  %v3542_v8 = vld [vmem:[#allocation4 + $0x8] sm:$0xff] }
 0x223   :  { %v3540_v17 = vpop.eup %3539  ;;  %v1511_v24 = vsel %vm1509_vm13, %v1510_v45, %v1508_v56  ;;  %v1517_v21 = vand.u32 2147483648, %v5000_v47  ;;  %v2170_v46 = vmul.f32 0.225, %v2138_v63  ;;  %vm1516_vm15 = vcmp.eq.f32.partialorder %v5000_v47, 0.0  ;;  %v3543_v60 = vld [vmem:[#allocation4 + $0x10] sm:$0xff]  ;;  %v5069_v56 = vpop.permute.xlu0 %2485 }
 0x224   :  { %v1513_v15 = vmul.f32 %v3540_v17, %v5000_v47  ;;  %v1850_v42 = vmul.f32 %v1818_v25, %v1722_v11  ;;  %v2233_v53 = vmul.f32 %v2201_v28, %v2105_v20  ;;  %v2841_v30 = vmul.f32 %v1849_v33, %v1511_v24  ;;  %v5061_v11 = vld [vmem:[#allocation4 + $0x18] sm:$0xff]  ;;  %v2544_v20 = vpop.permute.xlu1 %2543 }
 0x225   :  { %v2202_v10 = vadd.f32 0.775, %v2170_v46  ;;  %vm2493_vm0 = vcmp.ge.f32.partialorder %v3541_v35, %v4905_v16  ;;  %vm2494_vm1 = vcmp.ge.f32.partialorder %v3542_v8, %v4905_v16  ;;  %vm2877_vm2 = vcmp.ge.f32.partialorder %v3543_v60, %v4905_v16  ;;  %v5077_v46 = vld [vmem:[#allocation4 + $0x40] sm:$0xff] }
 0x226   :  { %v1515_v52 = vsel %vm1514_vm14, %v5000_v47, %v1513_v15  ;;  %v2297_v45 = vmul.f32 %v2233_v53, %v1511_v24  ;;  %vm2878_vm3 = vcmp.ge.f32.partialorder %v5061_v11, %v4905_v16  ;;  %v2412_v25 = vmul.f32 %v4879_v26, %v2300_v49  ;;  %v5081_v49 = vld [vmem:[#allocation4 + $0x48] sm:$0xff] }
 0x227   :  { %v2876_v58 = vmul.f32 %v2844_v61, %v4879_v26  ;;  %v1518_v33 = vsel %vm1516_vm15, %v1517_v21, %v1515_v52  ;;  %v2234_v63 = vmul.f32 %v2202_v10, %v2106_v62  ;;  %v5072_v28 = vadd.f32 %v2411_v22, %v5053_v0  ;;  %v5085_v26 = vld [vmem:[#allocation4 + $0x50] sm:$0xff]  ;;  %v5089_v47 = vld [vmem:[#allocation4 + $0x1e8] sm:$0xff]  ;;  %v5092_v22 = vld [vmem:[#allocation4 + $0x58] sm:$0xff] }
 0x228   :  { %v5075_v17 = vadd.f32 %v2875_v4, %v5055_v19  ;;  %v2842_v24 = vmul.f32 %v1850_v42, %v1518_v33  ;;  %vm2497_vm4 = vcmp.ge.f32.partialorder %v5077_v46, %v4916_v38  ;;  %vm2498_vm5 = vcmp.ge.f32.partialorder %v5081_v49, %v4916_v38  ;;  %v5096_v4 = vld [vmem:[#allocation4 + $0x1f8] sm:$0xff]  ;;  %v5098_v21 = vld [vmem:[#allocation4 + $0x1d0] sm:$0xff]  ;;  %v5103_v10 = vld [vmem:[#allocation4 + $0x1c0] sm:$0xff]  ;;  %v2554_v0 = vpop.permute.xlu1 %2553 }
 0x229   :  { %5771 = vst [vmem:[#allocation58_spill] sm:$0xff] %v5072_v28  ;;  %vm2881_vm6 = vcmp.ge.f32.partialorder %v5085_v26, %v4916_v38  ;;  %v2298_v62 = vmul.f32 %v2234_v63, %v1518_v33  ;;  %v2873_v61 = vmul.f32 %v2841_v30, %v4884_v6  ;;  %vm2882_vm7 = vcmp.ge.f32.partialorder %v5092_v22, %v4916_v38  ;;  %v5105_v30 = vld [vmem:[#allocation4 + $0x1c8] sm:$0xff]  ;;  %v5107_v52 = vld [vmem:[#allocation4 + $0x1d8] sm:$0xff]  ;;  %v5110_v63 = vld [vmem:[#allocation4 + $0x20] sm:$0xff] }
 0x22a   :  { %5772 = vst [vmem:[#allocation59_spill] sm:$0xff] %v5075_v17  ;;  %vm2621_vm8 = vcmp.le.f32.partialorder %v3541_v35, %v2544_v20  ;;  %v2409_v15 = vmul.f32 %v4884_v6, %v2297_v45  ;;  %v2874_v42 = vmul.f32 %v2842_v24, %v4884_v6  ;;  %vm2622_vm9 = vcmp.le.f32.partialorder %v3542_v8, %v2544_v20  ;;  %v5114_v17 = vld [vmem:[#allocation4 + $0x28] sm:$0xff]  ;;  %v5118_v45 = vld [vmem:[#allocation4 + $0x30] sm:$0xff] }
 0x22b   :  { %v2685_v53 = vsel %vm2621_vm8, %v2544_v20, %v4160_v55  ;;  %v2410_v33 = vmul.f32 %v4884_v6, %v2298_v62  ;;  %vm2495_vm10 = vcmp.ge.f32.partialorder %v5110_v63, %v4903_v34  ;;  %vm2496_vm11 = vcmp.ge.f32.partialorder %v5114_v17, %v4903_v34  ;;  %v5122_v55 = vld [vmem:[#allocation4 + $0x38] sm:$0xff] }
 0x22c   :  { %vm2879_vm12 = vcmp.ge.f32.partialorder %v5118_v45, %v4903_v34  ;;  %vm2880_vm13 = vcmp.ge.f32.partialorder %v5122_v55, %v4903_v34  ;;  %v2686_v6 = vsel %vm2622_vm9, %v2544_v20, %v4165_v41  ;;  %v2717_v24 = vsel %vm2493_vm0, %v4905_v16, %v2685_v53  ;;  %v2549_v53 = vpop.permute.xlu0 %2548 }
 0x22d   :  { %vm2909_vm14 = vcmp.le.f32.partialorder %v3543_v60, %v2544_v20  ;;  %v5131_v62 = vadd.f32 %v2412_v25, %v5089_v47  ;;  %v2718_v28 = vsel %vm2494_vm1, %v4905_v16, %v2686_v6  ;;  %2749 = vst [vmem:[#allocation7] sm:$0xff] %v2717_v24  ;;  %vm2910_vm15 = vcmp.le.f32.partialorder %v5061_v11, %v2544_v20  ;;  %v5157_v24 = vld [vmem:[#allocation4 + $0x80] sm:$0xff]  ;;  %v5169_v60 = vld [vmem:[#allocation4 + $0x98] sm:$0xff] }
 0x22e   :  { %v2973_v19 = vsel %vm2909_vm14, %v2544_v20, %v4168_v13  ;;  %v5139_v41 = vadd.f32 %v2876_v58, %v5096_v4  ;;  %v5142_v35 = vadd.f32 %v2873_v61, %v5098_v21  ;;  %2750 = vst [vmem:[#allocation7 + $0x8] sm:$0xff] %v2718_v28  ;;  %v2974_v25 = vsel %vm2910_vm15, %v2544_v20, %v4170_v48  ;;  %v5161_v48 = vld [vmem:[#allocation4 + $0x88] sm:$0xff]  ;;  %v5185_v11 = vld [vmem:[#allocation4 + $0x60] sm:$0xff] }
 0x22f   :  { %v3005_v8 = vsel %vm2877_vm2, %v4905_v16, %v2973_v19  ;;  %v5149_v6 = vadd.f32 %v2409_v15, %v5103_v10  ;;  %v5152_v13 = vadd.f32 %v2410_v33, %v5105_v30  ;;  %v5155_v58 = vadd.f32 %v2874_v42, %v5107_v52  ;;  %v5165_v19 = vld [vmem:[#allocation4 + $0x90] sm:$0xff] }
 0x230   :  { %vm2501_vm0 = vcmp.ge.f32.partialorder %v5157_v24, %v4937_v54  ;;  %vm2502_vm1 = vcmp.ge.f32.partialorder %v5161_v48, %v4937_v54  ;;  %v3006_v20 = vsel %vm2878_vm3, %v4905_v16, %v2974_v25  ;;  %3037 = vst [vmem:[#allocation7 + $0x10] sm:$0xff] %v3005_v8  ;;  %vm2625_vm9 = vcmp.le.f32.partialorder %v5077_v46, %v2554_v0  ;;  %v5189_v16 = vld [vmem:[#allocation4 + $0x68] sm:$0xff]  ;;  %v5193_v33 = vld [vmem:[#allocation4 + $0x70] sm:$0xff]  ;;  %v2564_v46 = vpop.permute.xlu1 %2563  ;;  %v5774_v25 = vld [vmem:[#allocation17_spill] sm:$0xff] }
 0x231   :  { %3038 = vst [vmem:[#allocation7 + $0x18] sm:$0xff] %v3006_v20  ;;  %vm2626_vm14 = vcmp.le.f32.partialorder %v5081_v49, %v2554_v0  ;;  %vm2913_vm15 = vcmp.le.f32.partialorder %v5085_v26, %v2554_v0  ;;  %vm2914_vm2 = vcmp.le.f32.partialorder %v5092_v22, %v2554_v0  ;;  %v2689_v28 = vsel %vm2625_vm9, %v2554_v0, %v4146_v27  ;;  %v5197_v27 = vld [vmem:[#allocation4 + $0x78] sm:$0xff]  ;;  %v5773_v49 = vld [vmem:[#allocation15_spill] sm:$0xff]  ;;  %v5775_v20 = vld [vmem:[#allocation14_spill] sm:$0xff] }
 0x232   :  { %v2690_v61 = vsel %vm2626_vm14, %v2554_v0, %v4148_v29  ;;  %v2977_v15 = vsel %vm2913_vm15, %v2554_v0, %v4155_v36  ;;  %v2978_v42 = vsel %vm2914_vm2, %v2554_v0, %v4158_v23  ;;  %vm2499_vm3 = vcmp.ge.f32.partialorder %v5185_v11, %v4912_v50 }
 0x233   :  { %vm2500_vm8 = vcmp.ge.f32.partialorder %v5189_v16, %v4912_v50  ;;  %vm2883_vm9 = vcmp.ge.f32.partialorder %v5193_v33, %v4912_v50  ;;  %vm2884_vm2 = vcmp.ge.f32.partialorder %v5197_v27, %v4912_v50  ;;  %v2721_v29 = vsel %vm2497_vm4, %v4916_v38, %v2689_v28 }
 0x234   :  { %v2722_v36 = vsel %vm2498_vm5, %v4916_v38, %v2690_v61  ;;  %v3009_v23 = vsel %vm2881_vm6, %v4916_v38, %v2977_v15  ;;  %v3010_v0 = vsel %vm2882_vm7, %v4916_v38, %v2978_v42  ;;  %2753 = vst [vmem:[#allocation7 + $0x40] sm:$0xff] %v2721_v29  ;;  %vm2623_vm4 = vcmp.le.f32.partialorder %v5110_v63, %v2549_v53  ;;  %v5776_v38 = vld [vmem:[#allocation16_spill] sm:$0xff]  ;;  %v2559_v61 = vpop.permute.xlu0 %2558  ;;  %v5225_v15 = vld [vmem:[#allocation4 + $0xc0] sm:$0xff]  ;;  %v5229_v42 = vld [vmem:[#allocation4 + $0xc8] sm:$0xff] }
 0x235   :  { %2754 = vst [vmem:[#allocation7 + $0x48] sm:$0xff] %v2722_v36  ;;  %3041 = vst [vmem:[#allocation7 + $0x50] sm:$0xff] %v3009_v23  ;;  %vm2624_vm14 = vcmp.le.f32.partialorder %v5114_v17, %v2549_v53  ;;  %vm2911_vm5 = vcmp.le.f32.partialorder %v5118_v45, %v2549_v53  ;;  %vm2912_vm15 = vcmp.le.f32.partialorder %v5122_v55, %v2549_v53  ;;  %v5233_v29 = vld [vmem:[#allocation4 + $0xd0] sm:$0xff]  ;;  %v5237_v36 = vld [vmem:[#allocation4 + $0xd8] sm:$0xff] }
 0x236   :  { %3042 = vst [vmem:[#allocation7 + $0x58] sm:$0xff] %v3010_v0  ;;  %v2687_v26 = vsel %vm2623_vm4, %v2549_v53, %v5773_v49  ;;  %v2688_v8 = vsel %vm2624_vm14, %v2549_v53, %v5774_v25  ;;  %v2975_v22 = vsel %vm2911_vm5, %v2549_v53, %v5775_v20  ;;  %v2976_v28 = vsel %vm2912_vm15, %v2549_v53, %v5776_v38  ;;  %v5777_v17 = vld [vmem:[#allocation24_spill] sm:$0xff]  ;;  %v5778_v45 = vld [vmem:[#allocation25_spill] sm:$0xff]  ;;  %v5779_v25 = vld [vmem:[#allocation22_spill] sm:$0xff] }
 0x237   :  { %vm2505_vm6 = vcmp.ge.f32.partialorder %v5225_v15, %v4981_v59  ;;  %vm2506_vm7 = vcmp.ge.f32.partialorder %v5229_v42, %v4981_v59  ;;  %vm2889_vm4 = vcmp.ge.f32.partialorder %v5233_v29, %v4981_v59  ;;  %vm2890_vm14 = vcmp.ge.f32.partialorder %v5237_v36, %v4981_v59  ;;  %v5780_v55 = vld [vmem:[#allocation23_spill] sm:$0xff]  ;;  %v5265_v20 = vld [vmem:[#allocation4 + $0xa0] sm:$0xff]  ;;  %v5273_v38 = vld [vmem:[#allocation4 + $0xb0] sm:$0xff] }
 0x238   :  { %v2719_v53 = vsel %vm2495_vm10, %v4903_v34, %v2687_v26  ;;  %v2720_v23 = vsel %vm2496_vm11, %v4903_v34, %v2688_v8  ;;  %v3007_v0 = vsel %vm2879_vm12, %v4903_v34, %v2975_v22  ;;  %v3008_v49 = vsel %vm2880_vm13, %v4903_v34, %v2976_v28  ;;  %v5269_v22 = vld [vmem:[#allocation4 + $0xa8] sm:$0xff]  ;;  %v5277_v28 = vld [vmem:[#allocation4 + $0xb8] sm:$0xff] }
 0x239   :  { %2751 = vst [vmem:[#allocation7 + $0x20] sm:$0xff] %v2719_v53  ;;  %2752 = vst [vmem:[#allocation7 + $0x28] sm:$0xff] %v2720_v23  ;;  %vm2629_vm10 = vcmp.le.f32.partialorder %v5157_v24, %v2564_v46  ;;  %vm2630_vm5 = vcmp.le.f32.partialorder %v5161_v48, %v2564_v46  ;;  %vm2917_vm11 = vcmp.le.f32.partialorder %v5165_v19, %v2564_v46  ;;  %v2574_v24 = vpop.permute.xlu1 %2573  ;;  %v5783_v48 = vld [vmem:[#allocation10_spill] sm:$0xff] }
 0x23a   :  { %3039 = vst [vmem:[#allocation7 + $0x30] sm:$0xff] %v3007_v0  ;;  %3040 = vst [vmem:[#allocation7 + $0x38] sm:$0xff] %v3008_v49  ;;  %vm2918_vm15 = vcmp.le.f32.partialorder %v5169_v60, %v2564_v46  ;;  %v2693_v63 = vsel %vm2629_vm10, %v2564_v46, %v5777_v17  ;;  %v2694_v26 = vsel %vm2630_vm5, %v2564_v46, %v5778_v45  ;;  %v5784_v49 = vld [vmem:[#allocation11_spill] sm:$0xff] }
 0x23b   :  { %v2981_v8 = vsel %vm2917_vm11, %v2564_v46, %v5779_v25  ;;  %v2982_v34 = vsel %vm2918_vm15, %v2564_v46, %v5780_v55  ;;  %vm2503_vm12 = vcmp.ge.f32.partialorder %v5265_v20, %v4930_v9  ;;  %vm2504_vm13 = vcmp.ge.f32.partialorder %v5269_v22, %v4930_v9  ;;  %v5305_v25 = vld [vmem:[#allocation4 + $0x100] sm:$0xff]  ;;  %v5313_v55 = vld [vmem:[#allocation4 + $0x110] sm:$0xff] }
 0x23c   :  { %v2725_v46 = vsel %vm2501_vm0, %v4937_v54, %v2693_v63  ;;  %v2726_v53 = vsel %vm2502_vm1, %v4937_v54, %v2694_v26  ;;  %vm5781_vm11 = vcmp.ge.f32.partialorder %v5165_v19, %v4937_v54  ;;  %vm5782_vm15 = vcmp.ge.f32.partialorder %v5169_v60, %v4937_v54  ;;  %v5785_v63 = vld [vmem:[#allocation12_spill] sm:$0xff]  ;;  %v2569_v26 = vpop.permute.xlu0 %2568 }
 0x23d   :  { %v3013_v23 = vsel %vm5781_vm11, %v4937_v54, %v2981_v8  ;;  %v3014_v0 = vsel %vm5782_vm15, %v4937_v54, %v2982_v34  ;;  %2757 = vst [vmem:[#allocation7 + $0x80] sm:$0xff] %v2725_v46  ;;  %2758 = vst [vmem:[#allocation7 + $0x88] sm:$0xff] %v2726_v53  ;;  %vm2627_vm0 = vcmp.le.f32.partialorder %v5185_v11, %v2559_v61  ;;  %v5786_v54 = vld [vmem:[#allocation13_spill] sm:$0xff]  ;;  %v5309_v8 = vld [vmem:[#allocation4 + $0x108] sm:$0xff] }
 0x23e   :  { %3045 = vst [vmem:[#allocation7 + $0x90] sm:$0xff] %v3013_v23  ;;  %3046 = vst [vmem:[#allocation7 + $0x98] sm:$0xff] %v3014_v0  ;;  %vm2628_vm5 = vcmp.le.f32.partialorder %v5189_v16, %v2559_v61  ;;  %vm2915_vm1 = vcmp.le.f32.partialorder %v5193_v33, %v2559_v61  ;;  %vm2916_vm10 = vcmp.le.f32.partialorder %v5197_v27, %v2559_v61  ;;  %v5317_v34 = vld [vmem:[#allocation4 + $0x118] sm:$0xff]  ;;  %v5787_v33 = vld [vmem:[#allocation30_spill] sm:$0xff] }
 0x23f   :  { %v2691_v19 = vsel %vm2627_vm0, %v2559_v61, %v5783_v48  ;;  %v2692_v17 = vsel %vm2628_vm5, %v2559_v61, %v5784_v49  ;;  %v2979_v60 = vsel %vm2915_vm1, %v2559_v61, %v5785_v63  ;;  %v2980_v45 = vsel %vm2916_vm10, %v2559_v61, %v5786_v54  ;;  %v5788_v27 = vld [vmem:[#allocation31_spill] sm:$0xff]  ;;  %v5345_v48 = vld [vmem:[#allocation4 + $0xe0] sm:$0xff]  ;;  %v5353_v49 = vld [vmem:[#allocation4 + $0xf0] sm:$0xff] }
 0x240   :  { %vm2509_vm11 = vcmp.ge.f32.partialorder %v5305_v25, %v4994_v43  ;;  %vm2510_vm15 = vcmp.ge.f32.partialorder %v5309_v8, %v4994_v43  ;;  %vm2893_vm5 = vcmp.ge.f32.partialorder %v5313_v55, %v4994_v43  ;;  %vm2894_vm10 = vcmp.ge.f32.partialorder %v5317_v34, %v4994_v43 }
 0x241   :  { %v2723_v61 = vsel %vm2499_vm3, %v4912_v50, %v2691_v19  ;;  %v2724_v46 = vsel %vm2500_vm8, %v4912_v50, %v2692_v17  ;;  %v3011_v53 = vsel %vm2883_vm9, %v4912_v50, %v2979_v60  ;;  %v3012_v23 = vsel %vm2884_vm2, %v4912_v50, %v2980_v45  ;;  %v5349_v19 = vld [vmem:[#allocation4 + $0xe8] sm:$0xff]  ;;  %v5790_v60 = vld [vmem:[#allocation21_spill] sm:$0xff]  ;;  %v5791_v45 = vld [vmem:[#allocation18_spill] sm:$0xff] }
 0x242   :  { %2755 = vst [vmem:[#allocation7 + $0x60] sm:$0xff] %v2723_v61  ;;  %2756 = vst [vmem:[#allocation7 + $0x68] sm:$0xff] %v2724_v46  ;;  %vm2633_vm3 = vcmp.le.f32.partialorder %v5225_v15, %v2574_v24  ;;  %vm2634_vm0 = vcmp.le.f32.partialorder %v5229_v42, %v2574_v24  ;;  %vm2921_vm8 = vcmp.le.f32.partialorder %v5233_v29, %v2574_v24  ;;  %v2584_v15 = vpop.permute.xlu1 %2583  ;;  %v5789_v42 = vld [vmem:[#allocation19_spill] sm:$0xff]  ;;  %v2579_v46 = vpop.permute.xlu0 %2578 }
 0x243   :  { %3043 = vst [vmem:[#allocation7 + $0x70] sm:$0xff] %v3011_v53  ;;  %3044 = vst [vmem:[#allocation7 + $0x78] sm:$0xff] %v3012_v23  ;;  %vm2922_vm1 = vcmp.le.f32.partialorder %v5237_v36, %v2574_v24  ;;  %v2697_v11 = vsel %vm2633_vm3, %v2574_v24, %v4575_v37  ;;  %v2698_v16 = vsel %vm2634_vm0, %v2574_v24, %v4582_v31  ;;  %v5357_v37 = vld [vmem:[#allocation4 + $0xf8] sm:$0xff]  ;;  %v5385_v53 = vld [vmem:[#allocation4 + $0x140] sm:$0xff] }
 0x244   :  { %v2985_v0 = vsel %vm2921_vm8, %v2574_v24, %v5787_v33  ;;  %v2986_v50 = vsel %vm2922_vm1, %v2574_v24, %v5788_v27  ;;  %vm2507_vm9 = vcmp.ge.f32.partialorder %v5345_v48, %v4977_v32  ;;  %vm2508_vm2 = vcmp.ge.f32.partialorder %v5349_v19, %v4977_v32  ;;  %v5389_v23 = vld [vmem:[#allocation4 + $0x148] sm:$0xff] }
 0x245   :  { %vm2891_vm3 = vcmp.ge.f32.partialorder %v5353_v49, %v4977_v32  ;;  %vm2892_vm0 = vcmp.ge.f32.partialorder %v5357_v37, %v4977_v32  ;;  %v2729_v31 = vsel %vm2505_vm6, %v4981_v59, %v2697_v11  ;;  %v2730_v24 = vsel %vm2506_vm7, %v4981_v59, %v2698_v16  ;;  %v5393_v11 = vld [vmem:[#allocation4 + $0x150] sm:$0xff]  ;;  %v5397_v16 = vld [vmem:[#allocation4 + $0x158] sm:$0xff] }
 0x246   :  { %v3017_v17 = vsel %vm2889_vm4, %v4981_v59, %v2985_v0  ;;  %v3018_v63 = vsel %vm2890_vm14, %v4981_v59, %v2986_v50  ;;  %2761 = vst [vmem:[#allocation7 + $0xc0] sm:$0xff] %v2729_v31  ;;  %2762 = vst [vmem:[#allocation7 + $0xc8] sm:$0xff] %v2730_v24  ;;  %vm2631_vm6 = vcmp.le.f32.partialorder %v5265_v20, %v2569_v26  ;;  %v5792_v59 = vld [vmem:[#allocation20_spill] sm:$0xff]  ;;  %v5425_v50 = vld [vmem:[#allocation4 + $0x120] sm:$0xff] }
 0x247   :  { %3049 = vst [vmem:[#allocation7 + $0xd0] sm:$0xff] %v3017_v17  ;;  %3050 = vst [vmem:[#allocation7 + $0xd8] sm:$0xff] %v3018_v63  ;;  %vm2632_vm8 = vcmp.le.f32.partialorder %v5269_v22, %v2569_v26  ;;  %vm2919_vm7 = vcmp.le.f32.partialorder %v5273_v38, %v2569_v26  ;;  %vm2920_vm1 = vcmp.le.f32.partialorder %v5277_v28, %v2569_v26  ;;  %v5429_v31 = vld [vmem:[#allocation4 + $0x128] sm:$0xff]  ;;  %v5433_v24 = vld [vmem:[#allocation4 + $0x130] sm:$0xff] }
 0x248   :  { %v2695_v29 = vsel %vm2631_vm6, %v2569_v26, %v5789_v42  ;;  %v2696_v54 = vsel %vm2632_vm8, %v2569_v26, %v5790_v60  ;;  %v2983_v36 = vsel %vm2919_vm7, %v2569_v26, %v5791_v45  ;;  %v2984_v61 = vsel %vm2920_vm1, %v2569_v26, %v5792_v59  ;;  %v5800_v45 = vld [vmem:[#allocation51_spill] sm:$0xff] }
 0x249   :  { %vm2513_vm4 = vcmp.ge.f32.partialorder %v5385_v53, %v5016_v40  ;;  %vm2514_vm14 = vcmp.ge.f32.partialorder %v5389_v23, %v5016_v40  ;;  %v2727_v26 = vsel %vm2503_vm12, %v4930_v9, %v2695_v29  ;;  %v2728_v33 = vsel %vm2504_vm13, %v4930_v9, %v2696_v54  ;;  %v5798_v29 = vld [vmem:[#allocation26_spill] sm:$0xff]  ;;  %v2589_v54 = vpop.permute.xlu0 %2588 }
 0x24a   :  { %vm5793_vm7 = vcmp.ge.f32.partialorder %v5273_v38, %v4930_v9  ;;  %vm5794_vm1 = vcmp.ge.f32.partialorder %v5277_v28, %v4930_v9  ;;  %2759 = vst [vmem:[#allocation7 + $0xa0] sm:$0xff] %v2727_v26  ;;  %2760 = vst [vmem:[#allocation7 + $0xa8] sm:$0xff] %v2728_v33  ;;  %vm2637_vm12 = vcmp.le.f32.partialorder %v5305_v25, %v2584_v15  ;;  %v5795_v28 = vld [vmem:[#allocation36_spill] sm:$0xff]  ;;  %v2594_v25 = vpop.permute.xlu1 %2593  ;;  %v5803_v33 = vld [vmem:[#allocation41_spill] sm:$0xff] }
 0x24b   :  { %v3015_v0 = vsel %vm5793_vm7, %v4930_v9, %v2983_v36  ;;  %v3016_v27 = vsel %vm5794_vm1, %v4930_v9, %v2984_v61  ;;  %vm2638_vm8 = vcmp.le.f32.partialorder %v5309_v8, %v2584_v15  ;;  %vm2925_vm13 = vcmp.le.f32.partialorder %v5313_v55, %v2584_v15  ;;  %v5796_v8 = vld [vmem:[#allocation28_spill] sm:$0xff] }
 0x24c   :  { %3047 = vst [vmem:[#allocation7 + $0xb0] sm:$0xff] %v3015_v0  ;;  %3048 = vst [vmem:[#allocation7 + $0xb8] sm:$0xff] %v3016_v27  ;;  %vm2926_vm6 = vcmp.le.f32.partialorder %v5317_v34, %v2584_v15  ;;  %v2701_v20 = vsel %vm2637_vm12, %v2584_v15, %v4685_v14  ;;  %v2702_v22 = vsel %vm2638_vm8, %v2584_v15, %v4692_v12  ;;  %v5437_v14 = vld [vmem:[#allocation4 + $0x138] sm:$0xff]  ;;  %v5497_v27 = vld [vmem:[#allocation4 + $0x160] sm:$0xff] }
 0x24d   :  { %v2989_v38 = vsel %vm2925_vm13, %v2584_v15, %v4688_v57  ;;  %v2990_v9 = vsel %vm2926_vm6, %v2584_v15, %v5795_v28  ;;  %vm2511_vm7 = vcmp.ge.f32.partialorder %v5425_v50, %v4991_v2  ;;  %vm2512_vm1 = vcmp.ge.f32.partialorder %v5429_v31, %v4991_v2  ;;  %v5797_v15 = vld [vmem:[#allocation29_spill] sm:$0xff] }
 0x24e   :  { %v2733_v57 = vsel %vm2509_vm11, %v4994_v43, %v2701_v20  ;;  %v2734_v12 = vsel %vm2510_vm15, %v4994_v43, %v2702_v22  ;;  %v3021_v17 = vsel %vm2893_vm5, %v4994_v43, %v2989_v38  ;;  %v3022_v63 = vsel %vm2894_vm10, %v4994_v43, %v2990_v9  ;;  %v5799_v43 = vld [vmem:[#allocation27_spill] sm:$0xff]  ;;  %v5505_v22 = vld [vmem:[#allocation4 + $0x170] sm:$0xff]  ;;  %v5509_v38 = vld [vmem:[#allocation4 + $0x178] sm:$0xff] }
 0x24f   :  { %2765 = vst [vmem:[#allocation7 + $0x100] sm:$0xff] %v2733_v57  ;;  %2766 = vst [vmem:[#allocation7 + $0x108] sm:$0xff] %v2734_v12  ;;  %vm2635_vm11 = vcmp.le.f32.partialorder %v5345_v48, %v2579_v46  ;;  %vm2636_vm8 = vcmp.le.f32.partialorder %v5349_v19, %v2579_v46  ;;  %vm2923_vm15 = vcmp.le.f32.partialorder %v5353_v49, %v2579_v46  ;;  %v5801_v48 = vld [vmem:[#allocation42_spill] sm:$0xff]  ;;  %v5802_v49 = vld [vmem:[#allocation44_spill] sm:$0xff] }
 0x250   :  { %3053 = vst [vmem:[#allocation7 + $0x110] sm:$0xff] %v3021_v17  ;;  %3054 = vst [vmem:[#allocation7 + $0x118] sm:$0xff] %v3022_v63  ;;  %vm2924_vm13 = vcmp.le.f32.partialorder %v5357_v37, %v2579_v46  ;;  %v2699_v55 = vsel %vm2635_vm11, %v2579_v46, %v5796_v8  ;;  %v2700_v42 = vsel %vm2636_vm8, %v2579_v46, %v5797_v15  ;;  %v5804_v37 = vld [vmem:[#allocation43_spill] sm:$0xff] }
 0x251   :  { %v2987_v34 = vsel %vm2923_vm15, %v2579_v46, %v5798_v29  ;;  %v2988_v60 = vsel %vm2924_vm13, %v2579_v46, %v5799_v43  ;;  %vm2517_vm5 = vcmp.ge.f32.partialorder %v5800_v45, %v5044_v3  ;;  %vm2518_vm10 = vcmp.ge.f32.partialorder %v5002_v7, %v5044_v3  ;;  %v5501_v20 = vld [vmem:[#allocation4 + $0x168] sm:$0xff] }
 0x252   :  { %vm2901_vm6 = vcmp.ge.f32.partialorder %v5004_v51, %v5044_v3  ;;  %vm2902_vm12 = vcmp.ge.f32.partialorder %v5018_v39, %v5044_v3  ;;  %v2731_v36 = vsel %vm2507_vm9, %v4977_v32, %v2699_v55  ;;  %v2732_v59 = vsel %vm2508_vm2, %v4977_v32, %v2700_v42  ;;  %v5808_v17 = vld [vmem:[#allocation35_spill] sm:$0xff]  ;;  %v2599_v55 = vpop.permute.xlu0 %2598 }
 0x253   :  { %v3019_v61 = vsel %vm2891_vm3, %v4977_v32, %v2987_v34  ;;  %v3020_v46 = vsel %vm2892_vm0, %v4977_v32, %v2988_v60  ;;  %2763 = vst [vmem:[#allocation7 + $0xe0] sm:$0xff] %v2731_v36  ;;  %2764 = vst [vmem:[#allocation7 + $0xe8] sm:$0xff] %v2732_v59  ;;  %vm2641_vm9 = vcmp.le.f32.partialorder %v5385_v53, %v2594_v25  ;;  %v2604_v53 = vpop.permute.xlu1 %2603  ;;  %v5817_v36 = vld [vmem:[#allocation45_spill] sm:$0xff]  ;;  %v5818_v59 = vld [vmem:[#allocation46_spill] sm:$0xff] }
 0x254   :  { %3051 = vst [vmem:[#allocation7 + $0xf0] sm:$0xff] %v3019_v61  ;;  %3052 = vst [vmem:[#allocation7 + $0xf8] sm:$0xff] %v3020_v46  ;;  %vm2642_vm11 = vcmp.le.f32.partialorder %v5389_v23, %v2594_v25  ;;  %vm2929_vm2 = vcmp.le.f32.partialorder %v5393_v11, %v2594_v25  ;;  %vm2930_vm8 = vcmp.le.f32.partialorder %v5397_v16, %v2594_v25  ;;  %v5807_v23 = vld [vmem:[#allocation34_spill] sm:$0xff] }
 0x255   :  { %v2705_v19 = vsel %vm2641_vm9, %v2594_v25, %v5801_v48  ;;  %v2706_v26 = vsel %vm2642_vm11, %v2594_v25, %v5802_v49  ;;  %v2993_v0 = vsel %vm2929_vm2, %v2594_v25, %v5803_v33  ;;  %v2994_v32 = vsel %vm2930_vm8, %v2594_v25, %v5804_v37  ;;  %v5809_v25 = vld [vmem:[#allocation32_spill] sm:$0xff]  ;;  %v5821_v49 = vld [vmem:[#allocation37_spill] sm:$0xff] }
 0x256   :  { %vm2515_vm3 = vcmp.ge.f32.partialorder %v5497_v27, %v5009_v18  ;;  %vm2516_vm0 = vcmp.ge.f32.partialorder %v5501_v20, %v5009_v18  ;;  %v2737_v28 = vsel %vm2513_vm4, %v5016_v40, %v2705_v19  ;;  %v2738_v9 = vsel %vm2514_vm14, %v5016_v40, %v2706_v26  ;;  %v5820_v48 = vld [vmem:[#allocation40_spill] sm:$0xff]  ;;  %v2609_v33 = vpop.permute.xlu0 %2608 }
 0x257   :  { %vm5805_vm9 = vcmp.ge.f32.partialorder %v5393_v11, %v5016_v40  ;;  %vm5806_vm11 = vcmp.ge.f32.partialorder %v5397_v16, %v5016_v40  ;;  %2769 = vst [vmem:[#allocation7 + $0x140] sm:$0xff] %v2737_v28  ;;  %2770 = vst [vmem:[#allocation7 + $0x148] sm:$0xff] %v2738_v9  ;;  %vm2639_vm4 = vcmp.le.f32.partialorder %v5425_v50, %v2589_v54  ;;  %v5813_v50 = vld [vmem:[#allocation54_spill] sm:$0xff] }
 0x258   :  { %v3025_v57 = vsel %vm5805_vm9, %v5016_v40, %v2993_v0  ;;  %v3026_v12 = vsel %vm5806_vm11, %v5016_v40, %v2994_v32  ;;  %vm2640_vm2 = vcmp.le.f32.partialorder %v5429_v31, %v2589_v54  ;;  %vm2927_vm14 = vcmp.le.f32.partialorder %v5433_v24, %v2589_v54  ;;  %v5810_v40 = vld [vmem:[#allocation33_spill] sm:$0xff] }
 0x259   :  { %3057 = vst [vmem:[#allocation7 + $0x150] sm:$0xff] %v3025_v57  ;;  %3058 = vst [vmem:[#allocation7 + $0x158] sm:$0xff] %v3026_v12  ;;  %vm2928_vm8 = vcmp.le.f32.partialorder %v5437_v14, %v2589_v54  ;;  %v2703_v11 = vsel %vm2639_vm4, %v2589_v54, %v5807_v23  ;;  %v2704_v63 = vsel %vm2640_vm2, %v2589_v54, %v5808_v17  ;;  %v5829_v57 = vld [vmem:[#allocation49_spill] sm:$0xff] }
 0x25a   :  { %v2991_v16 = vsel %vm2927_vm14, %v2589_v54, %v5809_v25  ;;  %v2992_v8 = vsel %vm2928_vm8, %v2589_v54, %v5810_v40  ;;  %vm2521_vm9 = vcmp.ge.f32.partialorder %v5103_v10, %v5069_v56  ;;  %vm2522_vm11 = vcmp.ge.f32.partialorder %v5105_v30, %v5069_v56  ;;  %v5816_v54 = vld [vmem:[#allocation48_spill] sm:$0xff] }
 0x25b   :  { %v2735_v15 = vsel %vm2511_vm7, %v4991_v2, %v2703_v11  ;;  %v2736_v42 = vsel %vm2512_vm1, %v4991_v2, %v2704_v63  ;;  %vm5811_vm4 = vcmp.ge.f32.partialorder %v5433_v24, %v4991_v2  ;;  %vm5812_vm2 = vcmp.ge.f32.partialorder %v5437_v14, %v4991_v2  ;;  %v5814_v24 = vld [vmem:[#allocation55_spill] sm:$0xff]  ;;  %v5831_v25 = vld [vmem:[#allocation56_spill] sm:$0xff] }
 0x25c   :  { %v3023_v29 = vsel %vm5811_vm4, %v4991_v2, %v2991_v16  ;;  %v3024_v34 = vsel %vm5812_vm2, %v4991_v2, %v2992_v8  ;;  %2767 = vst [vmem:[#allocation7 + $0x120] sm:$0xff] %v2735_v15  ;;  %2768 = vst [vmem:[#allocation7 + $0x128] sm:$0xff] %v2736_v42  ;;  %vm2645_vm7 = vcmp.le.f32.partialorder %v5800_v45, %v2604_v53  ;;  %v5815_v14 = vld [vmem:[#allocation47_spill] sm:$0xff]  ;;  %v5832_v16 = vld [vmem:[#allocation57_spill] sm:$0xff] }
 0x25d   :  { %3055 = vst [vmem:[#allocation7 + $0x130] sm:$0xff] %v3023_v29  ;;  %3056 = vst [vmem:[#allocation7 + $0x138] sm:$0xff] %v3024_v34  ;;  %vm2646_vm14 = vcmp.le.f32.partialorder %v5002_v7, %v2604_v53  ;;  %vm2933_vm1 = vcmp.le.f32.partialorder %v5004_v51, %v2604_v53  ;;  %vm2934_vm8 = vcmp.le.f32.partialorder %v5018_v39, %v2604_v53  ;;  %v2614_v7 = vpop.permute.xlu1 %2613  ;;  %v5819_v51 = vld [vmem:[#allocation39_spill] sm:$0xff] }
 0x25e   :  { %v2709_v31 = vsel %vm2645_vm7, %v2604_v53, %v5813_v50  ;;  %v2710_v43 = vsel %vm2646_vm14, %v2604_v53, %v5814_v24  ;;  %v2997_v60 = vsel %vm2933_vm1, %v2604_v53, %v5026_v1  ;;  %v2998_v2 = vsel %vm2934_vm8, %v2604_v53, %v5036_v44  ;;  %v2619_v53 = vpop.permute.xlu0 %2618 }
 0x25f   :  { %vm2519_vm4 = vcmp.ge.f32.partialorder %v5815_v14, %v5042_v5  ;;  %vm2520_vm2 = vcmp.ge.f32.partialorder %v5816_v54, %v5042_v5  ;;  %vm2903_vm15 = vcmp.ge.f32.partialorder %v5817_v36, %v5042_v5  ;;  %vm2904_vm13 = vcmp.ge.f32.partialorder %v5818_v59, %v5042_v5 }
 0x260   :  { %v2741_v61 = vsel %vm2517_vm5, %v5044_v3, %v2709_v31  ;;  %v2742_v1 = vsel %vm2518_vm10, %v5044_v3, %v2710_v43  ;;  %v3029_v44 = vsel %vm2901_vm6, %v5044_v3, %v2997_v60  ;;  %v3030_v46 = vsel %vm2902_vm12, %v5044_v3, %v2998_v2  ;;  %v5822_v3 = vld [vmem:[#allocation38_spill] sm:$0xff] }
 0x261   :  { %2773 = vst [vmem:[#allocation7 + $0x180] sm:$0xff] %v2741_v61  ;;  %2774 = vst [vmem:[#allocation7 + $0x188] sm:$0xff] %v2742_v1  ;;  %vm2643_vm5 = vcmp.le.f32.partialorder %v5497_v27, %v2599_v55  ;;  %vm2644_vm7 = vcmp.le.f32.partialorder %v5501_v20, %v2599_v55  ;;  %vm2931_vm10 = vcmp.le.f32.partialorder %v5505_v22, %v2599_v55 }
 0x262   :  { %3061 = vst [vmem:[#allocation7 + $0x190] sm:$0xff] %v3029_v44  ;;  %3062 = vst [vmem:[#allocation7 + $0x198] sm:$0xff] %v3030_v46  ;;  %vm2932_vm14 = vcmp.le.f32.partialorder %v5509_v38, %v2599_v55  ;;  %v2707_v45 = vsel %vm2643_vm5, %v2599_v55, %v5819_v51  ;;  %v2708_v19 = vsel %vm2644_vm7, %v2599_v55, %v5820_v48 }
 0x263   :  { %v2995_v39 = vsel %vm2931_vm10, %v2599_v55, %v5821_v49  ;;  %v2996_v26 = vsel %vm2932_vm14, %v2599_v55, %v5822_v3  ;;  %v2739_v0 = vsel %vm2515_vm3, %v5009_v18, %v2707_v45  ;;  %v2740_v37 = vsel %vm2516_vm0, %v5009_v18, %v2708_v19  ;;  %v5834_v55 = vld [vmem:[#allocation59_spill] sm:$0xff] }
 0x264   :  { %vm5823_vm12 = vcmp.ge.f32.partialorder %v5505_v22, %v5009_v18  ;;  %vm5824_vm6 = vcmp.ge.f32.partialorder %v5509_v38, %v5009_v18  ;;  %2771 = vst [vmem:[#allocation7 + $0x160] sm:$0xff] %v2739_v0  ;;  %2772 = vst [vmem:[#allocation7 + $0x168] sm:$0xff] %v2740_v37  ;;  %vm2649_vm3 = vcmp.le.f32.partialorder %v5103_v10, %v2614_v7  ;;  %v2491_v10 = vpop.permute.xlu1 %2490 }
 0x265   :  { %v3027_v32 = vsel %vm5823_vm12, %v5009_v18, %v2995_v39  ;;  %v3028_v28 = vsel %vm5824_vm6, %v5009_v18, %v2996_v26  ;;  %vm2650_vm1 = vcmp.le.f32.partialorder %v5105_v30, %v2614_v7  ;;  %vm2937_vm0 = vcmp.le.f32.partialorder %v5098_v21, %v2614_v7 }
 0x266   :  { %3059 = vst [vmem:[#allocation7 + $0x170] sm:$0xff] %v3027_v32  ;;  %3060 = vst [vmem:[#allocation7 + $0x178] sm:$0xff] %v3028_v28  ;;  %vm2938_vm8 = vcmp.le.f32.partialorder %v5107_v52, %v2614_v7  ;;  %v2713_v27 = vsel %vm2649_vm3, %v2614_v7, %v5149_v6  ;;  %v2714_v20 = vsel %vm2650_vm1, %v2614_v7, %v5152_v13  ;;  %v5828_v13 = vld [vmem:[#allocation53_spill] sm:$0xff] }
 0x267   :  { %v3001_v22 = vsel %vm2937_vm0, %v2614_v7, %v5142_v35  ;;  %v3002_v18 = vsel %vm2938_vm8, %v2614_v7, %v5155_v58  ;;  %v2745_v38 = vsel %vm2521_vm9, %v5069_v56, %v2713_v27  ;;  %v2746_v9 = vsel %vm2522_vm11, %v5069_v56, %v2714_v20 }
 0x268   :  { %vm5825_vm5 = vcmp.ge.f32.partialorder %v5098_v21, %v5069_v56  ;;  %vm5826_vm7 = vcmp.ge.f32.partialorder %v5107_v52, %v5069_v56  ;;  %2777 = vst [vmem:[#allocation7 + $0x1c0] sm:$0xff] %v2745_v38  ;;  %2778 = vst [vmem:[#allocation7 + $0x1c8] sm:$0xff] %v2746_v9  ;;  %vm2647_vm9 = vcmp.le.f32.partialorder %v5815_v14, %v2609_v33  ;;  %v5827_v21 = vld [vmem:[#allocation52_spill] sm:$0xff] }
 0x269   :  { %v3033_v6 = vsel %vm5825_vm5, %v5069_v56, %v3001_v22  ;;  %v3034_v35 = vsel %vm5826_vm7, %v5069_v56, %v3002_v18  ;;  %vm2648_vm10 = vcmp.le.f32.partialorder %v5816_v54, %v2609_v33  ;;  %vm2935_vm11 = vcmp.le.f32.partialorder %v5817_v36, %v2609_v33  ;;  %v5830_v56 = vld [vmem:[#allocation50_spill] sm:$0xff] }
 0x26a   :  { %3065 = vst [vmem:[#allocation7 + $0x1d0] sm:$0xff] %v3033_v6  ;;  %3066 = vst [vmem:[#allocation7 + $0x1d8] sm:$0xff] %v3034_v35  ;;  %vm2936_vm14 = vcmp.le.f32.partialorder %v5818_v59, %v2609_v33  ;;  %v2711_v30 = vsel %vm2647_vm9, %v2609_v33, %v5827_v21  ;;  %v2712_v58 = vsel %vm2648_vm10, %v2609_v33, %v5828_v13 }
 0x26b   :  { %v2999_v52 = vsel %vm2935_vm11, %v2609_v33, %v5829_v57  ;;  %v3000_v12 = vsel %vm2936_vm14, %v2609_v33, %v5830_v56  ;;  %v2743_v23 = vsel %vm2519_vm4, %v5042_v5, %v2711_v30  ;;  %v2744_v11 = vsel %vm2520_vm2, %v5042_v5, %v2712_v58 }
 0x26c   :  { %v3031_v17 = vsel %vm2903_vm15, %v5042_v5, %v2999_v52  ;;  %v3032_v63 = vsel %vm2904_vm13, %v5042_v5, %v3000_v12  ;;  %2775 = vst [vmem:[#allocation7 + $0x1a0] sm:$0xff] %v2743_v23  ;;  %2776 = vst [vmem:[#allocation7 + $0x1a8] sm:$0xff] %v2744_v11  ;;  %vm2523_vm4 = vcmp.ge.f32.partialorder %v5831_v25, %v2491_v10  ;;  %v5833_v5 = vld [vmem:[#allocation58_spill] sm:$0xff] }
 0x26d   :  { %3063 = vst [vmem:[#allocation7 + $0x1b0] sm:$0xff] %v3031_v17  ;;  %3064 = vst [vmem:[#allocation7 + $0x1b8] sm:$0xff] %v3032_v63  ;;  %vm2524_vm2 = vcmp.ge.f32.partialorder %v5089_v47, %v2491_v10  ;;  %vm2907_vm12 = vcmp.ge.f32.partialorder %v5832_v16, %v2491_v10  ;;  %vm2908_vm6 = vcmp.ge.f32.partialorder %v5096_v4, %v2491_v10 }
 0x26e   :  { %vm2651_vm15 = vcmp.le.f32.partialorder %v5831_v25, %v2619_v53  ;;  %vm2652_vm3 = vcmp.le.f32.partialorder %v5089_v47, %v2619_v53  ;;  %vm2939_vm13 = vcmp.le.f32.partialorder %v5832_v16, %v2619_v53  ;;  %vm2940_vm1 = vcmp.le.f32.partialorder %v5096_v4, %v2619_v53 }
 0x26f   :  { %v2715_v40 = vsel %vm2651_vm15, %v2619_v53, %v5833_v5  ;;  %v2716_v8 = vsel %vm2652_vm3, %v2619_v53, %v5131_v62  ;;  %v3003_v15 = vsel %vm2939_vm13, %v2619_v53, %v5834_v55  ;;  %v3004_v42 = vsel %vm2940_vm1, %v2619_v53, %v5139_v41 }
 0x270   :  { %v2747_v29 = vsel %vm2523_vm4, %v2491_v10, %v2715_v40  ;;  %v2748_v34 = vsel %vm2524_vm2, %v2491_v10, %v2716_v8  ;;  %v3035_v50 = vsel %vm2907_vm12, %v2491_v10, %v3003_v15  ;;  %v3036_v31 = vsel %vm2908_vm6, %v2491_v10, %v3004_v42 }
 0x271   :  { %2779 = vst [vmem:[#allocation7 + $0x1e0] sm:$0xff] %v2747_v29  ;;  %2780 = vst [vmem:[#allocation7 + $0x1e8] sm:$0xff] %v2748_v34 }
 0x272   :  { %3067 = vst [vmem:[#allocation7 + $0x1f0] sm:$0xff] %v3035_v50  ;;  %3068 = vst [vmem:[#allocation7 + $0x1f8] sm:$0xff] %v3036_v31 }
 0x273   :  { %3622 = shalt.err (!%p3619_p12)
}
 0x274   :  { %s3623_s11 = scalar_lea.hbm %s5695_s3, 8192 }
 0x275   :  { %p3624_p13 = scmp.ne.s32.totalorder %s5695_s3, %s3623_s11  ;;  %p3627_p0 = scmp.lt.u32.totalorder %s3623_s11, %s5695_s3 }
 0x277   :  { %p3629_p1 = pnand %p3627_p0, %p3624_p13 }
 0x279   :  { %3632 = shalt.err (!%p3629_p1)
}
 0x27a   :  { %3080 = dma.vmem_to_hbm [thread:$0]  %s3075_s7, 8192, %s5695_s3, [#allocation6], %s3638_s22, %s3638_s22, %s3639_s23  }
 0x27b   :  { %3635 = dma.done.wait [#allocation6], 8192  }
 0x27c   :  { %3636 = vsyncadd [#allocation6], 4294959104 }
 0x27d   :  { %3084 = vsyncpa [#allocation5], 1 }
 0x27e   :  { %3085 = vsyncpa [#allocation6], 1 }

</bundles_post_ra>
